<compile_context>
chip_gen: v6e
topology: v6e:2x2x1
jax: 0.10.0
libtpu: 0.0.40
codegen_flags: <defaults>
</compile_context>

<pallas_src>
import numpy as np
import jax
import jax.numpy as jnp
from jax.experimental import pallas as pl
from jax.experimental.pallas import tpu as pltpu

# ----------------------------- configuration --------------------------------
NUM_LABELS = 8
FULL_RES = (16, 16, 16)


def _half(n):
    return (n + 1) // 2


HALF_RES = tuple(_half(v) for v in FULL_RES)
QUARTER_RES = tuple(_half(v) for v in HALF_RES)


# ----------------------------- Pallas kernel --------------------------------
def obelisk_head_kernel(x_ref, w1_ref, w2_ref, wd_ref, w4_ref, bias_ref,
                        o_ref, cat_sc):
    f32 = jnp.float32
    bf16 = jnp.bfloat16
    tm = x_ref.shape[0]

    # ---- LIN1 grouped conv (1024 -> 256, groups=4) + folded BN1 + ReLU ------
    # ---- LIN2 (256 -> 128) + folded BN2, accumulated per group --------------
    x2 = None
    for g in range(4):
        yg = jnp.dot(x_ref[:, g * 256:(g + 1) * 256], w1_ref[g],
                     preferred_element_type=f32)                   # (tm, 64)
        yg = jnp.maximum(yg + bias_ref[0:1, g * 64:(g + 1) * 64], 0.0)
        part = jnp.dot(yg.astype(bf16), w2_ref[g * 64:(g + 1) * 64, :],
                       preferred_element_type=f32)                 # (tm, 128)
        x2 = part if x2 is None else x2 + part
    x2 = x2 + bias_ref[1:2, 0:128]                                 # f32

    # ---- dense block via (tm, 256) channel-concat scratch -------------------
    # layout of cat_sc columns: [0:128]=x2, [128:160]=a, [160:192]=b,
    #                           [192:224]=c, [224:256]=d
    cat_sc[:, 0:128] = x2.astype(bf16)
    # Zero every step: keeps 0-weight padded rows away from stale/NaN VMEM
    # (each TensorCore has its own scratch, so do not gate on program_id).
    cat_sc[:, 128:256] = jnp.zeros((tm, 128), bf16)

    a = jnp.maximum(
        jnp.dot(cat_sc[...], wd_ref[0], preferred_element_type=f32), 0.0)
    cat_sc[:, 128:160] = a.astype(bf16)

    b = jnp.maximum(
        jnp.dot(cat_sc[...], wd_ref[1], preferred_element_type=f32)
        + bias_ref[3:4, 0:32], 0.0)
    cat_sc[:, 160:192] = b.astype(bf16)

    c = jnp.maximum(
        jnp.dot(cat_sc[...], wd_ref[2], preferred_element_type=f32)
        + bias_ref[4:5, 0:32], 0.0)
    cat_sc[:, 192:224] = c.astype(bf16)

    d = jnp.maximum(
        jnp.dot(cat_sc[...], wd_ref[3], preferred_element_type=f32)
        + bias_ref[5:6, 0:32], 0.0)
    cat_sc[:, 224:256] = d.astype(bf16)

    # ---- LIN4 + folded BN3d, lane-dense 128-wide (padded) output ------------
    o_ref[...] = (jnp.dot(cat_sc[...], w4_ref[...], preferred_element_type=f32)
                  + bias_ref[2:3, 0:128])


def obelisk_head(x_flat, p, num_labels, tm=None):
    """x_flat: (rows, 1024) -> (rows, num_labels) via the Pallas kernel."""
    rows, c_in = x_flat.shape
    assert c_in == 1024
    assert num_labels <= 128
    if tm is None:
        if rows >= 2048:
            tm = 1024
        elif rows >= 512:
            tm = 512
        else:
            tm = 128
    rows_pad = pl.cdiv(rows, tm) * tm
    x_p = jnp.pad(x_flat, ((0, rows_pad - rows), (0, 0))).astype(jnp.bfloat16)

    w1 = p['w1g'].astype(jnp.bfloat16)     # (4, 256, 64)  grouped LIN1
    w2 = p['w2'].astype(jnp.bfloat16)      # (256, 128)
    wd = p['wd'].astype(jnp.bfloat16)      # (4, 256, 32)  K-padded LIN3a..d
    w4 = p['w4p'].astype(jnp.bfloat16)     # (256, 128)    lane-padded LIN4
    bias = p['bias']                       # (8, 256) f32  packed biases

    out = pl.pallas_call(
        obelisk_head_kernel,
        out_shape=jax.ShapeDtypeStruct((rows_pad, 128), jnp.float32),
        grid_spec=pltpu.PrefetchScalarGridSpec(
            num_scalar_prefetch=0,
            grid=(rows_pad // tm,),
            in_specs=[
                pl.BlockSpec((tm, 1024), lambda i: (i, 0)),
                pl.BlockSpec((4, 256, 64), lambda i: (0, 0, 0)),
                pl.BlockSpec((256, 128), lambda i: (0, 0)),
                pl.BlockSpec((4, 256, 32), lambda i: (0, 0, 0)),
                pl.BlockSpec((256, 128), lambda i: (0, 0)),
                pl.BlockSpec((8, 256), lambda i: (0, 0)),
            ],
            out_specs=pl.BlockSpec((tm, 128), lambda i: (i, 0)),
            scratch_shapes=[pltpu.VMEM((tm, 256), jnp.bfloat16)],
        ),
        compiler_params=pltpu.CompilerParams(
            dimension_semantics=("parallel",)),
    )(x_p, w1, w2, wd, w4, bias)
    return out[:rows, :num_labels]


# ----------------------------- parameters -----------------------------------
def init_params(key, num_labels):
    ks = jax.random.split(key, 9)
    eps = 1e-5

    def bn_fold(c):
        gamma = jnp.ones((c,), jnp.float32)
        beta = jnp.zeros((c,), jnp.float32)
        mean = jnp.zeros((c,), jnp.float32)
        var = jnp.ones((c,), jnp.float32)
        s = gamma / jnp.sqrt(var + eps)
        t = beta - mean * s
        return s, t

    # offset1: torch.randn(1, 1024, 1, 2, 3) * 0.05 (singleton dims dropped)
    offset1 = jax.random.normal(ks[0], (1024, 2, 3), jnp.float32) * 0.05

    # LIN1: Conv3d(1024, 256, 1, groups=4) -> per-group (in=256, out=64),
    # BN1 scale folded into the weights, BN1 shift kept as bias t1.
    w1g_raw = jax.random.normal(ks[1], (4, 256, 64), jnp.float32) / np.sqrt(256.0)
    s1, t1 = bn_fold(256)
    w1g = w1g_raw * s1.reshape(4, 1, 64)

    # LIN2 + BN2 (no relu)
    w2_raw = jax.random.normal(ks[2], (256, 128), jnp.float32) / np.sqrt(256.0)
    s2, t2 = bn_fold(128)
    w2 = w2_raw * s2[None, :]

    # Dense block (BN folded into weights per input channel; biases = t @ W).
    w3a = jax.random.normal(ks[3], (128, 32), jnp.float32) / np.sqrt(128.0)

    s3a, t3a = bn_fold(160)
    w3b_raw = jax.random.normal(ks[4], (160, 32), jnp.float32) / np.sqrt(160.0)
    w3b = w3b_raw * s3a[:, None]
    bb = t3a @ w3b_raw

    s3b, t3b = bn_fold(192)
    w3c_raw = jax.random.normal(ks[5], (192, 32), jnp.float32) / np.sqrt(192.0)
    w3c = w3c_raw * s3b[:, None]
    bc = t3b @ w3c_raw

    s3c, t3c = bn_fold(224)
    w3d_raw = jax.random.normal(ks[6], (224, 32), jnp.float32) / np.sqrt(224.0)
    w3d = w3d_raw * s3c[:, None]
    bd = t3c @ w3d_raw

    s3d, t3d = bn_fold(256)
    w4_raw = jax.random.normal(ks[7], (256, num_labels), jnp.float32) / np.sqrt(256.0)
    b4_raw = jax.random.normal(ks[8], (num_labels,), jnp.float32) * 0.01
    w4 = w4_raw * s3d[:, None]
    b4 = b4_raw + t3d @ w4_raw

    # Pack dense-block weights zero-padded to K=256 -> one (4, 256, 32) slab.
    def pad_k(w):
        return jnp.pad(w, ((0, 256 - w.shape[0]), (0, 0)))
    wd = jnp.stack([pad_k(w3a), pad_k(w3b), pad_k(w3c), pad_k(w3d)], axis=0)

    # Output weights / bias padded to a lane-dense 128 columns.
    w4p = jnp.pad(w4, ((0, 0), (0, 128 - num_labels)))
    b4p = jnp.pad(b4, (0, 128 - num_labels))

    # All biases packed into one (8, 256) f32 slab (lane-prefix slices in-kernel):
    #  row0: t1(256)  row1: t2(128)  row2: b4(128)  row3: bb  row4: bc  row5: bd
    bias = jnp.zeros((8, 256), jnp.float32)
    bias = bias.at[0, :].set(t1)
    bias = bias.at[1, 0:128].set(t2)
    bias = bias.at[2, 0:128].set(b4p)
    bias = bias.at[3, 0:32].set(bb)
    bias = bias.at[4, 0:32].set(bc)
    bias = bias.at[5, 0:32].set(bd)

    return dict(offset1=offset1, w1g=w1g, w2=w2, wd=wd, w4p=w4p, bias=bias)


# ----------------------------- JAX glue ops ----------------------------------
def identity_grid(d, h, w):
    """F.affine_grid(eye(3,4), (1,1,d,h,w)) with align_corners=False, flattened."""
    def lin(n):
        return (2.0 * jnp.arange(n, dtype=jnp.float32) + 1.0) / n - 1.0
    zz, yy, xx = jnp.meshgrid(lin(d), lin(h), lin(w), indexing='ij')
    return jnp.stack([xx, yy, zz], axis=-1).reshape(-1, 3)   # (d*h*w, 3) as (x,y,z)


def grid_sample_3d(vol, coords):
    """F.grid_sample 5D semantics: trilinear, zeros padding, align_corners=False.
    vol: (B, D, H, W); coords: (K, N, 3) normalized (x, y, z) shared across batch.
    Returns (B, K, N)."""
    b, d, h, w = vol.shape
    x = coords[..., 0]
    y = coords[..., 1]
    z = coords[..., 2]
    ix = ((x + 1.0) * w - 1.0) * 0.5
    iy = ((y + 1.0) * h - 1.0) * 0.5
    iz = ((z + 1.0) * d - 1.0) * 0.5
    ix0 = jnp.floor(ix)
    iy0 = jnp.floor(iy)
    iz0 = jnp.floor(iz)
    fx = ix - ix0
    fy = iy - iy0
    fz = iz - iz0
    vol_flat = vol.reshape(b, d * h * w)
    out = jnp.zeros((b,) + x.shape, jnp.float32)
    for dz in (0, 1):
        for dy in (0, 1):
            for dx in (0, 1):
                cz = iz0 + dz
                cy = iy0 + dy
                cx = ix0 + dx
                wz = fz if dz else (1.0 - fz)
                wy = fy if dy else (1.0 - fy)
                wx = fx if dx else (1.0 - fx)
                wgt = wz * wy * wx
                inb = ((cz >= 0) & (cz < d) & (cy >= 0) & (cy < h)
                       & (cx >= 0) & (cx < w))
                czi = jnp.clip(cz, 0, d - 1).astype(jnp.int32)
                cyi = jnp.clip(cy, 0, h - 1).astype(jnp.int32)
                cxi = jnp.clip(cx, 0, w - 1).astype(jnp.int32)
                flat = (czi * (h * w) + cyi * w + cxi).reshape(-1)
                vals = vol_flat[:, flat].reshape((b,) + x.shape)
                out = out + vals * (wgt * inb.astype(jnp.float32))[None]
    return out


def _resize_linear_axis(x, axis, out_size):
    in_size = x.shape[axis]
    scale = in_size / out_size
    dst = jnp.arange(out_size, dtype=jnp.float32)
    src = jnp.maximum(scale * (dst + 0.5) - 0.5, 0.0)
    i0 = jnp.minimum(jnp.floor(src).astype(jnp.int32), in_size - 1)
    i1 = jnp.minimum(i0 + 1, in_size - 1)
    wgt = jnp.clip(src - i0.astype(jnp.float32), 0.0, 1.0)
    x0 = jnp.take(x, i0, axis=axis)
    x1 = jnp.take(x, i1, axis=axis)
    shape = [1] * x.ndim
    shape[axis] = out_size
    wgt = wgt.reshape(shape)
    return x0 * (1.0 - wgt) + x1 * wgt


def trilinear_resize(x, size):
    """F.interpolate(mode='trilinear', align_corners=False) on NCDHW."""
    x = _resize_linear_axis(x, 2, size[0])
    x = _resize_linear_axis(x, 3, size[1])
    x = _resize_linear_axis(x, 4, size[2])
    return x


# ----------------------------- full forward ----------------------------------
def obelisk_forward(input_img, params, num_labels=NUM_LABELS):
    b, c, _, _, _ = input_img.shape
    assert c == 1, "obelisk_visceral samples a single-channel volume"
    d4, h4, w4 = QUARTER_RES
    ng = d4 * h4 * w4

    base = identity_grid(d4, h4, w4)                       # (ng, 3)
    off = params['offset1']                                # (1024, 2, 3)
    coords0 = base[None, :, :] + off[:, 0:1, :]            # (1024, ng, 3)
    coords1 = base[None, :, :] + off[:, 1:2, :]

    vol = input_img[:, 0]                                  # (B, D, H, W)
    feat = grid_sample_3d(vol, coords0) - grid_sample_3d(vol, coords1)  # (B,1024,ng)

    x_flat = jnp.transpose(feat, (0, 2, 1)).reshape(b * ng, 1024)
    y = obelisk_head(x_flat, params, num_labels)           # (B*ng, L)  -- Pallas
    x4 = jnp.transpose(y.reshape(b, ng, num_labels), (0, 2, 1)).reshape(
        b, num_labels, d4, h4, w4)
    return trilinear_resize(x4, HALF_RES)                  # (B, L, D/2, H/2, W/2)


# ----------------------------- main -------------------------------------------
if __name__ == "__main__":
    key = jax.random.PRNGKey(0)
    pkey, xkey = jax.random.split(key)
    params = init_params(pkey, NUM_LABELS)
    input_img = jax.random.normal(xkey, (2, 1) + FULL_RES, jnp.float32)

    fwd = jax.jit(lambda img, p: obelisk_forward(img, p, NUM_LABELS))
    out = fwd(input_img, params)
    out = jax.block_until_ready(out)
    assert out.shape == (2, NUM_LABELS) + HALF_RES, out.shape
    assert bool(jnp.all(jnp.isfinite(out)))
    print("KERNEL_OK")
</pallas_src>

<mosaic_0001>
module attributes {stable_mosaic.version = 11 : i64} {
  func.func @obelisk_head_kernel(%arg0: i32, %arg1: memref<128x1024xbf16, #tpu.memory_space<vmem>>, %arg2: memref<4x256x64xbf16, #tpu.memory_space<vmem>>, %arg3: memref<256x128xbf16, #tpu.memory_space<vmem>>, %arg4: memref<4x256x32xbf16, #tpu.memory_space<vmem>>, %arg5: memref<256x128xbf16, #tpu.memory_space<vmem>>, %arg6: memref<8x256xf32, #tpu.memory_space<vmem>>, %arg7: memref<128x128xf32, #tpu.memory_space<vmem>>, %arg8: memref<128x256xbf16, #tpu.memory_space<vmem>>) attributes {dimension_semantics = [#tpu.dimension_semantics<parallel>], iteration_bounds = array<i64: 1>, scalar_prefetch = 0 : i64, scratch_operands = 1 : i64, tpu.core_type = #tpu.core_type<tc>, window_params = [{transform_indices = @transform_0, window_bounds = array<i64: 128, 1024>}, {pipeline_mode = #tpu.pipeline_mode<synchronous>, transform_indices = @transform_1, window_bounds = array<i64: 4, 256, 64>}, {pipeline_mode = #tpu.pipeline_mode<synchronous>, transform_indices = @transform_2, window_bounds = array<i64: 256, 128>}, {pipeline_mode = #tpu.pipeline_mode<synchronous>, transform_indices = @transform_3, window_bounds = array<i64: 4, 256, 32>}, {pipeline_mode = #tpu.pipeline_mode<synchronous>, transform_indices = @transform_4, window_bounds = array<i64: 256, 128>}, {pipeline_mode = #tpu.pipeline_mode<synchronous>, transform_indices = @transform_5, window_bounds = array<i64: 8, 256>}, {transform_indices = @transform_6, window_bounds = array<i64: 128, 128>}]} {
    %c0 = arith.constant 0 : index
    %c0_0 = arith.constant 0 : index
    %0 = vector.load %arg1[%c0, %c0_0] : memref<128x1024xbf16, #tpu.memory_space<vmem>>, vector<128x256xbf16>
    %c0_1 = arith.constant 0 : index
    %c0_2 = arith.constant 0 : index
    %c0_3 = arith.constant 0 : index
    %1 = vector.load %arg2[%c0_1, %c0_2, %c0_3] : memref<4x256x64xbf16, #tpu.memory_space<vmem>>, vector<1x256x64xbf16>
    %2 = vector.shape_cast %1 : vector<1x256x64xbf16> to vector<256x64xbf16>
    %cst = arith.constant dense<0.000000e+00> : vector<128x64xf32>
    %3 = tpu.matmul %0, %2, %cst {dimension_numbers = #tpu.dot_dimension_numbers<[1], [0], [0], [1], [0, 0, 1, 1], [], []>} : vector<128x256xbf16>, vector<256x64xbf16>, vector<128x64xf32> -> vector<128x64xf32>
    %c0_4 = arith.constant 0 : index
    %c0_5 = arith.constant 0 : index
    %4 = vector.load %arg6[%c0_4, %c0_5] : memref<8x256xf32, #tpu.memory_space<vmem>>, vector<1x64xf32>
    %5 = vector.broadcast %4 : vector<1x64xf32> to vector<128x64xf32>
    %6 = arith.addf %3, %5 : vector<128x64xf32>
    %cst_6 = arith.constant 0.000000e+00 : f32
    %7 = vector.broadcast %cst_6 : f32 to vector<128x64xf32>
    %8 = arith.maximumf %6, %7 : vector<128x64xf32>
    %9 = arith.truncf %8 : vector<128x64xf32> to vector<128x64xbf16>
    %c0_7 = arith.constant 0 : index
    %c0_8 = arith.constant 0 : index
    %10 = vector.load %arg3[%c0_7, %c0_8] : memref<256x128xbf16, #tpu.memory_space<vmem>>, vector<64x128xbf16>
    %cst_9 = arith.constant dense<0.000000e+00> : vector<128x128xf32>
    %11 = tpu.matmul %9, %10, %cst_9 {dimension_numbers = #tpu.dot_dimension_numbers<[1], [0], [0], [1], [0, 0, 1, 1], [], []>} : vector<128x64xbf16>, vector<64x128xbf16>, vector<128x128xf32> -> vector<128x128xf32>
    %c0_10 = arith.constant 0 : index
    %c256 = arith.constant 256 : index
    %12 = vector.load %arg1[%c0_10, %c256] : memref<128x1024xbf16, #tpu.memory_space<vmem>>, vector<128x256xbf16>
    %c1 = arith.constant 1 : index
    %c0_11 = arith.constant 0 : index
    %c0_12 = arith.constant 0 : index
    %13 = vector.load %arg2[%c1, %c0_11, %c0_12] : memref<4x256x64xbf16, #tpu.memory_space<vmem>>, vector<1x256x64xbf16>
    %14 = vector.shape_cast %13 : vector<1x256x64xbf16> to vector<256x64xbf16>
    %cst_13 = arith.constant dense<0.000000e+00> : vector<128x64xf32>
    %15 = tpu.matmul %12, %14, %cst_13 {dimension_numbers = #tpu.dot_dimension_numbers<[1], [0], [0], [1], [0, 0, 1, 1], [], []>} : vector<128x256xbf16>, vector<256x64xbf16>, vector<128x64xf32> -> vector<128x64xf32>
    %c0_14 = arith.constant 0 : index
    %c64 = arith.constant 64 : index
    %16 = vector.load %arg6[%c0_14, %c64] : memref<8x256xf32, #tpu.memory_space<vmem>>, vector<1x64xf32>
    %17 = vector.broadcast %16 : vector<1x64xf32> to vector<128x64xf32>
    %18 = arith.addf %15, %17 : vector<128x64xf32>
    %cst_15 = arith.constant 0.000000e+00 : f32
    %19 = vector.broadcast %cst_15 : f32 to vector<128x64xf32>
    %20 = arith.maximumf %18, %19 : vector<128x64xf32>
    %21 = arith.truncf %20 : vector<128x64xf32> to vector<128x64xbf16>
    %c64_16 = arith.constant 64 : index
    %c0_17 = arith.constant 0 : index
    %22 = vector.load %arg3[%c64_16, %c0_17] : memref<256x128xbf16, #tpu.memory_space<vmem>>, vector<64x128xbf16>
    %cst_18 = arith.constant dense<0.000000e+00> : vector<128x128xf32>
    %23 = tpu.matmul %21, %22, %cst_18 {dimension_numbers = #tpu.dot_dimension_numbers<[1], [0], [0], [1], [0, 0, 1, 1], [], []>} : vector<128x64xbf16>, vector<64x128xbf16>, vector<128x128xf32> -> vector<128x128xf32>
    %24 = arith.addf %11, %23 : vector<128x128xf32>
    %c0_19 = arith.constant 0 : index
    %c512 = arith.constant 512 : index
    %25 = vector.load %arg1[%c0_19, %c512] : memref<128x1024xbf16, #tpu.memory_space<vmem>>, vector<128x256xbf16>
    %c2 = arith.constant 2 : index
    %c0_20 = arith.constant 0 : index
    %c0_21 = arith.constant 0 : index
    %26 = vector.load %arg2[%c2, %c0_20, %c0_21] : memref<4x256x64xbf16, #tpu.memory_space<vmem>>, vector<1x256x64xbf16>
    %27 = vector.shape_cast %26 : vector<1x256x64xbf16> to vector<256x64xbf16>
    %cst_22 = arith.constant dense<0.000000e+00> : vector<128x64xf32>
    %28 = tpu.matmul %25, %27, %cst_22 {dimension_numbers = #tpu.dot_dimension_numbers<[1], [0], [0], [1], [0, 0, 1, 1], [], []>} : vector<128x256xbf16>, vector<256x64xbf16>, vector<128x64xf32> -> vector<128x64xf32>
    %c0_23 = arith.constant 0 : index
    %c128 = arith.constant 128 : index
    %29 = vector.load %arg6[%c0_23, %c128] : memref<8x256xf32, #tpu.memory_space<vmem>>, vector<1x64xf32>
    %30 = vector.broadcast %29 : vector<1x64xf32> to vector<128x64xf32>
    %31 = arith.addf %28, %30 : vector<128x64xf32>
    %cst_24 = arith.constant 0.000000e+00 : f32
    %32 = vector.broadcast %cst_24 : f32 to vector<128x64xf32>
    %33 = arith.maximumf %31, %32 : vector<128x64xf32>
    %34 = arith.truncf %33 : vector<128x64xf32> to vector<128x64xbf16>
    %c128_25 = arith.constant 128 : index
    %c0_26 = arith.constant 0 : index
    %35 = vector.load %arg3[%c128_25, %c0_26] : memref<256x128xbf16, #tpu.memory_space<vmem>>, vector<64x128xbf16>
    %cst_27 = arith.constant dense<0.000000e+00> : vector<128x128xf32>
    %36 = tpu.matmul %34, %35, %cst_27 {dimension_numbers = #tpu.dot_dimension_numbers<[1], [0], [0], [1], [0, 0, 1, 1], [], []>} : vector<128x64xbf16>, vector<64x128xbf16>, vector<128x128xf32> -> vector<128x128xf32>
    %37 = arith.addf %24, %36 : vector<128x128xf32>
    %c0_28 = arith.constant 0 : index
    %c768 = arith.constant 768 : index
    %38 = vector.load %arg1[%c0_28, %c768] : memref<128x1024xbf16, #tpu.memory_space<vmem>>, vector<128x256xbf16>
    %c3 = arith.constant 3 : index
    %c0_29 = arith.constant 0 : index
    %c0_30 = arith.constant 0 : index
    %39 = vector.load %arg2[%c3, %c0_29, %c0_30] : memref<4x256x64xbf16, #tpu.memory_space<vmem>>, vector<1x256x64xbf16>
    %40 = vector.shape_cast %39 : vector<1x256x64xbf16> to vector<256x64xbf16>
    %cst_31 = arith.constant dense<0.000000e+00> : vector<128x64xf32>
    %41 = tpu.matmul %38, %40, %cst_31 {dimension_numbers = #tpu.dot_dimension_numbers<[1], [0], [0], [1], [0, 0, 1, 1], [], []>} : vector<128x256xbf16>, vector<256x64xbf16>, vector<128x64xf32> -> vector<128x64xf32>
    %c0_32 = arith.constant 0 : index
    %c192 = arith.constant 192 : index
    %42 = vector.load %arg6[%c0_32, %c192] : memref<8x256xf32, #tpu.memory_space<vmem>>, vector<1x64xf32>
    %43 = vector.broadcast %42 : vector<1x64xf32> to vector<128x64xf32>
    %44 = arith.addf %41, %43 : vector<128x64xf32>
    %cst_33 = arith.constant 0.000000e+00 : f32
    %45 = vector.broadcast %cst_33 : f32 to vector<128x64xf32>
    %46 = arith.maximumf %44, %45 : vector<128x64xf32>
    %47 = arith.truncf %46 : vector<128x64xf32> to vector<128x64xbf16>
    %c192_34 = arith.constant 192 : index
    %c0_35 = arith.constant 0 : index
    %48 = vector.load %arg3[%c192_34, %c0_35] : memref<256x128xbf16, #tpu.memory_space<vmem>>, vector<64x128xbf16>
    %cst_36 = arith.constant dense<0.000000e+00> : vector<128x128xf32>
    %49 = tpu.matmul %47, %48, %cst_36 {dimension_numbers = #tpu.dot_dimension_numbers<[1], [0], [0], [1], [0, 0, 1, 1], [], []>} : vector<128x64xbf16>, vector<64x128xbf16>, vector<128x128xf32> -> vector<128x128xf32>
    %50 = arith.addf %37, %49 : vector<128x128xf32>
    %c1_37 = arith.constant 1 : index
    %c0_38 = arith.constant 0 : index
    %51 = vector.load %arg6[%c1_37, %c0_38] : memref<8x256xf32, #tpu.memory_space<vmem>>, vector<1x128xf32>
    %52 = vector.broadcast %51 : vector<1x128xf32> to vector<128x128xf32>
    %53 = arith.addf %50, %52 : vector<128x128xf32>
    %54 = arith.truncf %53 : vector<128x128xf32> to vector<128x128xbf16>
    %c0_39 = arith.constant 0 : index
    %c0_40 = arith.constant 0 : index
    %55 = vector.load %arg8[%c0_39, %c0_40] : memref<128x256xbf16, #tpu.memory_space<vmem>>, vector<128x128xbf16>
    tpu.vector_store %arg8[%c0_39, %c0_40], %54 {strides = array<i32>} : memref<128x256xbf16, #tpu.memory_space<vmem>>, vector<128x128xbf16>,
    %cst_41 = arith.constant 0.000000e+00 : bf16
    %56 = vector.broadcast %cst_41 : bf16 to vector<128x128xbf16>
    %c0_42 = arith.constant 0 : index
    %c128_43 = arith.constant 128 : index
    %57 = vector.load %arg8[%c0_42, %c128_43] : memref<128x256xbf16, #tpu.memory_space<vmem>>, vector<128x128xbf16>
    tpu.vector_store %arg8[%c0_42, %c128_43], %56 {strides = array<i32>} : memref<128x256xbf16, #tpu.memory_space<vmem>>, vector<128x128xbf16>,
    %c0_44 = arith.constant 0 : index
    %c0_45 = arith.constant 0 : index
    %58 = vector.load %arg8[%c0_44, %c0_45] : memref<128x256xbf16, #tpu.memory_space<vmem>>, vector<128x256xbf16>
    %c0_46 = arith.constant 0 : index
    %c0_47 = arith.constant 0 : index
    %c0_48 = arith.constant 0 : index
    %59 = vector.load %arg4[%c0_46, %c0_47, %c0_48] : memref<4x256x32xbf16, #tpu.memory_space<vmem>>, vector<1x256x32xbf16>
    %60 = vector.shape_cast %59 : vector<1x256x32xbf16> to vector<256x32xbf16>
    %cst_49 = arith.constant dense<0.000000e+00> : vector<128x32xf32>
    %61 = tpu.matmul %58, %60, %cst_49 {dimension_numbers = #tpu.dot_dimension_numbers<[1], [0], [0], [1], [0, 0, 1, 1], [], []>} : vector<128x256xbf16>, vector<256x32xbf16>, vector<128x32xf32> -> vector<128x32xf32>
    %cst_50 = arith.constant 0.000000e+00 : f32
    %62 = vector.broadcast %cst_50 : f32 to vector<128x32xf32>
    %63 = arith.maximumf %61, %62 : vector<128x32xf32>
    %64 = arith.truncf %63 : vector<128x32xf32> to vector<128x32xbf16>
    %c0_51 = arith.constant 0 : index
    %c128_52 = arith.constant 128 : index
    %65 = vector.load %arg8[%c0_51, %c128_52] : memref<128x256xbf16, #tpu.memory_space<vmem>>, vector<128x32xbf16>
    tpu.vector_store %arg8[%c0_51, %c128_52], %64 {strides = array<i32>} : memref<128x256xbf16, #tpu.memory_space<vmem>>, vector<128x32xbf16>,
    %c0_53 = arith.constant 0 : index
    %c0_54 = arith.constant 0 : index
    %66 = vector.load %arg8[%c0_53, %c0_54] : memref<128x256xbf16, #tpu.memory_space<vmem>>, vector<128x256xbf16>
    %c1_55 = arith.constant 1 : index
    %c0_56 = arith.constant 0 : index
    %c0_57 = arith.constant 0 : index
    %67 = vector.load %arg4[%c1_55, %c0_56, %c0_57] : memref<4x256x32xbf16, #tpu.memory_space<vmem>>, vector<1x256x32xbf16>
    %68 = vector.shape_cast %67 : vector<1x256x32xbf16> to vector<256x32xbf16>
    %cst_58 = arith.constant dense<0.000000e+00> : vector<128x32xf32>
    %69 = tpu.matmul %66, %68, %cst_58 {dimension_numbers = #tpu.dot_dimension_numbers<[1], [0], [0], [1], [0, 0, 1, 1], [], []>} : vector<128x256xbf16>, vector<256x32xbf16>, vector<128x32xf32> -> vector<128x32xf32>
    %c3_59 = arith.constant 3 : index
    %c0_60 = arith.constant 0 : index
    %70 = vector.load %arg6[%c3_59, %c0_60] : memref<8x256xf32, #tpu.memory_space<vmem>>, vector<1x32xf32>
    %71 = vector.broadcast %70 : vector<1x32xf32> to vector<128x32xf32>
    %72 = arith.addf %69, %71 : vector<128x32xf32>
    %cst_61 = arith.constant 0.000000e+00 : f32
    %73 = vector.broadcast %cst_61 : f32 to vector<128x32xf32>
    %74 = arith.maximumf %72, %73 : vector<128x32xf32>
    %75 = arith.truncf %74 : vector<128x32xf32> to vector<128x32xbf16>
    %c0_62 = arith.constant 0 : index
    %c160 = arith.constant 160 : index
    %76 = vector.load %arg8[%c0_62, %c160] : memref<128x256xbf16, #tpu.memory_space<vmem>>, vector<128x32xbf16>
    tpu.vector_store %arg8[%c0_62, %c160], %75 {strides = array<i32>} : memref<128x256xbf16, #tpu.memory_space<vmem>>, vector<128x32xbf16>,
    %c0_63 = arith.constant 0 : index
    %c0_64 = arith.constant 0 : index
    %77 = vector.load %arg8[%c0_63, %c0_64] : memref<128x256xbf16, #tpu.memory_space<vmem>>, vector<128x256xbf16>
    %c2_65 = arith.constant 2 : index
    %c0_66 = arith.constant 0 : index
    %c0_67 = arith.constant 0 : index
    %78 = vector.load %arg4[%c2_65, %c0_66, %c0_67] : memref<4x256x32xbf16, #tpu.memory_space<vmem>>, vector<1x256x32xbf16>
    %79 = vector.shape_cast %78 : vector<1x256x32xbf16> to vector<256x32xbf16>
    %cst_68 = arith.constant dense<0.000000e+00> : vector<128x32xf32>
    %80 = tpu.matmul %77, %79, %cst_68 {dimension_numbers = #tpu.dot_dimension_numbers<[1], [0], [0], [1], [0, 0, 1, 1], [], []>} : vector<128x256xbf16>, vector<256x32xbf16>, vector<128x32xf32> -> vector<128x32xf32>
    %c4 = arith.constant 4 : index
    %c0_69 = arith.constant 0 : index
    %81 = vector.load %arg6[%c4, %c0_69] : memref<8x256xf32, #tpu.memory_space<vmem>>, vector<1x32xf32>
    %82 = vector.broadcast %81 : vector<1x32xf32> to vector<128x32xf32>
    %83 = arith.addf %80, %82 : vector<128x32xf32>
    %cst_70 = arith.constant 0.000000e+00 : f32
    %84 = vector.broadcast %cst_70 : f32 to vector<128x32xf32>
    %85 = arith.maximumf %83, %84 : vector<128x32xf32>
    %86 = arith.truncf %85 : vector<128x32xf32> to vector<128x32xbf16>
    %c0_71 = arith.constant 0 : index
    %c192_72 = arith.constant 192 : index
    %87 = vector.load %arg8[%c0_71, %c192_72] : memref<128x256xbf16, #tpu.memory_space<vmem>>, vector<128x32xbf16>
    tpu.vector_store %arg8[%c0_71, %c192_72], %86 {strides = array<i32>} : memref<128x256xbf16, #tpu.memory_space<vmem>>, vector<128x32xbf16>,
    %c0_73 = arith.constant 0 : index
    %c0_74 = arith.constant 0 : index
    %88 = vector.load %arg8[%c0_73, %c0_74] : memref<128x256xbf16, #tpu.memory_space<vmem>>, vector<128x256xbf16>
    %c3_75 = arith.constant 3 : index
    %c0_76 = arith.constant 0 : index
    %c0_77 = arith.constant 0 : index
    %89 = vector.load %arg4[%c3_75, %c0_76, %c0_77] : memref<4x256x32xbf16, #tpu.memory_space<vmem>>, vector<1x256x32xbf16>
    %90 = vector.shape_cast %89 : vector<1x256x32xbf16> to vector<256x32xbf16>
    %cst_78 = arith.constant dense<0.000000e+00> : vector<128x32xf32>
    %91 = tpu.matmul %88, %90, %cst_78 {dimension_numbers = #tpu.dot_dimension_numbers<[1], [0], [0], [1], [0, 0, 1, 1], [], []>} : vector<128x256xbf16>, vector<256x32xbf16>, vector<128x32xf32> -> vector<128x32xf32>
    %c5 = arith.constant 5 : index
    %c0_79 = arith.constant 0 : index
    %92 = vector.load %arg6[%c5, %c0_79] : memref<8x256xf32, #tpu.memory_space<vmem>>, vector<1x32xf32>
    %93 = vector.broadcast %92 : vector<1x32xf32> to vector<128x32xf32>
    %94 = arith.addf %91, %93 : vector<128x32xf32>
    %cst_80 = arith.constant 0.000000e+00 : f32
    %95 = vector.broadcast %cst_80 : f32 to vector<128x32xf32>
    %96 = arith.maximumf %94, %95 : vector<128x32xf32>
    %97 = arith.truncf %96 : vector<128x32xf32> to vector<128x32xbf16>
    %c0_81 = arith.constant 0 : index
    %c224 = arith.constant 224 : index
    %98 = vector.load %arg8[%c0_81, %c224] : memref<128x256xbf16, #tpu.memory_space<vmem>>, vector<128x32xbf16>
    tpu.vector_store %arg8[%c0_81, %c224], %97 {strides = array<i32>} : memref<128x256xbf16, #tpu.memory_space<vmem>>, vector<128x32xbf16>,
    %c0_82 = arith.constant 0 : index
    %c0_83 = arith.constant 0 : index
    %99 = vector.load %arg8[%c0_82, %c0_83] : memref<128x256xbf16, #tpu.memory_space<vmem>>, vector<128x256xbf16>
    %c0_84 = arith.constant 0 : index
    %c0_85 = arith.constant 0 : index
    %100 = vector.load %arg5[%c0_84, %c0_85] : memref<256x128xbf16, #tpu.memory_space<vmem>>, vector<256x128xbf16>
    %cst_86 = arith.constant dense<0.000000e+00> : vector<128x128xf32>
    %101 = tpu.matmul %99, %100, %cst_86 {dimension_numbers = #tpu.dot_dimension_numbers<[1], [0], [0], [1], [0, 0, 1, 1], [], []>} : vector<128x256xbf16>, vector<256x128xbf16>, vector<128x128xf32> -> vector<128x128xf32>
    %c2_87 = arith.constant 2 : index
    %c0_88 = arith.constant 0 : index
    %102 = vector.load %arg6[%c2_87, %c0_88] : memref<8x256xf32, #tpu.memory_space<vmem>>, vector<1x128xf32>
    %103 = vector.broadcast %102 : vector<1x128xf32> to vector<128x128xf32>
    %104 = arith.addf %101, %103 : vector<128x128xf32>
    %c0_89 = arith.constant 0 : index
    %c0_90 = arith.constant 0 : index
    %105 = vector.load %arg7[%c0_89, %c0_90] : memref<128x128xf32, #tpu.memory_space<vmem>>, vector<128x128xf32>
    tpu.vector_store %arg7[%c0_89, %c0_90], %104 {strides = array<i32>} : memref<128x128xf32, #tpu.memory_space<vmem>>, vector<128x128xf32>,
    return
  }
  func.func @transform_0(%arg0: i32) -> (i32, i32) {
    %c0_i32 = arith.constant 0 : i32
    %c0_i32_0 = arith.constant 0 : i32
    return %arg0, %c0_i32 : i32, i32
  }
  func.func @transform_1(%arg0: i32) -> (i32, i32, i32) {
    %c0_i32 = arith.constant 0 : i32
    %c0_i32_0 = arith.constant 0 : i32
    %c0_i32_1 = arith.constant 0 : i32
    %c0_i32_2 = arith.constant 0 : i32
    return %c0_i32, %c0_i32_0, %c0_i32_1 : i32, i32, i32
  }
  func.func @transform_2(%arg0: i32) -> (i32, i32) {
    %c0_i32 = arith.constant 0 : i32
    %c0_i32_0 = arith.constant 0 : i32
    %c0_i32_1 = arith.constant 0 : i32
    return %c0_i32, %c0_i32_0 : i32, i32
  }
  func.func @transform_3(%arg0: i32) -> (i32, i32, i32) {
    %c0_i32 = arith.constant 0 : i32
    %c0_i32_0 = arith.constant 0 : i32
    %c0_i32_1 = arith.constant 0 : i32
    %c0_i32_2 = arith.constant 0 : i32
    return %c0_i32, %c0_i32_0, %c0_i32_1 : i32, i32, i32
  }
  func.func @transform_4(%arg0: i32) -> (i32, i32) {
    %c0_i32 = arith.constant 0 : i32
    %c0_i32_0 = arith.constant 0 : i32
    %c0_i32_1 = arith.constant 0 : i32
    return %c0_i32, %c0_i32_0 : i32, i32
  }
  func.func @transform_5(%arg0: i32) -> (i32, i32) {
    %c0_i32 = arith.constant 0 : i32
    %c0_i32_0 = arith.constant 0 : i32
    %c0_i32_1 = arith.constant 0 : i32
    return %c0_i32, %c0_i32_0 : i32, i32
  }
  func.func @transform_6(%arg0: i32) -> (i32, i32) {
    %c0_i32 = arith.constant 0 : i32
    %c0_i32_0 = arith.constant 0 : i32
    return %arg0, %c0_i32 : i32, i32
  }
}

</mosaic_0001>

<bundles_post_ra>
// kernel: _lambda_.1
= control target key start
LH: loop header
LB: loop body
LE: loop exit
PB: predicated region body
PF: predicated region fallthrough
CT: control target
= control target key end

     0   :  { %s5989_s11 = smov 64   ;;  %vm760_vm0 = vcmask 523264   ;;  %vm2576_vm1 = vcmask 257024   ;;  %s5991_s28 = smov 32   ;;  %vm3028_vm2 = vcmask 519424   ;;  %vm3480_vm3 = vcmask 781824   ;;  %s7187_s1 = inlined_call_operand.vmem [shape: bf16[4,256,64], index: 1, kind: input, shape index: {}]   ;;  %s7188_s0 = inlined_call_operand.vmem [shape: bf16[128,1024], index: 0, kind: input, shape index: {}]   ;;  %s7189_s5 = inlined_call_operand.vmem [shape: f32[8,256], index: 5, kind: input, shape index: {}]   ;;  %s7190_s2 = inlined_call_operand.vmem [shape: bf16[256,128], index: 2, kind: input, shape index: {}]   ;;  %s7191_s3 = inlined_call_operand.vmem [shape: bf16[4,256,32], index: 3, kind: input, shape index: {}]   ;;  %s7192_s4 = inlined_call_operand.vmem [shape: bf16[256,128], index: 4, kind: input, shape index: {}]   ;;  %s7193_s6 = inlined_call_operand.vmem [shape: f32[128,128], index: 6, kind: output, shape index: {}]  }
   0x1   :  { %v5719_v0 = vld [vmem:[%s7187_s1 + $0x78] sm:$0xff]   ;;  %v5721_v2 = vld [vmem:[%s7187_s1 + $0x70] sm:$0xff]   ;;  %v5723_v4 = vld [vmem:[%s7187_s1 + $0x68] sm:$0xff]   ;;  %s5992_s16 = smov 96   ;;  %vm3932_vm4 = vcmask 1044224  }
   0x2   :  { %v5720_v1 = vld [vmem:[%s7187_s1 + $0x38] sm:$0xff]   ;;  %4979 = vmatprep.subr.bf16.mxu0 %v5719_v0  ;;  %5699 = vmatprep.subr.bf16.mxu1 %v5719_v0  ;;  %v5722_v3 = vld [vmem:[%s7187_s1 + $0x30] sm:$0xff]   ;;  %v5724_v5 = vld [vmem:[%s7187_s1 + $0x28] sm:$0xff]  }
   0x3   :  { %4980 = vmatpush3.bf16.msra.mxu0 %v5720_v1  ;;  %5707 = vmatpush3.bf16.msra.mxu1 %v5720_v1  ;;  %v5725_v6 = vld [vmem:[%s7187_s1 + $0x60] sm:$0xff]   ;;  %v5727_v8 = vld [vmem:[%s7187_s1 + $0x58] sm:$0xff]   ;;  %v5729_v10 = vld [vmem:[%s7187_s1 + $0x50] sm:$0xff]  }
   0x4   :  { %4981 = vmatprep.subr.bf16.mxu0 %v5721_v2  ;;  %5700 = vmatprep.subr.bf16.mxu1 %v5721_v2  ;;  %v5726_v7 = vld [vmem:[%s7187_s1 + $0x20] sm:$0xff]   ;;  %v5728_v9 = vld [vmem:[%s7187_s1 + $0x18] sm:$0xff]   ;;  %v5730_v17 = vld [vmem:[%s7187_s1 + $0x10] sm:$0xff]  }
   0x5   :  { %v24_v11 = vld [vmem:[%s7188_s0] sm:$0xff]  ;;  %v5731_v18 = vld [vmem:[%s7187_s1 + $0x48] sm:$0xff]   ;;  %v5735_v22 = vld [vmem:[%s7187_s1 + $0xf8] sm:$0xff]  }
   0x6   :  { %v25_v12 = vld [vmem:[%s7188_s0 + $0x20] sm:$0xff]  ;;  %v5732_v19 = vld [vmem:[%s7187_s1 + $0x8] sm:$0xff]   ;;  %v5736_v29 = vld [vmem:[%s7187_s1 + $0xb8] sm:$0xff]  }
   0x7   :  { %4982 = vmatpush3.bf16.msra.mxu0 %v5722_v3  ;;  %5708 = vmatpush3.bf16.msra.mxu1 %v5722_v3  ;;  %v32_v13 = vld [vmem:[%s7188_s0 + $0x100] sm:$0xff]  ;;  %v4292_v14 = vcombine.high %v24_v11, %v25_v12  ;;  %v4291_v27 = vcombine.low %v24_v11, %v25_v12  ;;  %v5737_v31 = vld [vmem:[%s7187_s1 + $0xf0] sm:$0xff]   ;;  %v5739_v34 = vld [vmem:[%s7187_s1 + $0xe8] sm:$0xff]  }
   0x8   :  { %4983 = vmatprep.subr.bf16.mxu0 %v5723_v4  ;;  %5701 = vmatprep.subr.bf16.mxu1 %v5723_v4  ;;  %v33_v15 = vld [vmem:[%s7188_s0 + $0x120] sm:$0xff]  ;;  %v5738_v33 = vld [vmem:[%s7187_s1 + $0xb0] sm:$0xff]   ;;  %v5740_v41 = vld [vmem:[%s7187_s1 + $0xa8] sm:$0xff]  }
   0x9   :  { %v4300_v16 = vcombine.high %v32_v13, %v33_v15  ;;  %281 = vmatprep.mubr.bf16.mxu0 %v4292_v14  ;;  %v5733_v20 = vld [vmem:[%s7187_s1 + $0x40] sm:$0xff]   ;;  %v4299_v28 = vcombine.low %v32_v13, %v33_v15  ;;  %v5743_v46 = vld [vmem:[%s7187_s1 + $0xd8] sm:$0xff]   ;;  %v5745_v55 = vld [vmem:[%s7187_s1 + $0xd0] sm:$0xff]  }
   0xa   :  { %v5734_v21 = vld [vmem:[%s7187_s1] sm:$0xff]   ;;  %v5744_v52 = vld [vmem:[%s7187_s1 + $0x98] sm:$0xff]   ;;  %v5746_v58 = vld [vmem:[%s7187_s1 + $0x90] sm:$0xff]  }
   0xb   :  { %4984 = vmatpush3.bf16.msra.mxu0 %v5724_v5  ;;  %5709 = vmatpush3.bf16.msra.mxu1 %v5724_v5  ;;  %v26_v23 = vld [vmem:[%s7188_s0 + $0x40] sm:$0xff]  ;;  %v5747_v59 = vld [vmem:[%s7187_s1 + $0xc8] sm:$0xff]  }
   0xc   :  { %4985 = vmatprep.subr.bf16.mxu0 %v5725_v6  ;;  %5702 = vmatprep.subr.bf16.mxu1 %v5725_v6  ;;  %v27_v24 = vld [vmem:[%s7188_s0 + $0x60] sm:$0xff]  ;;  %v378_v60 = vld [vmem:[%s7188_s0 + $0x8] sm:$0xff] }
   0xd   :  { %313 = vmatprep.mubr.bf16.mxu1 %v4300_v16  ;;  %v34_v25 = vld [vmem:[%s7188_s0 + $0x140] sm:$0xff]  ;;  %v4294_v30 = vcombine.high %v26_v23, %v27_v24  ;;  %v4293_v39 = vcombine.low %v26_v23, %v27_v24  ;;  %v379_v61 = vld [vmem:[%s7188_s0 + $0x28] sm:$0xff] }
   0xe   :  { %v35_v26 = vld [vmem:[%s7188_s0 + $0x160] sm:$0xff]  ;;  %v5748_v62 = vld [vmem:[%s7187_s1 + $0x88] sm:$0xff]   ;;  %v4356_v2 = vcombine.high %v378_v60, %v379_v61  ;;  %v4355_v6 = vcombine.low %v378_v60, %v379_v61 }
   0xf   :  { %4986 = vmatpush3.bf16.msra.mxu0 %v5726_v7  ;;  %5710 = vmatpush3.bf16.msra.mxu1 %v5726_v7  ;;  %v4302_v32 = vcombine.high %v34_v25, %v35_v26  ;;  %v28_v35 = vld [vmem:[%s7188_s0 + $0x80] sm:$0xff]  ;;  %v4301_v40 = vcombine.low %v34_v25, %v35_v26  ;;  %v380_v4 = vld [vmem:[%s7188_s0 + $0x48] sm:$0xff] }
  0x10   :  { %4987 = vmatprep.subr.bf16.mxu0 %v5727_v8  ;;  %5703 = vmatprep.subr.bf16.mxu1 %v5727_v8  ;;  %v29_v36 = vld [vmem:[%s7188_s0 + $0xa0] sm:$0xff]  ;;  %v381_v5 = vld [vmem:[%s7188_s0 + $0x68] sm:$0xff] }
  0x11   :  { %v36_v37 = vld [vmem:[%s7188_s0 + $0x180] sm:$0xff]  ;;  %v4296_v42 = vcombine.high %v28_v35, %v29_v36  ;;  %v4295_v53 = vcombine.low %v28_v35, %v29_v36  ;;  %v4358_v7 = vcombine.high %v380_v4, %v381_v5  ;;  %v382_v8 = vld [vmem:[%s7188_s0 + $0x88] sm:$0xff] }
  0x12   :  { %v37_v38 = vld [vmem:[%s7188_s0 + $0x1a0] sm:$0xff]  ;;  %v384_v12 = vld [vmem:[%s7188_s0 + $0xc8] sm:$0xff] }
  0x13   :  { %4988 = vmatpush3.bf16.msra.mxu0 %v5728_v9  ;;  %5711 = vmatpush3.bf16.msra.mxu1 %v5728_v9  ;;  %v5741_v43 = vld [vmem:[%s7187_s1 + $0xe0] sm:$0xff]   ;;  %v4304_v44 = vcombine.high %v36_v37, %v37_v38  ;;  %v4303_v54 = vcombine.low %v36_v37, %v37_v38  ;;  %v383_v9 = vld [vmem:[%s7188_s0 + $0xa8] sm:$0xff]  ;;  %v5755_v37 = vld [vmem:[%s7190_s2 + $0x38] sm:$0xff]  }
  0x14   :  { %4989 = vmatprep.subr.bf16.mxu0 %v5729_v10  ;;  %5704 = vmatprep.subr.bf16.mxu1 %v5729_v10  ;;  %v5742_v45 = vld [vmem:[%s7187_s1 + $0xa0] sm:$0xff]   ;;  %v4357_v10 = vcombine.low %v380_v4, %v381_v5  ;;  %v4360_v11 = vcombine.high %v382_v8, %v383_v9  ;;  %v385_v13 = vld [vmem:[%s7188_s0 + $0xe8] sm:$0xff]  ;;  %v4359_v14 = vcombine.low %v382_v8, %v383_v9  ;;  %v5756_v38 = vld [vmem:[%s7190_s2 + $0x30] sm:$0xff]  }
  0x15   :  { %v30_v47 = vld [vmem:[%s7188_s0 + $0xc0] sm:$0xff]  ;;  %v4362_v15 = vcombine.high %v384_v12, %v385_v13  ;;  %v386_v16 = vld [vmem:[%s7188_s0 + $0x108] sm:$0xff] }
  0x16   :  { %v31_v48 = vld [vmem:[%s7188_s0 + $0xe0] sm:$0xff]  ;;  %v390_v24 = vld [vmem:[%s7188_s0 + $0x188] sm:$0xff] }
  0x17   :  { %4990 = vmatpush3.bf16.msra.mxu0 %v5730_v17  ;;  %5712 = vmatpush3.bf16.msra.mxu1 %v5730_v17  ;;  %v6148_v49 = vld [vmem:[%s7189_s5] ss:$0 sm:$0xff]  ;;  %v4298_v56 = vcombine.high %v30_v47, %v31_v48  ;;  %v4297_v63 = vcombine.low %v30_v47, %v31_v48  ;;  %v387_v17 = vld [vmem:[%s7188_s0 + $0x128] sm:$0xff] }
  0x18   :  { %4991 = vmatprep.subr.bf16.mxu0 %v5731_v18  ;;  %5705 = vmatprep.subr.bf16.mxu1 %v5731_v18  ;;  %v38_v50 = vld [vmem:[%s7188_s0 + $0x1c0] sm:$0xff]  ;;  %v4361_v18 = vcombine.low %v384_v12, %v385_v13  ;;  %v391_v25 = vld [vmem:[%s7188_s0 + $0x1a8] sm:$0xff] }
  0x19   :  { %v39_v51 = vld [vmem:[%s7188_s0 + $0x1e0] sm:$0xff]  ;;  %604 = vrot.lane.b32.xlu0 %v6148_v49, %s5989_s11  ;;  %v5753_v35 = vld [vmem:[%s7190_s2 + $0x8] sm:$0xff]  }
  0x1a   :  { %v4306_v57 = vcombine.high %v38_v50, %v39_v51  ;;  %v4305_v0 = vcombine.low %v38_v50, %v39_v51  ;;  %v5749_v1 = vld [vmem:[%s7187_s1 + $0xc0] sm:$0xff]  }
  0x1b   :  { %4992 = vmatpush3.bf16.msra.mxu0 %v5732_v19  ;;  %5713 = vmatpush3.bf16.msra.mxu1 %v5732_v19  ;;  %v5750_v3 = vld [vmem:[%s7187_s1 + $0x80] sm:$0xff]   ;;  %v4364_v19 = vcombine.high %v386_v16, %v387_v17 }
  0x1c   :  { %4993 = vmatprep.subr.bf16.mxu0 %v5733_v20  ;;  %5706 = vmatprep.subr.bf16.mxu1 %v5733_v20  ;;  %v388_v20 = vld [vmem:[%s7188_s0 + $0x148] sm:$0xff]  ;;  %v5754_v36 = vld [vmem:[%s7190_s2] sm:$0xff]  }
  0x1f   :  { %4994 = vmatpush3.bf16.msra.mxu0 %v5734_v21  ;;  %5714 = vmatpush3.bf16.msra.mxu1 %v5734_v21  ;;  %v389_v21 = vld [vmem:[%s7188_s0 + $0x168] sm:$0xff] }
  0x20   :  { %5043 = vmatprep.subr.bf16.mxu1 %v5735_v22  ;;  %v4363_v22 = vcombine.low %v386_v16, %v387_v17  ;;  %v4366_v23 = vcombine.high %v388_v20, %v389_v21  ;;  %v4365_v26 = vcombine.low %v388_v20, %v389_v21  ;;  %5603 = vmatprep.subr.bf16.mxu0 %v5755_v37 }
  0x22   :  { %282 = vmatmul.mubr.bf16.vlgmr.msra.gmra.mxu0 %v4291_v27  ;;  %314 = vmatmul.mubr.bf16.vlgmr.msra.gmra.mxu1 %v4299_v28  ;;  %v4368_v27 = vcombine.high %v390_v24, %v391_v25  ;;  %v392_v28 = vld [vmem:[%s7188_s0 + $0x1c8] sm:$0xff] }
  0x23   :  { %5044 = vmatpush3.bf16.msra.mxu1 %v5736_v29  ;;  %289 = vmatprep.mubr.bf16.mxu0 %v4294_v30  ;;  %v393_v29 = vld [vmem:[%s7188_s0 + $0x1e8] sm:$0xff]  ;;  %v4367_v30 = vcombine.low %v390_v24, %v391_v25 }
  0x24   :  { %5045 = vmatprep.subr.bf16.mxu1 %v5737_v31  ;;  %321 = vmatprep.mubr.bf16.mxu1 %v4302_v32  ;;  %v4370_v31 = vcombine.high %v392_v28, %v393_v29  ;;  %v5751_v32 = vld [vmem:[%s7190_s2 + $0x18] sm:$0xff]  }
  0x25   :  { %5604 = vmatpush3.bf16.msra.mxu0 %v5755_v37 }
  0x26   :  { %5605 = vmatprep.subr.bf16.mxu0 %v5756_v38 }
  0x27   :  { %5046 = vmatpush3.bf16.msra.mxu1 %v5738_v33  ;;  %v5752_v33 = vld [vmem:[%s7190_s2 + $0x10] sm:$0xff]  }
  0x28   :  { %5047 = vmatprep.subr.bf16.mxu1 %v5739_v34  ;;  %v4369_v34 = vcombine.low %v392_v28, %v393_v29 }
  0x29   :  { %5606 = vmatpush3.bf16.msra.mxu0 %v5756_v38 }
  0x2a   :  { %290 = vmatmul.mubr.bf16.gmra.mxu0 %v4293_v39  ;;  %322 = vmatmul.mubr.bf16.gmra.mxu1 %v4301_v40  ;;  %v5757_v39 = vld [vmem:[%s7190_s2 + $0x28] sm:$0xff]   ;;  %v5758_v40 = vld [vmem:[%s7190_s2 + $0x20] sm:$0xff]  }
  0x2b   :  { %5048 = vmatpush3.bf16.msra.mxu1 %v5740_v41  ;;  %297 = vmatprep.mubr.bf16.mxu0 %v4296_v42  ;;  %v5759_v41 = vld [vmem:[%s7187_s1 + $0x178] sm:$0xff]  }
  0x2c   :  { %5049 = vmatprep.subr.bf16.mxu1 %v5741_v43  ;;  %329 = vmatprep.mubr.bf16.mxu1 %v4304_v44 }
  0x2d   :  { %5607 = vmatprep.subr.bf16.mxu0 %v5757_v39 }
  0x2e   :  { %5608 = vmatpush3.bf16.msra.mxu0 %v5757_v39 }
  0x2f   :  { %5050 = vmatpush3.bf16.msra.mxu1 %v5742_v45  ;;  %5609 = vmatprep.subr.bf16.mxu0 %v5758_v40 }
  0x30   :  { %5051 = vmatprep.subr.bf16.mxu1 %v5743_v46 }
  0x32   :  { %298 = vmatmul.mubr.bf16.gmra.mxu0 %v4295_v53  ;;  %330 = vmatmul.mubr.bf16.gmra.mxu1 %v4303_v54 }
  0x33   :  { %5052 = vmatpush3.bf16.msra.mxu1 %v5744_v52  ;;  %305 = vmatprep.mubr.bf16.mxu0 %v4298_v56 }
  0x34   :  { %5053 = vmatprep.subr.bf16.mxu1 %v5745_v55  ;;  %337 = vmatprep.mubr.bf16.mxu1 %v4306_v57 }
  0x35   :  { %5610 = vmatpush3.bf16.msra.mxu0 %v5758_v40 }
  0x36   :  { %5131 = vmatprep.subr.bf16.mxu0 %v5759_v41 }
  0x37   :  { %5054 = vmatpush3.bf16.msra.mxu1 %v5746_v58 }
  0x38   :  { %5055 = vmatprep.subr.bf16.mxu1 %v5747_v59 }
  0x3a   :  { %306 = vmatmul.mubr.bf16.gmra.mxu0 %v4297_v63  ;;  %338 = vmatmul.mubr.bf16.gmra.mxu1 %v4305_v0 }
  0x3b   :  { %5056 = vmatpush3.bf16.msra.mxu1 %v5748_v62  ;;  %639 = vmatprep.mubr.bf16.mxu1 %v4356_v2 }
  0x3c   :  { %5057 = vmatprep.subr.bf16.mxu1 %v5749_v1 }
  0x3f   :  { %5058 = vmatpush3.bf16.msra.mxu1 %v5750_v3 }
  0x40   :  { %5627 = vmatprep.subr.bf16.mxu1 %v5751_v32 }
  0x42   :  { %640 = vmatmul.mubr.bf16.vlgmr.msra.gmra.mxu1 %v4355_v6 }
  0x43   :  { %647 = vmatprep.mubr.bf16.mxu1 %v4358_v7  ;;  %5628 = vmatpush3.bf16.msra.mxu1 %v5751_v32 }
  0x44   :  { %5629 = vmatprep.subr.bf16.mxu1 %v5752_v33 }
  0x47   :  { %5630 = vmatpush3.bf16.msra.mxu1 %v5752_v33 }
  0x48   :  { %5631 = vmatprep.subr.bf16.mxu1 %v5753_v35 }
  0x4a   :  { %648 = vmatmul.mubr.bf16.gmra.mxu1 %v4357_v10 }
  0x4b   :  { %655 = vmatprep.mubr.bf16.mxu1 %v4360_v11  ;;  %5632 = vmatpush3.bf16.msra.mxu1 %v5753_v35 }
  0x4c   :  { %5633 = vmatprep.subr.bf16.mxu1 %v5754_v36 }
  0x4f   :  { %5634 = vmatpush3.bf16.msra.mxu1 %v5754_v36 }
  0x52   :  { %656 = vmatmul.mubr.bf16.gmra.mxu1 %v4359_v14 }
  0x53   :  { %663 = vmatprep.mubr.bf16.mxu1 %v4362_v15 }
  0x5a   :  { %664 = vmatmul.mubr.bf16.gmra.mxu1 %v4361_v18 }
  0x5b   :  { %671 = vmatprep.mubr.bf16.mxu1 %v4364_v19 }
  0x62   :  { %672 = vmatmul.mubr.bf16.gmra.mxu1 %v4363_v22 }
  0x63   :  { %679 = vmatprep.mubr.bf16.mxu1 %v4366_v23 }
  0x6a   :  { %680 = vmatmul.mubr.bf16.gmra.mxu1 %v4365_v26 }
  0x6b   :  { %687 = vmatprep.mubr.bf16.mxu1 %v4368_v27 }
  0x72   :  { %688 = vmatmul.mubr.bf16.gmra.mxu1 %v4367_v30 }
  0x73   :  { %695 = vmatprep.mubr.bf16.mxu1 %v4370_v31 }
  0x7a   :  { %696 = vmatmul.mubr.bf16.gmra.mxu1 %v4369_v34 }
  0xe2   :  { %v4995_v42 = vpop.f32.mrf.mxu0  ;;  %v5019_v43 = vpop.f32.mrf.mxu1 }
  0xe4   :  { %v4996_v44 = vpop.f32.mrf.mxu0  ;;  %v5020_v45 = vpop.f32.mrf.mxu1 }
  0xe5   :  { %v4997_v46 = vadd.f32 %v4996_v44, %v4995_v42  ;;  %v5021_v29 = vadd.f32 %v5020_v45, %v5019_v43 }
  0xe6   :  { %v4998_v47 = vpop.f32.mrf.mxu0  ;;  %v5022_v48 = vpop.f32.mrf.mxu1 }
  0xe7   :  { %v284_v50 = vadd.f32 %v4997_v46, %v6148_v49  ;;  %v316_v38 = vadd.f32 %v5021_v29, %v6148_v49 }
  0xe8   :  { %v4999_v51 = vpop.f32.mrf.mxu0  ;;  %v5023_v52 = vpop.f32.mrf.mxu1 }
  0xe9   :  { %v5000_v53 = vadd.f32 %v4999_v51, %v4998_v47  ;;  %v346_v56 = vmax.f32 %v284_v50, 0.0  ;;  %v5024_v24 = vadd.f32 %v5023_v52, %v5022_v48  ;;  %v354_v50 = vmax.f32 %v316_v38, 0.0  ;;  %v6267_v52 = vpop.permute.xlu0 %604  ;;  %v5763_v38 = vld [vmem:[%s7187_s1 + $0x168] sm:$0xff]  }
  0xea   :  { %v5001_v54 = vpop.f32.mrf.mxu0  ;;  %v5025_v55 = vpop.f32.mrf.mxu1 }
  0xeb   :  { %v287_v57 = vadd.f32 %v5000_v53, %v6148_v49  ;;  %v319_v34 = vadd.f32 %v5024_v24, %v6148_v49 }
  0xec   :  { %v5002_v58 = vpop.f32.mrf.mxu0  ;;  %v5026_v59 = vpop.f32.mrf.mxu1 }
  0xed   :  { %v347_v60 = vmax.f32 %v287_v57, 0.0  ;;  %v5003_v61 = vadd.f32 %v5002_v58, %v5001_v54  ;;  %v355_v43 = vmax.f32 %v319_v34, 0.0  ;;  %v5027_v44 = vadd.f32 %v5026_v59, %v5025_v55 }
  0xee   :  { %v5004_v62 = vpop.f32.mrf.mxu0  ;;  %v5028_v63 = vpop.f32.mrf.mxu1 }
  0xef   :  { %v362_v0 = vpack.c.bf16 %v347_v60, %v346_v56  ;;  %v292_v1 = vadd.f32 %v5003_v61, %v6148_v49  ;;  %v366_v57 = vpack.c.bf16 %v355_v43, %v354_v50  ;;  %v324_v58 = vadd.f32 %v5027_v44, %v6148_v49  ;;  %v5764_v44 = vld [vmem:[%s7187_s1 + $0x128] sm:$0xff]  }
  0xf0   :  { %v5005_v2 = vpop.f32.mrf.mxu0  ;;  %v5029_v3 = vpop.f32.mrf.mxu1 }
  0xf1   :  { %v5006_v4 = vadd.f32 %v5005_v2, %v5004_v62  ;;  %5635 = vmatprep.mubr.msk.bf16.mxu1 %vm760_vm0, %v362_v0  ;;  %v348_v7 = vmax.f32 %v292_v1, 0.0  ;;  %v5030_v40 = vadd.f32 %v5029_v3, %v5028_v63  ;;  %v356_v3 = vmax.f32 %v324_v58, 0.0 }
  0xf2   :  { %v5007_v5 = vpop.f32.mrf.mxu0  ;;  %v5031_v6 = vpop.f32.mrf.mxu1 }
  0xf3   :  { %v295_v8 = vadd.f32 %v5006_v4, %v6148_v49  ;;  %v327_v54 = vadd.f32 %v5030_v40, %v6148_v49 }
  0xf4   :  { %v5008_v9 = vpop.f32.mrf.mxu0  ;;  %v5032_v10 = vpop.f32.mrf.mxu1 }
  0xf5   :  { %v349_v11 = vmax.f32 %v295_v8, 0.0  ;;  %v5009_v12 = vadd.f32 %v5008_v9, %v5007_v5  ;;  %v5033_v51 = vadd.f32 %v5032_v10, %v5031_v6  ;;  %v357_v0 = vmax.f32 %v327_v54, 0.0 }
  0xf6   :  { %v5010_v13 = vpop.f32.mrf.mxu0  ;;  %v5034_v14 = vpop.f32.mrf.mxu1 }
  0xf7   :  { %v363_v15 = vpack.c.bf16 %v349_v11, %v348_v7  ;;  %v300_v16 = vadd.f32 %v5009_v12, %v6148_v49  ;;  %v332_v62 = vadd.f32 %v5033_v51, %v6148_v49  ;;  %v367_v12 = vpack.c.bf16 %v357_v0, %v356_v3 }
  0xf8   :  { %v5011_v17 = vpop.f32.mrf.mxu0  ;;  %v5035_v18 = vpop.f32.mrf.mxu1 }
  0xf9   :  { %v5012_v19 = vadd.f32 %v5011_v17, %v5010_v13  ;;  %5636 = vmatmul.mubr.msk.bf16.vlgmr.msra.gmra.mxu1 %vm760_vm0, %v363_v15  ;;  %v350_v22 = vmax.f32 %v300_v16, 0.0  ;;  %v5036_v45 = vadd.f32 %v5035_v18, %v5034_v14  ;;  %v358_v10 = vmax.f32 %v332_v62, 0.0 }
  0xfa   :  { %v5013_v20 = vpop.f32.mrf.mxu0  ;;  %v5037_v21 = vpop.f32.mrf.mxu1 }
  0xfb   :  { %v303_v23 = vadd.f32 %v5012_v19, %v6148_v49  ;;  %v335_v60 = vadd.f32 %v5036_v45, %v6148_v49 }
  0xfc   :  { %v5014_v25 = vpop.f32.mrf.mxu0  ;;  %v5038_v26 = vpop.f32.mrf.mxu1 }
  0xfd   :  { %v351_v27 = vmax.f32 %v303_v23, 0.0  ;;  %v5015_v28 = vadd.f32 %v5014_v25, %v5013_v20  ;;  %v359_v4 = vmax.f32 %v335_v60, 0.0  ;;  %v5039_v6 = vadd.f32 %v5038_v26, %v5037_v21 }
  0xfe   :  { %v5016_v30 = vpop.f32.mrf.mxu0  ;;  %v5040_v31 = vpop.f32.mrf.mxu1 }
  0xff   :  { %v364_v32 = vpack.c.bf16 %v351_v27, %v350_v22  ;;  %v308_v33 = vadd.f32 %v5015_v28, %v6148_v49  ;;  %v368_v15 = vpack.c.bf16 %v359_v4, %v358_v10  ;;  %v340_v17 = vadd.f32 %v5039_v6, %v6148_v49  ;;  %v5770_v4 = vld [vmem:[%s7187_s1 + $0x110] sm:$0xff]   ;;  %v5771_v6 = vld [vmem:[%s7187_s1 + $0x148] sm:$0xff]  }
 0x100   :  { %v5017_v35 = vpop.f32.mrf.mxu0  ;;  %v5041_v36 = vpop.f32.mrf.mxu1 }
 0x101   :  { %v5018_v37 = vadd.f32 %v5017_v35, %v5016_v30  ;;  %5639 = vmatprep.mubr.msk.bf16.mxu1 %vm760_vm0, %v364_v32  ;;  %v352_v41 = vmax.f32 %v308_v33, 0.0  ;;  %v5042_v1 = vadd.f32 %v5041_v36, %v5040_v31  ;;  %v360_v24 = vmax.f32 %v340_v17, 0.0  ;;  %v5761_v31 = vld [vmem:[%s7187_s1 + $0x170] sm:$0xff]  }
 0x102   :  { %v5059_v39 = vpop.f32.mrf.mxu1  ;;  %v5762_v36 = vld [vmem:[%s7187_s1 + $0x130] sm:$0xff]  }
 0x103   :  { %v311_v42 = vadd.f32 %v5018_v37, %v6148_v49  ;;  %v343_v13 = vadd.f32 %v5042_v1, %v6148_v49  ;;  %v5760_v49 = vld [vmem:[%s7187_s1 + $0x138] sm:$0xff]  }
 0x104   :  { %v5060_v46 = vpop.f32.mrf.mxu1 }
 0x105   :  { %v353_v47 = vmax.f32 %v311_v42, 0.0  ;;  %v5061_v48 = vadd.f32 %v5060_v46, %v5059_v39  ;;  %v361_v21 = vmax.f32 %v343_v13, 0.0  ;;  %v5765_v46 = vld [vmem:[%s7187_s1 + $0x160] sm:$0xff]  }
 0x106   :  { %v5062_v53 = vpop.f32.mrf.mxu1 }
 0x107   :  { %v365_v56 = vpack.c.bf16 %v353_v47, %v352_v41  ;;  %v642_v55 = vadd.f32 %v5061_v48, %v6267_v52  ;;  %v369_v29 = vpack.c.bf16 %v361_v21, %v360_v24 }
 0x108   :  { %v5063_v61 = vpop.f32.mrf.mxu1 }
 0x109   :  { %v5064_v59 = vadd.f32 %v5063_v61, %v5062_v53  ;;  %5640 = vmatmul.mubr.msk.bf16.gmra.mxu1 %vm760_vm0, %v365_v56  ;;  %v704_v7 = vmax.f32 %v642_v55, 0.0  ;;  %v5766_v53 = vld [vmem:[%s7187_s1 + $0x120] sm:$0xff]   ;;  %v5767_v56 = vld [vmem:[%s7187_s1 + $0x158] sm:$0xff]  }
 0x10a   :  { %v5065_v63 = vpop.f32.mrf.mxu1  ;;  %5643 = vmatprep.mubr.msk.bf16.mxu1 %vm760_vm0, %v366_v57 }
 0x10b   :  { %v645_v2 = vadd.f32 %v5064_v59, %v6267_v52  ;;  %v5768_v59 = vld [vmem:[%s7187_s1 + $0x118] sm:$0xff]  }
 0x10c   :  { %v5066_v5 = vpop.f32.mrf.mxu1 }
 0x10d   :  { %v705_v8 = vmax.f32 %v645_v2, 0.0  ;;  %v5067_v9 = vadd.f32 %v5066_v5, %v5065_v63  ;;  %v5769_v63 = vld [vmem:[%s7187_s1 + $0x150] sm:$0xff]  }
 0x10e   :  { %v5068_v11 = vpop.f32.mrf.mxu1 }
 0x10f   :  { %v720_v14 = vpack.c.bf16 %v705_v8, %v704_v7  ;;  %v650_v18 = vadd.f32 %v5067_v9, %v6267_v52 }
 0x110   :  { %v5069_v16 = vpop.f32.mrf.mxu1 }
 0x111   :  { %v5070_v19 = vadd.f32 %v5069_v16, %v5068_v11  ;;  %5611 = vmatprep.mubr.msk.bf16.mxu0 %vm760_vm0, %v720_v14  ;;  %5644 = vmatmul.mubr.msk.bf16.gmra.mxu1 %vm760_vm0, %v367_v12  ;;  %v706_v25 = vmax.f32 %v650_v18, 0.0  ;;  %v5772_v12 = vld [vmem:[%s7187_s1 + $0x108] sm:$0xff]   ;;  %v5773_v14 = vld [vmem:[%s7187_s1 + $0x140] sm:$0xff]  }
 0x112   :  { %v5071_v20 = vpop.f32.mrf.mxu1  ;;  %5647 = vmatprep.mubr.msk.bf16.mxu1 %vm760_vm0, %v368_v15 }
 0x113   :  { %v653_v22 = vadd.f32 %v5070_v19, %v6267_v52  ;;  %v5774_v19 = vld [vmem:[%s7187_s1 + $0x100] sm:$0xff]  }
 0x114   :  { %v5072_v23 = vpop.f32.mrf.mxu1 }
 0x115   :  { %v707_v26 = vmax.f32 %v653_v22, 0.0  ;;  %v5073_v27 = vadd.f32 %v5072_v23, %v5071_v20 }
 0x116   :  { %v5074_v28 = vpop.f32.mrf.mxu1 }
 0x117   :  { %v721_v30 = vpack.c.bf16 %v707_v26, %v706_v25  ;;  %v658_v33 = vadd.f32 %v5073_v27, %v6267_v52 }
 0x118   :  { %v5075_v32 = vpop.f32.mrf.mxu1 }
 0x119   :  { %v5076_v34 = vadd.f32 %v5075_v32, %v5074_v28  ;;  %5612 = vmatmul.mubr.msk.bf16.vlgmr.msra.gmra.mxu0 %vm760_vm0, %v721_v30  ;;  %5648 = vmatmul.mubr.msk.bf16.gmra.mxu1 %vm760_vm0, %v369_v29  ;;  %v708_v40 = vmax.f32 %v658_v33, 0.0 }
 0x11a   :  { %v5077_v35 = vpop.f32.mrf.mxu1  ;;  %5132 = vmatpush3.bf16.msra.mxu0 %v5760_v49 }
 0x11b   :  { %v661_v37 = vadd.f32 %v5076_v34, %v6267_v52  ;;  %5133 = vmatprep.subr.bf16.mxu0 %v5761_v31 }
 0x11c   :  { %v5078_v39 = vpop.f32.mrf.mxu1 }
 0x11d   :  { %v709_v41 = vmax.f32 %v661_v37, 0.0  ;;  %v5079_v42 = vadd.f32 %v5078_v39, %v5077_v35 }
 0x11e   :  { %v5080_v43 = vpop.f32.mrf.mxu1  ;;  %5134 = vmatpush3.bf16.msra.mxu0 %v5762_v36 }
 0x11f   :  { %v722_v45 = vpack.c.bf16 %v709_v41, %v708_v40  ;;  %5135 = vmatprep.subr.bf16.mxu0 %v5763_v38  ;;  %v666_v48 = vadd.f32 %v5079_v42, %v6267_v52  ;;  %v1027_v41 = vld [vmem:[%s7188_s0 + $0x10] sm:$0xff] }
 0x120   :  { %v5081_v47 = vpop.f32.mrf.mxu1  ;;  %v1028_v42 = vld [vmem:[%s7188_s0 + $0x30] sm:$0xff] }
 0x121   :  { %v5082_v50 = vadd.f32 %v5081_v47, %v5080_v43  ;;  %5615 = vmatprep.mubr.msk.bf16.mxu0 %vm760_vm0, %v722_v45  ;;  %v710_v58 = vmax.f32 %v666_v48, 0.0  ;;  %v4444_v45 = vcombine.high %v1027_v41, %v1028_v42  ;;  %v1029_v47 = vld [vmem:[%s7188_s0 + $0x50] sm:$0xff]  ;;  %v4443_v48 = vcombine.low %v1027_v41, %v1028_v42 }
 0x122   :  { %v5083_v51 = vpop.f32.mrf.mxu1  ;;  %5136 = vmatpush3.bf16.msra.mxu0 %v5764_v44 }
 0x123   :  { %v669_v54 = vadd.f32 %v5082_v50, %v6267_v52  ;;  %5137 = vmatprep.subr.bf16.mxu0 %v5765_v46 }
 0x124   :  { %v5084_v57 = vpop.f32.mrf.mxu1 }
 0x125   :  { %v711_v60 = vmax.f32 %v669_v54, 0.0  ;;  %v5085_v61 = vadd.f32 %v5084_v57, %v5083_v51  ;;  %v1031_v51 = vld [vmem:[%s7188_s0 + $0x90] sm:$0xff] }
 0x126   :  { %v5086_v55 = vpop.f32.mrf.mxu1  ;;  %5138 = vmatpush3.bf16.msra.mxu0 %v5766_v53  ;;  %v1032_v53 = vld [vmem:[%s7188_s0 + $0xb0] sm:$0xff] }
 0x127   :  { %v723_v62 = vpack.c.bf16 %v711_v60, %v710_v58  ;;  %5139 = vmatprep.subr.bf16.mxu0 %v5767_v56  ;;  %v674_v1 = vadd.f32 %v5085_v61, %v6267_v52  ;;  %v4448_v56 = vcombine.high %v1031_v51, %v1032_v53  ;;  %v1033_v57 = vld [vmem:[%s7188_s0 + $0xd0] sm:$0xff]  ;;  %v4447_v60 = vcombine.low %v1031_v51, %v1032_v53 }
 0x128   :  { %v5087_v0 = vpop.f32.mrf.mxu1  ;;  %v1034_v58 = vld [vmem:[%s7188_s0 + $0xf0] sm:$0xff] }
 0x129   :  { %v5088_v2 = vadd.f32 %v5087_v0, %v5086_v55  ;;  %5616 = vmatmul.mubr.msk.bf16.gmra.mxu0 %vm760_vm0, %v723_v62  ;;  %v712_v8 = vmax.f32 %v674_v1, 0.0  ;;  %v4450_v61 = vcombine.high %v1033_v57, %v1034_v58  ;;  %v1035_v55 = vld [vmem:[%s7188_s0 + $0x110] sm:$0xff]  ;;  %v4449_v62 = vcombine.low %v1033_v57, %v1034_v58 }
 0x12a   :  { %v5089_v3 = vpop.f32.mrf.mxu1  ;;  %5140 = vmatpush3.bf16.msra.mxu0 %v5768_v59  ;;  %v1036_v59 = vld [vmem:[%s7188_s0 + $0x130] sm:$0xff] }
 0x12b   :  { %v677_v5 = vadd.f32 %v5088_v2, %v6267_v52  ;;  %5141 = vmatprep.subr.bf16.mxu0 %v5769_v63  ;;  %v4452_v63 = vcombine.high %v1035_v55, %v1036_v59  ;;  %v1037_v0 = vld [vmem:[%s7188_s0 + $0x150] sm:$0xff]  ;;  %v4451_v2 = vcombine.low %v1035_v55, %v1036_v59 }
 0x12c   :  { %v5090_v7 = vpop.f32.mrf.mxu1  ;;  %v1038_v1 = vld [vmem:[%s7188_s0 + $0x170] sm:$0xff] }
 0x12d   :  { %v713_v9 = vmax.f32 %v677_v5, 0.0  ;;  %v5091_v10 = vadd.f32 %v5090_v7, %v5089_v3  ;;  %v4454_v3 = vcombine.high %v1037_v0, %v1038_v1  ;;  %v1040_v5 = vld [vmem:[%s7188_s0 + $0x1b0] sm:$0xff] }
 0x12e   :  { %v5092_v11 = vpop.f32.mrf.mxu1  ;;  %5142 = vmatpush3.bf16.msra.mxu0 %v5770_v4  ;;  %v1039_v4 = vld [vmem:[%s7188_s0 + $0x190] sm:$0xff] }
 0x12f   :  { %v724_v13 = vpack.c.bf16 %v713_v9, %v712_v8  ;;  %5143 = vmatprep.subr.bf16.mxu0 %v5771_v6  ;;  %v682_v16 = vadd.f32 %v5091_v10, %v6267_v52  ;;  %v4453_v6 = vcombine.low %v1037_v0, %v1038_v1  ;;  %v4456_v7 = vcombine.high %v1039_v4, %v1040_v5  ;;  %v1041_v8 = vld [vmem:[%s7188_s0 + $0x1d0] sm:$0xff] }
 0x130   :  { %v5093_v15 = vpop.f32.mrf.mxu1  ;;  %v1042_v9 = vld [vmem:[%s7188_s0 + $0x1f0] sm:$0xff]  ;;  %v4455_v10 = vcombine.low %v1039_v4, %v1040_v5 }
 0x131   :  { %v5094_v17 = vadd.f32 %v5093_v15, %v5092_v11  ;;  %5619 = vmatprep.mubr.msk.bf16.mxu0 %vm760_vm0, %v724_v13  ;;  %v714_v22 = vmax.f32 %v682_v16, 0.0  ;;  %v4458_v11 = vcombine.high %v1041_v8, %v1042_v9  ;;  %v6400_v13 = vld [vmem:[%s7189_s5 + $0x8] ss:$0 sm:$0xff]  ;;  %v5776_v15 = vld [vmem:[%s7190_s2 + $0x50] sm:$0xff]  }
 0x132   :  { %v5095_v18 = vpop.f32.mrf.mxu1  ;;  %5144 = vmatpush3.bf16.msra.mxu0 %v5772_v12  ;;  %v4457_v12 = vcombine.low %v1041_v8, %v1042_v9  ;;  %1769 = vrot.lane.b32.xlu0 %v6400_v13, %s5989_s11  ;;  %v5777_v16 = vld [vmem:[%s7190_s2 + $0x48] sm:$0xff]  }
 0x133   :  { %v685_v20 = vadd.f32 %v5094_v17, %v6267_v52  ;;  %5145 = vmatprep.subr.bf16.mxu0 %v5773_v14  ;;  %v5775_v14 = vld [vmem:[%s7190_s2 + $0x58] sm:$0xff]   ;;  %v5778_v17 = vld [vmem:[%s7190_s2 + $0x40] sm:$0xff]  }
 0x134   :  { %v5096_v21 = vpop.f32.mrf.mxu1  ;;  %5651 = vmatprep.subr.bf16.mxu1 %v5775_v14 }
 0x135   :  { %v715_v23 = vmax.f32 %v685_v20, 0.0  ;;  %v5097_v24 = vadd.f32 %v5096_v21, %v5095_v18  ;;  %5652 = vmatpush3.bf16.msra.mxu1 %v5775_v14  ;;  %v5779_v18 = vld [vmem:[%s7187_s1 + $0x1f8] sm:$0xff]  }
 0x136   :  { %v5098_v25 = vpop.f32.mrf.mxu1  ;;  %5146 = vmatpush3.bf16.msra.mxu0 %v5774_v19  ;;  %5653 = vmatprep.subr.bf16.mxu1 %v5776_v15 }
 0x137   :  { %v725_v26 = vpack.c.bf16 %v715_v23, %v714_v22  ;;  %v690_v28 = vadd.f32 %v5097_v24, %v6267_v52 }
 0x138   :  { %v5099_v27 = vpop.f32.mrf.mxu1 }
 0x139   :  { %v5100_v49 = vadd.f32 %v5099_v27, %v5098_v25  ;;  %5620 = vmatmul.mubr.msk.bf16.gmra.mxu0 %vm760_vm0, %v725_v26  ;;  %v716_v32 = vmax.f32 %v690_v28, 0.0  ;;  %5654 = vmatpush3.bf16.msra.mxu1 %v5776_v15 }
 0x13a   :  { %v5101_v29 = vpop.f32.mrf.mxu1  ;;  %5655 = vmatprep.subr.bf16.mxu1 %v5777_v16 }
 0x13b   :  { %v693_v30 = vadd.f32 %v5100_v49, %v6267_v52 }
 0x13c   :  { %v5102_v31 = vpop.f32.mrf.mxu1 }
 0x13d   :  { %v717_v33 = vmax.f32 %v693_v30, 0.0  ;;  %v5103_v34 = vadd.f32 %v5102_v31, %v5101_v29  ;;  %5656 = vmatpush3.bf16.msra.mxu1 %v5777_v16 }
 0x13e   :  { %v5104_v35 = vpop.f32.mrf.mxu1  ;;  %5657 = vmatprep.subr.bf16.mxu1 %v5778_v17 }
 0x13f   :  { %v726_v36 = vpack.c.bf16 %v717_v33, %v716_v32  ;;  %v698_v38 = vadd.f32 %v5103_v34, %v6267_v52 }
 0x140   :  { %v5105_v37 = vpop.f32.mrf.mxu1 }
 0x141   :  { %v5106_v39 = vadd.f32 %v5105_v37, %v5104_v35  ;;  %5623 = vmatprep.mubr.msk.bf16.mxu0 %vm760_vm0, %v726_v36  ;;  %v718_v43 = vmax.f32 %v698_v38, 0.0  ;;  %5658 = vmatpush3.bf16.msra.mxu1 %v5778_v17 }
 0x142   :  { %5207 = vmatprep.subr.bf16.mxu1 %v5779_v18 }
 0x143   :  { %v701_v40 = vadd.f32 %v5106_v39, %v6267_v52  ;;  %v1030_v52 = vld [vmem:[%s7188_s0 + $0x70] sm:$0xff] }
 0x144   :  { %v4446_v50 = vcombine.high %v1029_v47, %v1030_v52  ;;  %v4445_v54 = vcombine.low %v1029_v47, %v1030_v52 }
 0x145   :  { %v719_v44 = vmax.f32 %v701_v40, 0.0 }
 0x147   :  { %v727_v46 = vpack.c.bf16 %v719_v44, %v718_v43 }
 0x149   :  { %5624 = vmatmul.mubr.msk.bf16.gmra.mxu0 %vm760_vm0, %v727_v46 }
 0x14a   :  { %1285 = vmatprep.mubr.bf16.mxu0 %v4444_v45 }
 0x151   :  { %1286 = vmatmul.mubr.bf16.vlgmr.msra.gmra.mxu0 %v4443_v48 }
 0x152   :  { %1293 = vmatprep.mubr.bf16.mxu0 %v4446_v50 }
 0x159   :  { %1294 = vmatmul.mubr.bf16.gmra.mxu0 %v4445_v54 }
 0x15a   :  { %1301 = vmatprep.mubr.bf16.mxu0 %v4448_v56 }
 0x161   :  { %1302 = vmatmul.mubr.bf16.gmra.mxu0 %v4447_v60 }
 0x162   :  { %1309 = vmatprep.mubr.bf16.mxu0 %v4450_v61 }
 0x169   :  { %1310 = vmatmul.mubr.bf16.gmra.mxu0 %v4449_v62 }
 0x16a   :  { %1317 = vmatprep.mubr.bf16.mxu0 %v4452_v63 }
 0x171   :  { %1318 = vmatmul.mubr.bf16.gmra.mxu0 %v4451_v2 }
 0x172   :  { %1325 = vmatprep.mubr.bf16.mxu0 %v4454_v3 }
 0x179   :  { %1326 = vmatmul.mubr.bf16.gmra.mxu0 %v4453_v6 }
 0x17a   :  { %1333 = vmatprep.mubr.bf16.mxu0 %v4456_v7 }
 0x181   :  { %1334 = vmatmul.mubr.bf16.gmra.mxu0 %v4455_v10 }
 0x182   :  { %1341 = vmatprep.mubr.bf16.mxu0 %v4458_v11 }
 0x189   :  { %1342 = vmatmul.mubr.bf16.gmra.mxu0 %v4457_v12 }
 0x1b9   :  { %v5637_v19 = vpop.f32.mrf.mxu1 }
 0x1bb   :  { %v964_v20 = vpop.f32.mrf.mxu1 }
 0x1bd   :  { %v5638_v25 = vpop.f32.mrf.mxu1 }
 0x1bf   :  { %v6425_v28 = vpop.f32.mrf.mxu1 }
 0x1c9   :  { %v5641_v49 = vpop.f32.mrf.mxu1 }
 0x1cb   :  { %v980_v30 = vpop.f32.mrf.mxu1 }
 0x1cd   :  { %v5642_v35 = vpop.f32.mrf.mxu1 }
 0x1cf   :  { %v6435_v38 = vpop.f32.mrf.mxu1 }
 0x1d1   :  { %v5645_v39 = vpop.f32.mrf.mxu1 }
 0x1d3   :  { %v996_v41 = vpop.f32.mrf.mxu1 }
 0x1d5   :  { %v5646_v46 = vpop.f32.mrf.mxu1 }
 0x1d7   :  { %v6445_v48 = vpop.f32.mrf.mxu1 }
 0x1d9   :  { %v5613_v21 = vpop.f32.mrf.mxu0  ;;  %v5649_v50 = vpop.f32.mrf.mxu1 }
 0x1da   :  { %v6419_v22 = vadd.f32 %v5637_v19, %v5613_v21 }
 0x1db   :  { %v819_v23 = vpop.f32.mrf.mxu0  ;;  %v1012_v53 = vpop.f32.mrf.mxu1 }
 0x1dc   :  { %v6421_v24 = vadd.f32 %v964_v20, %v819_v23 }
 0x1dd   :  { %v5614_v26 = vpop.f32.mrf.mxu0  ;;  %v5650_v60 = vpop.f32.mrf.mxu1 }
 0x1de   :  { %v6423_v27 = vadd.f32 %v5638_v25, %v5614_v26  ;;  %v5780_v26 = vld [vmem:[%s7187_s1 + $0x1b8] sm:$0xff]  }
 0x1df   :  { %v6427_v29 = vpop.f32.mrf.mxu0 }
 0x1e9   :  { %v5617_v31 = vpop.f32.mrf.mxu0 }
 0x1ea   :  { %v6429_v32 = vadd.f32 %v5641_v49, %v5617_v31 }
 0x1eb   :  { %v835_v33 = vpop.f32.mrf.mxu0 }
 0x1ec   :  { %v6431_v34 = vadd.f32 %v980_v30, %v835_v33  ;;  %v5781_v30 = vld [vmem:[%s7187_s1 + $0x1f0] sm:$0xff]  }
 0x1ed   :  { %v5618_v36 = vpop.f32.mrf.mxu0 }
 0x1ee   :  { %v6433_v37 = vadd.f32 %v5642_v35, %v5618_v36 }
 0x1ef   :  { %v6437_v40 = vpop.f32.mrf.mxu0 }
 0x1f9   :  { %v5621_v42 = vpop.f32.mrf.mxu0 }
 0x1fa   :  { %v6439_v43 = vadd.f32 %v5645_v39, %v5621_v42  ;;  %v5782_v39 = vld [vmem:[%s7187_s1 + $0x1b0] sm:$0xff]   ;;  %v5783_v42 = vld [vmem:[%s7187_s1 + $0x1e8] sm:$0xff]  }
 0x1fb   :  { %v851_v44 = vpop.f32.mrf.mxu0 }
 0x1fc   :  { %v6441_v45 = vadd.f32 %v996_v41, %v851_v44 }
 0x1fd   :  { %v5622_v47 = vpop.f32.mrf.mxu0 }
 0x1fe   :  { %v6443_v52 = vadd.f32 %v5646_v46, %v5622_v47 }
 0x1ff   :  { %v6447_v51 = vpop.f32.mrf.mxu0 }
 0x209   :  { %v5625_v54 = vpop.f32.mrf.mxu0 }
 0x20a   :  { %v6449_v56 = vadd.f32 %v5649_v50, %v5625_v54  ;;  %v5784_v54 = vld [vmem:[%s7187_s1 + $0x1a8] sm:$0xff]  }
 0x20b   :  { %v867_v57 = vpop.f32.mrf.mxu0 }
 0x20c   :  { %v6451_v58 = vadd.f32 %v1012_v53, %v867_v57 }
 0x20d   :  { %v5626_v61 = vpop.f32.mrf.mxu0 }
 0x20e   :  { %v6453_v55 = vadd.f32 %v5650_v60, %v5626_v61  ;;  %v5785_v60 = vld [vmem:[%s7187_s1 + $0x1e0] sm:$0xff]  }
 0x20f   :  { %v6455_v59 = vpop.f32.mrf.mxu0 }
 0x211   :  { %v5147_v62 = vpop.f32.mrf.mxu0 }
 0x213   :  { %v5148_v63 = vpop.f32.mrf.mxu0 }
 0x214   :  { %v5149_v0 = vadd.f32 %v5148_v63, %v5147_v62 }
 0x215   :  { %v5150_v1 = vpop.f32.mrf.mxu0 }
 0x216   :  { %v1288_v3 = vadd.f32 %v5149_v0, %v6400_v13 }
 0x217   :  { %v5151_v2 = vpop.f32.mrf.mxu0 }
 0x218   :  { %v5152_v4 = vadd.f32 %v5151_v2, %v5150_v1  ;;  %v1350_v8 = vmax.f32 %v1288_v3, 0.0  ;;  %v5786_v1 = vld [vmem:[%s7187_s1 + $0x1a0] sm:$0xff]   ;;  %v5787_v3 = vld [vmem:[%s7187_s1 + $0x1d8] sm:$0xff]  }
 0x219   :  { %v5153_v5 = vpop.f32.mrf.mxu0 }
 0x21a   :  { %v1291_v6 = vadd.f32 %v5152_v4, %v6400_v13 }
 0x21b   :  { %v5154_v7 = vpop.f32.mrf.mxu0 }
 0x21c   :  { %v1351_v9 = vmax.f32 %v1291_v6, 0.0  ;;  %v5155_v10 = vadd.f32 %v5154_v7, %v5153_v5 }
 0x21d   :  { %v5156_v11 = vpop.f32.mrf.mxu0 }
 0x21e   :  { %v1366_v12 = vpack.c.bf16 %v1351_v9, %v1350_v8  ;;  %v1296_v15 = vadd.f32 %v5155_v10, %v6400_v13  ;;  %v5788_v9 = vld [vmem:[%s7187_s1 + $0x198] sm:$0xff]  }
 0x21f   :  { %v5157_v14 = vpop.f32.mrf.mxu0 }
 0x220   :  { %v5158_v16 = vadd.f32 %v5157_v14, %v5156_v11  ;;  %5659 = vmatprep.mubr.msk.bf16.mxu1 %vm760_vm0, %v1366_v12  ;;  %v1352_v20 = vmax.f32 %v1296_v15, 0.0  ;;  %v5789_v11 = vld [vmem:[%s7187_s1 + $0x1d0] sm:$0xff]  }
 0x221   :  { %v5159_v17 = vpop.f32.mrf.mxu0 }
 0x222   :  { %v1299_v18 = vadd.f32 %v5158_v16, %v6400_v13 }
 0x223   :  { %v5160_v19 = vpop.f32.mrf.mxu0 }
 0x224   :  { %v1353_v21 = vmax.f32 %v1299_v18, 0.0  ;;  %v5161_v23 = vadd.f32 %v5160_v19, %v5159_v17  ;;  %v5790_v17 = vld [vmem:[%s7187_s1 + $0x190] sm:$0xff]   ;;  %v5791_v19 = vld [vmem:[%s7187_s1 + $0x1c8] sm:$0xff]  }
 0x225   :  { %v5162_v25 = vpop.f32.mrf.mxu0 }
 0x226   :  { %v1367_v49 = vpack.c.bf16 %v1353_v21, %v1352_v20  ;;  %v1304_v33 = vadd.f32 %v5161_v23, %v6400_v13 }
 0x227   :  { %v5163_v31 = vpop.f32.mrf.mxu0 }
 0x228   :  { %v5164_v35 = vadd.f32 %v5163_v31, %v5162_v25  ;;  %5660 = vmatmul.mubr.msk.bf16.vlgmr.msra.gmra.mxu1 %vm760_vm0, %v1367_v49  ;;  %v1354_v46 = vmax.f32 %v1304_v33, 0.0  ;;  %v5792_v49 = vld [vmem:[%s7187_s1 + $0x188] sm:$0xff]   ;;  %v5793_v31 = vld [vmem:[%s7187_s1 + $0x1c0] sm:$0xff]  }
 0x229   :  { %v5165_v36 = vpop.f32.mrf.mxu0  ;;  %5208 = vmatpush3.bf16.msra.mxu1 %v5780_v26 }
 0x22a   :  { %v1307_v41 = vadd.f32 %v5164_v35, %v6400_v13  ;;  %5209 = vmatprep.subr.bf16.mxu1 %v5781_v30 }
 0x22b   :  { %v5166_v44 = vpop.f32.mrf.mxu0 }
 0x22c   :  { %v1355_v47 = vmax.f32 %v1307_v41, 0.0  ;;  %v5167_v50 = vadd.f32 %v5166_v44, %v5165_v36  ;;  %v5794_v41 = vld [vmem:[%s7187_s1 + $0x180] sm:$0xff]  }
 0x22d   :  { %v5168_v53 = vpop.f32.mrf.mxu0  ;;  %5210 = vmatpush3.bf16.msra.mxu1 %v5782_v39 }
 0x22e   :  { %v1368_v57 = vpack.c.bf16 %v1355_v47, %v1354_v46  ;;  %5211 = vmatprep.subr.bf16.mxu1 %v5783_v42  ;;  %v1312_v62 = vadd.f32 %v5167_v50, %v6400_v13 }
 0x22f   :  { %v5169_v61 = vpop.f32.mrf.mxu0 }
 0x230   :  { %v5170_v63 = vadd.f32 %v5169_v61, %v5168_v53  ;;  %5663 = vmatprep.mubr.msk.bf16.mxu1 %vm760_vm0, %v1368_v57  ;;  %v1356_v5 = vmax.f32 %v1312_v62, 0.0 }
 0x231   :  { %v5171_v0 = vpop.f32.mrf.mxu0  ;;  %5212 = vmatpush3.bf16.msra.mxu1 %v5784_v54 }
 0x232   :  { %v1315_v2 = vadd.f32 %v5170_v63, %v6400_v13  ;;  %5213 = vmatprep.subr.bf16.mxu1 %v5785_v60 }
 0x233   :  { %v5172_v4 = vpop.f32.mrf.mxu0 }
 0x234   :  { %v1357_v6 = vmax.f32 %v1315_v2, 0.0  ;;  %v5173_v7 = vadd.f32 %v5172_v4, %v5171_v0 }
 0x235   :  { %v5174_v8 = vpop.f32.mrf.mxu0  ;;  %5214 = vmatpush3.bf16.msra.mxu1 %v5786_v1 }
 0x236   :  { %v1369_v10 = vpack.c.bf16 %v1357_v6, %v1356_v5  ;;  %5215 = vmatprep.subr.bf16.mxu1 %v5787_v3  ;;  %v1320_v14 = vadd.f32 %v5173_v7, %v6400_v13 }
 0x237   :  { %v5175_v12 = vpop.f32.mrf.mxu0 }
 0x238   :  { %v5176_v15 = vadd.f32 %v5175_v12, %v5174_v8  ;;  %5664 = vmatmul.mubr.msk.bf16.gmra.mxu1 %vm760_vm0, %v1369_v10  ;;  %v1358_v21 = vmax.f32 %v1320_v14, 0.0  ;;  %v1543_v10 = vld [vmem:[%s7188_s0 + $0x18] sm:$0xff] }
 0x239   :  { %v5177_v16 = vpop.f32.mrf.mxu0  ;;  %5216 = vmatpush3.bf16.msra.mxu1 %v5788_v9 }
 0x23a   :  { %v1323_v18 = vadd.f32 %v5176_v15, %v6400_v13  ;;  %5217 = vmatprep.subr.bf16.mxu1 %v5789_v11  ;;  %v1544_v11 = vld [vmem:[%s7188_s0 + $0x38] sm:$0xff] }
 0x23b   :  { %v5178_v20 = vpop.f32.mrf.mxu0  ;;  %v4520_v15 = vcombine.high %v1543_v10, %v1544_v11 }
 0x23c   :  { %v1359_v23 = vmax.f32 %v1323_v18, 0.0  ;;  %v5179_v25 = vadd.f32 %v5178_v20, %v5177_v16  ;;  %v4519_v18 = vcombine.low %v1543_v10, %v1544_v11  ;;  %v1547_v20 = vld [vmem:[%s7188_s0 + $0x98] sm:$0xff] }
 0x23d   :  { %v5180_v26 = vpop.f32.mrf.mxu0  ;;  %5218 = vmatpush3.bf16.msra.mxu1 %v5790_v17  ;;  %v1545_v17 = vld [vmem:[%s7188_s0 + $0x58] sm:$0xff] }
 0x23e   :  { %v1370_v30 = vpack.c.bf16 %v1359_v23, %v1358_v21  ;;  %5219 = vmatprep.subr.bf16.mxu1 %v5791_v19  ;;  %v1328_v35 = vadd.f32 %v5179_v25, %v6400_v13  ;;  %v1548_v21 = vld [vmem:[%s7188_s0 + $0xb8] sm:$0xff] }
 0x23f   :  { %v5181_v33 = vpop.f32.mrf.mxu0  ;;  %v4524_v25 = vcombine.high %v1547_v20, %v1548_v21 }
 0x240   :  { %v5182_v36 = vadd.f32 %v5181_v33, %v5180_v26  ;;  %5667 = vmatprep.mubr.msk.bf16.mxu1 %vm760_vm0, %v1370_v30  ;;  %v1360_v46 = vmax.f32 %v1328_v35, 0.0  ;;  %v1549_v26 = vld [vmem:[%s7188_s0 + $0xd8] sm:$0xff]  ;;  %v4523_v30 = vcombine.low %v1547_v20, %v1548_v21 }
 0x241   :  { %v5183_v39 = vpop.f32.mrf.mxu0  ;;  %5220 = vmatpush3.bf16.msra.mxu1 %v5792_v49  ;;  %v1550_v49 = vld [vmem:[%s7188_s0 + $0xf8] sm:$0xff] }
 0x242   :  { %v1331_v42 = vadd.f32 %v5182_v36, %v6400_v13  ;;  %5221 = vmatprep.subr.bf16.mxu1 %v5793_v31  ;;  %v4526_v31 = vcombine.high %v1549_v26, %v1550_v49  ;;  %v5795_v33 = vld [vmem:[%s7190_s2 + $0x78] sm:$0xff]  }
 0x243   :  { %v5184_v44 = vpop.f32.mrf.mxu0  ;;  %5675 = vmatprep.subr.bf16.mxu0 %v5795_v33  ;;  %v1551_v35 = vld [vmem:[%s7188_s0 + $0x118] sm:$0xff] }
 0x244   :  { %v1361_v47 = vmax.f32 %v1331_v42, 0.0  ;;  %v5185_v50 = vadd.f32 %v5184_v44, %v5183_v39  ;;  %v1552_v36 = vld [vmem:[%s7188_s0 + $0x138] sm:$0xff]  ;;  %5676 = vmatpush3.bf16.msra.mxu0 %v5795_v33  ;;  %v4525_v39 = vcombine.low %v1549_v26, %v1550_v49  ;;  %v6635_v33 = vpop.permute.xlu0 %1769 }
 0x245   :  { %v5186_v53 = vpop.f32.mrf.mxu0  ;;  %5222 = vmatpush3.bf16.msra.mxu1 %v5794_v41  ;;  %v4528_v41 = vcombine.high %v1551_v35, %v1552_v36  ;;  %v1553_v42 = vld [vmem:[%s7188_s0 + $0x158] sm:$0xff] }
 0x246   :  { %v1371_v54 = vpack.c.bf16 %v1361_v47, %v1360_v46  ;;  %v1336_v60 = vadd.f32 %v5185_v50, %v6400_v13  ;;  %v1554_v44 = vld [vmem:[%s7188_s0 + $0x178] sm:$0xff]  ;;  %v4527_v46 = vcombine.low %v1551_v35, %v1552_v36  ;;  %v5796_v50 = vld [vmem:[%s7190_s2 + $0x70] sm:$0xff]  }
 0x247   :  { %v5187_v57 = vpop.f32.mrf.mxu0  ;;  %v4530_v47 = vcombine.high %v1553_v42, %v1554_v44  ;;  %5677 = vmatprep.subr.bf16.mxu0 %v5796_v50 }
 0x248   :  { %v5188_v61 = vadd.f32 %v5187_v57, %v5186_v53  ;;  %5668 = vmatmul.mubr.msk.bf16.gmra.mxu1 %vm760_vm0, %v1371_v54  ;;  %v1362_v1 = vmax.f32 %v1336_v60, 0.0  ;;  %v1555_v53 = vld [vmem:[%s7188_s0 + $0x198] sm:$0xff]  ;;  %5678 = vmatpush3.bf16.msra.mxu0 %v5796_v50  ;;  %v4529_v57 = vcombine.low %v1553_v42, %v1554_v44 }
 0x249   :  { %v5189_v62 = vpop.f32.mrf.mxu0  ;;  %v1556_v54 = vld [vmem:[%s7188_s0 + $0x1b8] sm:$0xff] }
 0x24a   :  { %v1339_v63 = vadd.f32 %v5188_v61, %v6400_v13  ;;  %v4532_v60 = vcombine.high %v1555_v53, %v1556_v54  ;;  %v1557_v61 = vld [vmem:[%s7188_s0 + $0x1d8] sm:$0xff] }
 0x24b   :  { %v5190_v0 = vpop.f32.mrf.mxu0 }
 0x24c   :  { %v1363_v2 = vmax.f32 %v1339_v63, 0.0  ;;  %v5191_v3 = vadd.f32 %v5190_v0, %v5189_v62  ;;  %v1558_v62 = vld [vmem:[%s7188_s0 + $0x1f8] sm:$0xff]  ;;  %v4531_v63 = vcombine.low %v1555_v53, %v1556_v54 }
 0x24d   :  { %v5192_v4 = vpop.f32.mrf.mxu0  ;;  %v4534_v0 = vcombine.high %v1557_v61, %v1558_v62 }
 0x24e   :  { %v1372_v5 = vpack.c.bf16 %v1363_v2, %v1362_v1  ;;  %v1344_v7 = vadd.f32 %v5191_v3, %v6400_v13  ;;  %v5797_v1 = vld [vmem:[%s7190_s2 + $0x68] sm:$0xff]   ;;  %v4533_v2 = vcombine.low %v1557_v61, %v1558_v62  ;;  %v5798_v3 = vld [vmem:[%s7190_s2 + $0x60] sm:$0xff]  }
 0x24f   :  { %v5193_v6 = vpop.f32.mrf.mxu0  ;;  %5679 = vmatprep.subr.bf16.mxu0 %v5797_v1 }
 0x250   :  { %v5194_v8 = vadd.f32 %v5193_v6, %v5192_v4  ;;  %5671 = vmatprep.mubr.msk.bf16.mxu1 %vm760_vm0, %v1372_v5  ;;  %v1364_v12 = vmax.f32 %v1344_v7, 0.0  ;;  %5680 = vmatpush3.bf16.msra.mxu0 %v5797_v1  ;;  %v6586_v4 = vpop.f32.mrf.mxu1  ;;  %v5799_v6 = vld [vmem:[%s7191_s3 + $0x78] sm:$0xff]  }
 0x251   :  { %5681 = vmatprep.subr.bf16.mxu0 %v5798_v3 }
 0x252   :  { %v1347_v9 = vadd.f32 %v5194_v8, %v6400_v13  ;;  %v1546_v13 = vld [vmem:[%s7188_s0 + $0x78] sm:$0xff] }
 0x253   :  { %v4522_v19 = vcombine.high %v1545_v17, %v1546_v13  ;;  %v4521_v23 = vcombine.low %v1545_v17, %v1546_v13 }
 0x254   :  { %v1365_v14 = vmax.f32 %v1347_v9, 0.0  ;;  %5682 = vmatpush3.bf16.msra.mxu0 %v5798_v3  ;;  %v5800_v3 = vld [vmem:[%s7191_s3 + $0x38] sm:$0xff]  }
 0x255   :  { %5283 = vmatprep.subr.bf16.mxu0 %v5799_v6  ;;  %v5801_v6 = vld [vmem:[%s7191_s3 + $0x70] sm:$0xff]  }
 0x256   :  { %v1373_v16 = vpack.c.bf16 %v1365_v14, %v1364_v12 }
 0x258   :  { %5672 = vmatmul.mubr.msk.bf16.gmra.mxu1 %vm760_vm0, %v1373_v16 }
 0x259   :  { %1804 = vmatprep.mubr.bf16.mxu1 %v4520_v15 }
 0x260   :  { %1805 = vmatmul.mubr.bf16.vlgmr.msra.gmra.mxu1 %v4519_v18 }
 0x261   :  { %1812 = vmatprep.mubr.bf16.mxu1 %v4522_v19 }
 0x268   :  { %1813 = vmatmul.mubr.bf16.gmra.mxu1 %v4521_v23 }
 0x269   :  { %1820 = vmatprep.mubr.bf16.mxu1 %v4524_v25 }
 0x270   :  { %1821 = vmatmul.mubr.bf16.gmra.mxu1 %v4523_v30 }
 0x271   :  { %1828 = vmatprep.mubr.bf16.mxu1 %v4526_v31 }
 0x278   :  { %1829 = vmatmul.mubr.bf16.gmra.mxu1 %v4525_v39 }
 0x279   :  { %1836 = vmatprep.mubr.bf16.mxu1 %v4528_v41 }
 0x280   :  { %1837 = vmatmul.mubr.bf16.gmra.mxu1 %v4527_v46 }
 0x281   :  { %1844 = vmatprep.mubr.bf16.mxu1 %v4530_v47 }
 0x288   :  { %1845 = vmatmul.mubr.bf16.gmra.mxu1 %v4529_v57 }
 0x289   :  { %1852 = vmatprep.mubr.bf16.mxu1 %v4532_v60 }
 0x290   :  { %1853 = vmatmul.mubr.bf16.gmra.mxu1 %v4531_v63 }
 0x291   :  { %1860 = vmatprep.mubr.bf16.mxu1 %v4534_v0 }
 0x298   :  { %1861 = vmatmul.mubr.bf16.gmra.mxu1 %v4533_v2 }
 0x2e8   :  { %v5661_v5 = vpop.f32.mrf.mxu1 }
 0x2e9   :  { %v6592_v7 = vadd.f32 %v5661_v5, %v6419_v22 }
 0x2ea   :  { %v1464_v8 = vpop.f32.mrf.mxu1 }
 0x2eb   :  { %v6595_v9 = vadd.f32 %v1464_v8, %v6421_v24 }
 0x2ec   :  { %v5662_v10 = vpop.f32.mrf.mxu1 }
 0x2ed   :  { %v6598_v11 = vadd.f32 %v5662_v10, %v6423_v27 }
 0x2ee   :  { %v6600_v12 = vpop.f32.mrf.mxu1 }
 0x2f8   :  { %v5665_v14 = vpop.f32.mrf.mxu1 }
 0x2f9   :  { %v6603_v15 = vadd.f32 %v5665_v14, %v6429_v32 }
 0x2fa   :  { %v1480_v16 = vpop.f32.mrf.mxu1 }
 0x2fb   :  { %v6606_v17 = vadd.f32 %v1480_v16, %v6431_v34 }
 0x2fc   :  { %v5666_v22 = vpop.f32.mrf.mxu1 }
 0x2fd   :  { %v6609_v13 = vadd.f32 %v5666_v22, %v6433_v37  ;;  %v5802_v22 = vld [vmem:[%s7191_s3 + $0x30] sm:$0xff]  }
 0x2fe   :  { %v6611_v24 = vpop.f32.mrf.mxu1 }
 0x308   :  { %v5669_v18 = vpop.f32.mrf.mxu1 }
 0x309   :  { %v6614_v27 = vadd.f32 %v5669_v18, %v6439_v43 }
 0x30a   :  { %v1496_v19 = vpop.f32.mrf.mxu1 }
 0x30b   :  { %v6617_v20 = vadd.f32 %v1496_v19, %v6441_v45 }
 0x30c   :  { %v5670_v32 = vpop.f32.mrf.mxu1 }
 0x30d   :  { %v6620_v21 = vadd.f32 %v5670_v32, %v6443_v52 }
 0x30e   :  { %v6622_v34 = vpop.f32.mrf.mxu1 }
 0x318   :  { %v5673_v23 = vpop.f32.mrf.mxu1 }
 0x319   :  { %v6625_v37 = vadd.f32 %v5673_v23, %v6449_v56 }
 0x31a   :  { %v1512_v25 = vpop.f32.mrf.mxu1 }
 0x31b   :  { %v6628_v26 = vadd.f32 %v1512_v25, %v6451_v58 }
 0x31c   :  { %v5674_v43 = vpop.f32.mrf.mxu1 }
 0x31d   :  { %v6631_v49 = vadd.f32 %v5674_v43, %v6453_v55 }
 0x31e   :  { %v6633_v45 = vpop.f32.mrf.mxu1 }
 0x320   :  { %v5223_v30 = vpop.f32.mrf.mxu1 }
 0x322   :  { %v5224_v31 = vpop.f32.mrf.mxu1 }
 0x323   :  { %v5225_v52 = vadd.f32 %v5224_v31, %v5223_v30 }
 0x324   :  { %v5226_v35 = vpop.f32.mrf.mxu1 }
 0x325   :  { %v1807_v56 = vadd.f32 %v5225_v52, %v6635_v33 }
 0x326   :  { %v5227_v36 = vpop.f32.mrf.mxu1 }
 0x327   :  { %v5228_v39 = vadd.f32 %v5227_v36, %v5226_v35  ;;  %v1869_v44 = vmax.f32 %v1807_v56, 0.0 }
 0x328   :  { %v5229_v41 = vpop.f32.mrf.mxu1 }
 0x329   :  { %v1810_v58 = vadd.f32 %v5228_v39, %v6635_v33 }
 0x32a   :  { %v5230_v42 = vpop.f32.mrf.mxu1 }
 0x32b   :  { %v1870_v46 = vmax.f32 %v1810_v58, 0.0  ;;  %v5231_v55 = vadd.f32 %v5230_v42, %v5229_v41 }
 0x32c   :  { %v5232_v47 = vpop.f32.mrf.mxu1 }
 0x32d   :  { %v1885_v50 = vpack.c.bf16 %v1870_v46, %v1869_v44  ;;  %v1815_v54 = vadd.f32 %v5231_v55, %v6635_v33 }
 0x32e   :  { %v5233_v53 = vpop.f32.mrf.mxu1 }
 0x32f   :  { %v5234_v57 = vadd.f32 %v5233_v53, %v5232_v47  ;;  %5683 = vmatprep.mubr.msk.bf16.mxu0 %vm760_vm0, %v1885_v50  ;;  %v1871_v63 = vmax.f32 %v1815_v54, 0.0 }
 0x330   :  { %v5235_v60 = vpop.f32.mrf.mxu1 }
 0x331   :  { %v1818_v61 = vadd.f32 %v5234_v57, %v6635_v33 }
 0x332   :  { %v5236_v62 = vpop.f32.mrf.mxu1 }
 0x333   :  { %v1872_v0 = vmax.f32 %v1818_v61, 0.0  ;;  %v5237_v1 = vadd.f32 %v5236_v62, %v5235_v60 }
 0x334   :  { %v5238_v2 = vpop.f32.mrf.mxu1 }
 0x335   :  { %v1886_v5 = vpack.c.bf16 %v1872_v0, %v1871_v63  ;;  %v1823_v10 = vadd.f32 %v5237_v1, %v6635_v33 }
 0x336   :  { %v5239_v8 = vpop.f32.mrf.mxu1 }
 0x337   :  { %v5240_v14 = vadd.f32 %v5239_v8, %v5238_v2  ;;  %5684 = vmatmul.mubr.msk.bf16.vlgmr.msra.gmra.mxu0 %vm760_vm0, %v1886_v5  ;;  %v1873_v32 = vmax.f32 %v1823_v10, 0.0 }
 0x338   :  { %v5241_v16 = vpop.f32.mrf.mxu1  ;;  %5284 = vmatpush3.bf16.msra.mxu0 %v5800_v3 }
 0x339   :  { %v1826_v18 = vadd.f32 %v5240_v14, %v6635_v33  ;;  %5285 = vmatprep.subr.bf16.mxu0 %v5801_v6 }
 0x33a   :  { %v5242_v19 = vpop.f32.mrf.mxu1 }
 0x33b   :  { %v1874_v23 = vmax.f32 %v1826_v18, 0.0  ;;  %v5243_v25 = vadd.f32 %v5242_v19, %v5241_v16 }
 0x33c   :  { %v5244_v43 = vpop.f32.mrf.mxu1  ;;  %5286 = vmatpush3.bf16.msra.mxu0 %v5802_v22 }
 0x33d   :  { %v1887_v30 = vpack.c.bf16 %v1874_v23, %v1873_v32  ;;  %v1831_v52 = vadd.f32 %v5243_v25, %v6635_v33 }
 0x33e   :  { %v5245_v31 = vpop.f32.mrf.mxu1 }
 0x33f   :  { %v5246_v35 = vadd.f32 %v5245_v31, %v5244_v43  ;;  %5687 = vmatprep.mubr.msk.bf16.mxu0 %vm760_vm0, %v1887_v30  ;;  %v1875_v41 = vmax.f32 %v1831_v52, 0.0 }
 0x340   :  { %v5247_v36 = vpop.f32.mrf.mxu1 }
 0x341   :  { %v1834_v56 = vadd.f32 %v5246_v35, %v6635_v33 }
 0x342   :  { %v5248_v39 = vpop.f32.mrf.mxu1 }
 0x343   :  { %v1876_v58 = vmax.f32 %v1834_v56, 0.0  ;;  %v5249_v42 = vadd.f32 %v5248_v39, %v5247_v36 }
 0x344   :  { %v5250_v44 = vpop.f32.mrf.mxu1 }
 0x345   :  { %v1888_v46 = vpack.c.bf16 %v1876_v58, %v1875_v41  ;;  %v1839_v47 = vadd.f32 %v5249_v42, %v6635_v33 }
 0x346   :  { %v5251_v55 = vpop.f32.mrf.mxu1 }
 0x347   :  { %v5252_v50 = vadd.f32 %v5251_v55, %v5250_v44  ;;  %5688 = vmatmul.mubr.msk.bf16.gmra.mxu0 %vm760_vm0, %v1888_v46  ;;  %v1877_v60 = vmax.f32 %v1839_v47, 0.0  ;;  %v5803_v47 = vld [vmem:[%s7191_s3 + $0x68] sm:$0xff]  }
 0x348   :  { %v5253_v53 = vpop.f32.mrf.mxu1  ;;  %5287 = vmatprep.subr.bf16.mxu0 %v5803_v47 }
 0x349   :  { %v1842_v54 = vadd.f32 %v5252_v50, %v6635_v33  ;;  %v5804_v50 = vld [vmem:[%s7191_s3 + $0x28] sm:$0xff]  }
 0x34a   :  { %v5254_v57 = vpop.f32.mrf.mxu1  ;;  %5288 = vmatpush3.bf16.msra.mxu0 %v5804_v50 }
 0x34b   :  { %v1878_v61 = vmax.f32 %v1842_v54, 0.0  ;;  %v5255_v62 = vadd.f32 %v5254_v57, %v5253_v53  ;;  %v5805_v53 = vld [vmem:[%s7191_s3 + $0x60] sm:$0xff]   ;;  %v5807_v54 = vld [vmem:[%s7191_s3 + $0x58] sm:$0xff]  }
 0x34c   :  { %v5256_v63 = vpop.f32.mrf.mxu1  ;;  %5289 = vmatprep.subr.bf16.mxu0 %v5805_v53  ;;  %v5808_v57 = vld [vmem:[%s7191_s3 + $0x18] sm:$0xff]  }
 0x34d   :  { %v1889_v0 = vpack.c.bf16 %v1878_v61, %v1877_v60  ;;  %v1847_v2 = vadd.f32 %v5255_v62, %v6635_v33  ;;  %v5990_v60 = vmov 0   ;;  %v5809_v61 = vld [vmem:[%s7191_s3 + $0x50] sm:$0xff]  }
 0x34e   :  { %v5257_v1 = vpop.f32.mrf.mxu1  ;;  %2159 = vst [vmem:[#allocation2 + $0x4] sm:$0xf] %v5990_v60  ;;  %2160 = vst [vmem:[#allocation2 + $0xc] sm:$0xf] %v5990_v60  ;;  %v5810_v62 = vld [vmem:[%s7191_s3 + $0x10] sm:$0xff]  }
 0x34f   :  { %v5258_v3 = vadd.f32 %v5257_v1, %v5256_v63  ;;  %5691 = vmatprep.mubr.msk.bf16.mxu0 %vm760_vm0, %v1889_v0  ;;  %v1879_v10 = vmax.f32 %v1847_v2, 0.0  ;;  %2161 = vst [vmem:[#allocation2 + $0x14] sm:$0xf] %v5990_v60  ;;  %2162 = vst [vmem:[#allocation2 + $0x1c] sm:$0xf] %v5990_v60  ;;  %v5811_v63 = vld [vmem:[%s7191_s3 + $0x48] sm:$0xff]  }
 0x350   :  { %v5259_v5 = vpop.f32.mrf.mxu1  ;;  %2163 = vst [vmem:[#allocation2 + $0x24] sm:$0xf] %v5990_v60  ;;  %2164 = vst [vmem:[#allocation2 + $0x2c] sm:$0xf] %v5990_v60  ;;  %v5812_v0 = vld [vmem:[%s7191_s3 + $0x8] sm:$0xff]   ;;  %v5813_v1 = vld [vmem:[%s7191_s3 + $0x40] sm:$0xff]  }
 0x351   :  { %v1850_v6 = vadd.f32 %v5258_v3, %v6635_v33  ;;  %2165 = vst [vmem:[#allocation2 + $0x34] sm:$0xf] %v5990_v60  ;;  %2166 = vst [vmem:[#allocation2 + $0x3c] sm:$0xf] %v5990_v60  ;;  %v5814_v2 = vld [vmem:[%s7191_s3] sm:$0xff]   ;;  %v5839_v3 = vld [vmem:[%s7191_s3 + $0xf8] sm:$0xff]  }
 0x352   :  { %v5260_v8 = vpop.f32.mrf.mxu1  ;;  %2167 = vst [vmem:[#allocation2 + $0x44] sm:$0xf] %v5990_v60  ;;  %2168 = vst [vmem:[#allocation2 + $0x4c] sm:$0xf] %v5990_v60  ;;  %5347 = vmatprep.subr.bf16.mxu1 %v5839_v3 }
 0x353   :  { %v1880_v14 = vmax.f32 %v1850_v6, 0.0  ;;  %v5261_v16 = vadd.f32 %v5260_v8, %v5259_v5  ;;  %2169 = vst [vmem:[#allocation2 + $0x54] sm:$0xf] %v5990_v60  ;;  %2170 = vst [vmem:[#allocation2 + $0x5c] sm:$0xf] %v5990_v60  ;;  %v5840_v5 = vld [vmem:[%s7191_s3 + $0xb8] sm:$0xff]  }
 0x354   :  { %v5262_v22 = vpop.f32.mrf.mxu1  ;;  %2171 = vst [vmem:[#allocation2 + $0x64] sm:$0xf] %v5990_v60  ;;  %2172 = vst [vmem:[#allocation2 + $0x6c] sm:$0xf] %v5990_v60  ;;  %v5841_v6 = vld [vmem:[%s7191_s3 + $0xf0] sm:$0xff]   ;;  %5348 = vmatpush3.bf16.msra.mxu1 %v5840_v5 }
 0x355   :  { %v1890_v18 = vpack.c.bf16 %v1880_v14, %v1879_v10  ;;  %v1855_v32 = vadd.f32 %v5261_v16, %v6635_v33  ;;  %2173 = vst [vmem:[#allocation2 + $0x74] sm:$0xf] %v5990_v60  ;;  %2174 = vst [vmem:[#allocation2 + $0x7c] sm:$0xf] %v5990_v60  ;;  %v5842_v8 = vld [vmem:[%s7191_s3 + $0xb0] sm:$0xff]   ;;  %5349 = vmatprep.subr.bf16.mxu1 %v5841_v6  ;;  %v5843_v10 = vld [vmem:[%s7191_s3 + $0xe8] sm:$0xff]   ;;  %v1000_v6 = vadd.f32 %v6445_v48, %v6447_v51 }
 0x356   :  { %v5263_v19 = vpop.f32.mrf.mxu1  ;;  %v5844_v14 = vld [vmem:[%s7191_s3 + $0xa8] sm:$0xff]   ;;  %v5845_v16 = vld [vmem:[%s7191_s3 + $0xe0] sm:$0xff]  }
 0x357   :  { %v5264_v23 = vadd.f32 %v5263_v19, %v5262_v22  ;;  %5692 = vmatmul.mubr.msk.bf16.gmra.mxu0 %vm760_vm0, %v1890_v18  ;;  %v1881_v31 = vmax.f32 %v1855_v32, 0.0  ;;  %v5846_v22 = vld [vmem:[%s7191_s3 + $0xa0] sm:$0xff]   ;;  %v5847_v18 = vld [vmem:[%s7191_s3 + $0xd8] sm:$0xff]  }
 0x358   :  { %v5265_v25 = vpop.f32.mrf.mxu1  ;;  %5350 = vmatpush3.bf16.msra.mxu1 %v5842_v8  ;;  %v5848_v19 = vld [vmem:[%s7191_s3 + $0x98] sm:$0xff]  }
 0x359   :  { %v1858_v43 = vadd.f32 %v5264_v23, %v6635_v33  ;;  %5351 = vmatprep.subr.bf16.mxu1 %v5843_v10  ;;  %v6739_v23 = vld [vmem:[%s7189_s5 + $0x1] ss:$0 sm:$0xff] }
 0x35a   :  { %v5266_v30 = vpop.f32.mrf.mxu1 }
 0x35b   :  { %v1882_v52 = vmax.f32 %v1858_v43, 0.0  ;;  %v5267_v35 = vadd.f32 %v5266_v30, %v5265_v25  ;;  %v968_v30 = vadd.f32 %v6425_v28, %v6427_v29 }
 0x35c   :  { %v5268_v36 = vpop.f32.mrf.mxu1  ;;  %5352 = vmatpush3.bf16.msra.mxu1 %v5844_v14 }
 0x35d   :  { %v1891_v56 = vpack.c.bf16 %v1882_v52, %v1881_v31  ;;  %v1863_v41 = vadd.f32 %v5267_v35, %v6635_v33  ;;  %5353 = vmatprep.subr.bf16.mxu1 %v5845_v16  ;;  %v5821_v16 = vld [vmem:[#allocation2 + $0x24] ss:$8 sps:$4 sm:$0xff]  }
 0x35e   :  { %v5269_v39 = vpop.f32.mrf.mxu1 }
 0x35f   :  { %v5270_v58 = vadd.f32 %v5269_v39, %v5268_v36  ;;  %5695 = vmatprep.mubr.msk.bf16.mxu0 %vm760_vm0, %v1891_v56  ;;  %v1883_v44 = vmax.f32 %v1863_v41, 0.0  ;;  %v1528_v36 = vadd.f32 %v6600_v12, %v968_v30 }
 0x360   :  { %5354 = vmatpush3.bf16.msra.mxu1 %v5846_v22 }
 0x361   :  { %v1866_v42 = vadd.f32 %v5270_v58, %v6635_v33  ;;  %v5806_v33 = vld [vmem:[%s7191_s3 + $0x20] sm:$0xff]   ;;  %5355 = vmatprep.subr.bf16.mxu1 %v5847_v18  ;;  %v1536_v18 = vadd.f32 %v6622_v34, %v1000_v6 }
 0x362   :  { %5290 = vmatpush3.bf16.msra.mxu0 %v5806_v33  ;;  %v5815_v33 = vld [vmem:[#allocation2 + $0x4] ss:$8 sps:$4 sm:$0xff]  }
 0x363   :  { %v1884_v46 = vmax.f32 %v1866_v42, 0.0  ;;  %5291 = vmatprep.subr.bf16.mxu0 %v5807_v54 }
 0x364   :  { %5356 = vmatpush3.bf16.msra.mxu1 %v5848_v19 }
 0x365   :  { %v1892_v55 = vpack.c.bf16 %v1884_v46, %v1883_v44 }
 0x366   :  { %5292 = vmatpush3.bf16.msra.mxu0 %v5808_v57 }
 0x367   :  { %5696 = vmatmul.mubr.msk.bf16.gmra.mxu0 %vm760_vm0, %v1892_v55  ;;  %5293 = vmatprep.subr.bf16.mxu0 %v5809_v61 }
 0x368   :  { %2431 = vmatprep.mubr.bf16.mxu0 %v5815_v33  ;;  %v5849_v33 = vld [vmem:[%s7191_s3 + $0xd0] sm:$0xff]  }
 0x369   :  { %5357 = vmatprep.subr.bf16.mxu1 %v5849_v33 }
 0x36a   :  { %5294 = vmatpush3.bf16.msra.mxu0 %v5810_v62 }
 0x36b   :  { %5295 = vmatprep.subr.bf16.mxu0 %v5811_v63 }
 0x36e   :  { %5296 = vmatpush3.bf16.msra.mxu0 %v5812_v0 }
 0x36f   :  { %5297 = vmatprep.subr.bf16.mxu0 %v5813_v1 }
 0x372   :  { %5298 = vmatpush3.bf16.msra.mxu0 %v5814_v2 }
 0x3f7   :  { %v5685_v32 = vpop.f32.mrf.mxu0 }
 0x3f8   :  { %v2048_v25 = vadd.f32 %v5685_v32, %v6592_v7 }
 0x3f9   :  { %v1983_v43 = vpop.f32.mrf.mxu0 }
 0x3fa   :  { %v2065_v31 = vadd.f32 %v6739_v23, %v2048_v25  ;;  %v2046_v52 = vadd.f32 %v1983_v43, %v6595_v9 }
 0x3fb   :  { %v5686_v35 = vpop.f32.mrf.mxu0 }
 0x3fc   :  { %v4901_v56 = vpack.c.bf16 %v2065_v31, %v2065_v31  ;;  %v2063_v39 = vadd.f32 %v6739_v23, %v2046_v52  ;;  %v2049_v41 = vadd.f32 %v5686_v35, %v6598_v11  ;;  %v984_v11 = vadd.f32 %v6435_v38, %v6437_v40 }
 0x3fd   :  { %v1986_v58 = vpop.f32.mrf.mxu0 }
 0x3fe   :  { %2145 = vst [vmem:[#allocation2 + $0x10] sm:$0xf] %v4901_v56  ;;  %v4899_v42 = vpack.c.bf16 %v2063_v39, %v2063_v39  ;;  %v2066_v7 = vadd.f32 %v6739_v23, %v2049_v41  ;;  %v2047_v44 = vadd.f32 %v1986_v58, %v1528_v36  ;;  %v1532_v57 = vadd.f32 %v6611_v24, %v984_v11 }
 0x3ff   :  { %v1016_v56 = vadd.f32 %v6586_v4, %v6455_v59 }
 0x400   :  { %2143 = vst [vmem:[#allocation2] sm:$0xf] %v4899_v42  ;;  %v4902_v28 = vpack.c.bf16 %v2066_v7, %v2066_v7  ;;  %v2064_v29 = vadd.f32 %v6739_v23, %v2047_v44  ;;  %v5827_v42 = vld [vmem:[#allocation2 + $0x44] ss:$8 sps:$4 sm:$0xff]  }
 0x401   :  { %v1540_v44 = vadd.f32 %v6633_v45, %v1016_v56 }
 0x402   :  { %2146 = vst [vmem:[#allocation2 + $0x18] sm:$0xf] %v4902_v28  ;;  %v4900_v9 = vpack.c.bf16 %v2064_v29, %v2064_v29 }
 0x404   :  { %2144 = vst [vmem:[#allocation2 + $0x8] sm:$0xf] %v4900_v9 }
 0x407   :  { %v5689_v46 = vpop.f32.mrf.mxu0 }
 0x408   :  { %v2052_v12 = vadd.f32 %v5689_v46, %v6603_v15  ;;  %v5818_v15 = vld [vmem:[#allocation2 + $0x14] ss:$8 sps:$4 sm:$0xff]  }
 0x409   :  { %v1999_v55 = vpop.f32.mrf.mxu0  ;;  %v5820_v2 = vld [vmem:[#allocation2 + $0x10] ss:$8 sps:$4 sm:$0xff]  }
 0x40a   :  { %v2069_v47 = vadd.f32 %v6739_v23, %v2052_v12  ;;  %v2050_v50 = vadd.f32 %v1999_v55, %v6606_v17 }
 0x40b   :  { %v5690_v53 = vpop.f32.mrf.mxu0  ;;  %v5817_v54 = vld [vmem:[#allocation2] ss:$8 sps:$4 sm:$0xff]  }
 0x40c   :  { %v4905_v60 = vpack.c.bf16 %v2069_v47, %v2069_v47  ;;  %v2067_v61 = vadd.f32 %v6739_v23, %v2050_v50  ;;  %v2053_v62 = vadd.f32 %v5690_v53, %v6609_v13  ;;  %2432 = vmatmul.mubr.bf16.vlgmr.msra.gmra.mxu0 %v5817_v54  ;;  %v5836_v50 = vld [vmem:[#allocation2 + $0x74] ss:$8 sps:$4 sm:$0xff]   ;;  %v5851_v54 = vld [vmem:[%s7191_s3 + $0xc8] sm:$0xff]  }
 0x40d   :  { %v2002_v63 = vpop.f32.mrf.mxu0  ;;  %2439 = vmatprep.mubr.bf16.mxu0 %v5818_v15 }
 0x40e   :  { %2149 = vst [vmem:[#allocation2 + $0x30] sm:$0xf] %v4905_v60  ;;  %v4903_v0 = vpack.c.bf16 %v2067_v61, %v2067_v61  ;;  %v2070_v38 = vadd.f32 %v6739_v23, %v2053_v62  ;;  %v2051_v40 = vadd.f32 %v2002_v63, %v1532_v57  ;;  %v5852_v57 = vld [vmem:[%s7191_s3 + $0x88] sm:$0xff]   ;;  %v5853_v60 = vld [vmem:[%s7191_s3 + $0xc0] sm:$0xff]  }
 0x40f   :  { %v5854_v61 = vld [vmem:[%s7191_s3 + $0x80] sm:$0xff]  }
 0x410   :  { %2147 = vst [vmem:[#allocation2 + $0x20] sm:$0xf] %v4903_v0  ;;  %v4906_v17 = vpack.c.bf16 %v2070_v38, %v2070_v38  ;;  %v2068_v1 = vadd.f32 %v6739_v23, %v2051_v40 }
 0x412   :  { %2150 = vst [vmem:[#allocation2 + $0x38] sm:$0xf] %v4906_v17  ;;  %v4904_v24 = vpack.c.bf16 %v2068_v1, %v2068_v1 }
 0x414   :  { %2148 = vst [vmem:[#allocation2 + $0x28] sm:$0xf] %v4904_v24  ;;  %2440 = vmatmul.mubr.bf16.gmra.mxu0 %v5820_v2 }
 0x415   :  { %2447 = vmatprep.mubr.bf16.mxu0 %v5821_v16 }
 0x417   :  { %v5693_v13 = vpop.f32.mrf.mxu0 }
 0x418   :  { %v2056_v3 = vadd.f32 %v5693_v13, %v6614_v27  ;;  %v5824_v27 = vld [vmem:[#allocation2 + $0x34] ss:$8 sps:$4 sm:$0xff]  }
 0x419   :  { %v2015_v5 = vpop.f32.mrf.mxu0  ;;  %v5826_v52 = vld [vmem:[#allocation2 + $0x30] ss:$8 sps:$4 sm:$0xff]  }
 0x41a   :  { %v2073_v8 = vadd.f32 %v6739_v23, %v2056_v3  ;;  %v2054_v10 = vadd.f32 %v2015_v5, %v6617_v20 }
 0x41b   :  { %v5694_v14 = vpop.f32.mrf.mxu0  ;;  %v5823_v22 = vld [vmem:[#allocation2 + $0x20] ss:$8 sps:$4 sm:$0xff]  }
 0x41c   :  { %v4909_v19 = vpack.c.bf16 %v2073_v8, %v2073_v8  ;;  %v2071_v32 = vadd.f32 %v6739_v23, %v2054_v10  ;;  %v2057_v25 = vadd.f32 %v5694_v14, %v6620_v21  ;;  %2448 = vmatmul.mubr.bf16.gmra.mxu0 %v5823_v22 }
 0x41d   :  { %v2018_v43 = vpop.f32.mrf.mxu0  ;;  %2455 = vmatprep.mubr.bf16.mxu0 %v5824_v27  ;;  %v5855_v27 = vld [vmem:[#allocation2] ss:$8 sps:$4 sm:$0xff]  }
 0x41e   :  { %2153 = vst [vmem:[#allocation2 + $0x50] sm:$0xf] %v4909_v19  ;;  %v4907_v30 = vpack.c.bf16 %v2071_v32, %v2071_v32  ;;  %v2074_v48 = vadd.f32 %v6739_v23, %v2057_v25  ;;  %v2055_v51 = vadd.f32 %v2018_v43, %v1536_v18 }
 0x420   :  { %2151 = vst [vmem:[#allocation2 + $0x40] sm:$0xf] %v4907_v30  ;;  %v4910_v20 = vpack.c.bf16 %v2074_v48, %v2074_v48  ;;  %v2072_v31 = vadd.f32 %v6739_v23, %v2055_v51 }
 0x422   :  { %2154 = vst [vmem:[#allocation2 + $0x58] sm:$0xf] %v4910_v20  ;;  %v4908_v34 = vpack.c.bf16 %v2072_v31, %v2072_v31 }
 0x424   :  { %2152 = vst [vmem:[#allocation2 + $0x48] sm:$0xf] %v4908_v34  ;;  %2456 = vmatmul.mubr.bf16.gmra.mxu0 %v5826_v52 }
 0x425   :  { %2463 = vmatprep.mubr.bf16.mxu0 %v5827_v42 }
 0x427   :  { %v5697_v21 = vpop.f32.mrf.mxu0 }
 0x428   :  { %v2060_v35 = vadd.f32 %v5697_v21, %v6625_v37  ;;  %v5830_v37 = vld [vmem:[#allocation2 + $0x54] ss:$8 sps:$4 sm:$0xff]  }
 0x429   :  { %v2031_v36 = vpop.f32.mrf.mxu0  ;;  %v5832_v11 = vld [vmem:[#allocation2 + $0x50] ss:$8 sps:$4 sm:$0xff]  }
 0x42a   :  { %v2077_v39 = vadd.f32 %v6739_v23, %v2060_v35  ;;  %v2058_v41 = vadd.f32 %v2031_v36, %v6628_v26 }
 0x42b   :  { %v5698_v58 = vpop.f32.mrf.mxu0  ;;  %v5829_v7 = vld [vmem:[#allocation2 + $0x40] ss:$8 sps:$4 sm:$0xff]  }
 0x42c   :  { %v4913_v28 = vpack.c.bf16 %v2077_v39, %v2077_v39  ;;  %v2075_v29 = vadd.f32 %v6739_v23, %v2058_v41  ;;  %v2061_v9 = vadd.f32 %v5698_v58, %v6631_v49  ;;  %2464 = vmatmul.mubr.bf16.gmra.mxu0 %v5829_v7  ;;  %v5833_v49 = vld [vmem:[#allocation2 + $0x64] ss:$8 sps:$4 sm:$0xff]   ;;  %v5860_v41 = vld [vmem:[#allocation2 + $0x10] ss:$8 sps:$4 sm:$0xff]  }
 0x42d   :  { %v2034_v46 = vpop.f32.mrf.mxu0  ;;  %2471 = vmatprep.mubr.bf16.mxu0 %v5830_v37 }
 0x42e   :  { %2157 = vst [vmem:[#allocation2 + $0x70] sm:$0xf] %v4913_v28  ;;  %v4911_v12 = vpack.c.bf16 %v2075_v29, %v2075_v29  ;;  %v2078_v59 = vadd.f32 %v6739_v23, %v2061_v9  ;;  %v2059_v4 = vadd.f32 %v2034_v46, %v1540_v44 }
 0x430   :  { %2155 = vst [vmem:[#allocation2 + $0x60] sm:$0xf] %v4911_v12  ;;  %v4914_v26 = vpack.c.bf16 %v2078_v59, %v2078_v59  ;;  %v2076_v55 = vadd.f32 %v6739_v23, %v2059_v4  ;;  %v5850_v23 = vld [vmem:[%s7191_s3 + $0x90] sm:$0xff]   ;;  %v5863_v4 = vld [vmem:[#allocation2 + $0x20] ss:$8 sps:$4 sm:$0xff]  }
 0x431   :  { %5358 = vmatpush3.bf16.msra.mxu1 %v5850_v23 }
 0x432   :  { %2158 = vst [vmem:[#allocation2 + $0x78] sm:$0xf] %v4914_v26  ;;  %v4912_v45 = vpack.c.bf16 %v2076_v55, %v2076_v55  ;;  %5359 = vmatprep.subr.bf16.mxu1 %v5851_v54 }
 0x434   :  { %2156 = vst [vmem:[#allocation2 + $0x68] sm:$0xf] %v4912_v45  ;;  %2472 = vmatmul.mubr.bf16.gmra.mxu0 %v5832_v11 }
 0x435   :  { %2479 = vmatprep.mubr.bf16.mxu0 %v5833_v49  ;;  %5360 = vmatpush3.bf16.msra.mxu1 %v5852_v57  ;;  %v5866_v57 = vld [vmem:[#allocation2 + $0x30] ss:$8 sps:$4 sm:$0xff]  }
 0x436   :  { %5361 = vmatprep.subr.bf16.mxu1 %v5853_v60 }
 0x439   :  { %v5838_v53 = vld [vmem:[#allocation2 + $0x70] ss:$8 sps:$4 sm:$0xff]   ;;  %5362 = vmatpush3.bf16.msra.mxu1 %v5854_v61 }
 0x43b   :  { %v5835_v47 = vld [vmem:[#allocation2 + $0x60] ss:$8 sps:$4 sm:$0xff]  }
 0x43c   :  { %2480 = vmatmul.mubr.bf16.gmra.mxu0 %v5835_v47 }
 0x43d   :  { %2487 = vmatprep.mubr.bf16.mxu0 %v5836_v50 }
 0x444   :  { %2488 = vmatmul.mubr.bf16.gmra.mxu0 %v5838_v53 }
 0x4cc   :  { %v5299_v62 = vpop.f32.mrf.mxu0 }
 0x4ce   :  { %v5300_v63 = vpop.f32.mrf.mxu0 }
 0x4cf   :  { %v5301_v15 = vadd.f32 %v5300_v63, %v5299_v62 }
 0x4d0   :  { %v5302_v0 = vpop.f32.mrf.mxu0 }
 0x4d1   :  { %v2496_v38 = vmax.f32 %v5301_v15, 0.0 }
 0x4d2   :  { %v5303_v40 = vpop.f32.mrf.mxu0 }
 0x4d3   :  { %v4915_v17 = vpack.c.bf16 %v2496_v38, %v2496_v38  ;;  %v5304_v1 = vadd.f32 %v5303_v40, %v5302_v0 }
 0x4d4   :  { %v5305_v24 = vpop.f32.mrf.mxu0 }
 0x4d5   :  { %2577 = vst.msk [vmem:[#allocation2 + $0x4] sm:$0xf] %vm2576_vm1, %v4915_v17  ;;  %v2497_v2 = vmax.f32 %v5304_v1, 0.0 }
 0x4d6   :  { %v5306_v13 = vpop.f32.mrf.mxu0 }
 0x4d7   :  { %v4916_v3 = vpack.c.bf16 %v2497_v2, %v2497_v2  ;;  %v5307_v5 = vadd.f32 %v5306_v13, %v5305_v24  ;;  %v5869_v2 = vld [vmem:[#allocation2 + $0x40] ss:$8 sps:$4 sm:$0xff]  }
 0x4d8   :  { %v5308_v6 = vpop.f32.mrf.mxu0 }
 0x4d9   :  { %2578 = vst.msk [vmem:[#allocation2 + $0xc] sm:$0xf] %vm2576_vm1, %v4916_v3  ;;  %v2498_v8 = vmax.f32 %v5307_v5, 0.0 }
 0x4da   :  { %v5309_v10 = vpop.f32.mrf.mxu0 }
 0x4db   :  { %v4917_v14 = vpack.c.bf16 %v2498_v8, %v2498_v8  ;;  %v5310_v16 = vadd.f32 %v5309_v10, %v5308_v6 }
 0x4dc   :  { %v5311_v22 = vpop.f32.mrf.mxu0 }
 0x4dd   :  { %2579 = vst.msk [vmem:[#allocation2 + $0x14] sm:$0xf] %vm2576_vm1, %v4917_v14  ;;  %v2499_v18 = vmax.f32 %v5310_v16, 0.0 }
 0x4de   :  { %v5312_v19 = vpop.f32.mrf.mxu0 }
 0x4df   :  { %v4918_v32 = vpack.c.bf16 %v2499_v18, %v2499_v18  ;;  %v5313_v25 = vadd.f32 %v5312_v19, %v5311_v22 }
 0x4e0   :  { %v5314_v43 = vpop.f32.mrf.mxu0  ;;  %v5857_v30 = vld [vmem:[#allocation2 + $0x4] ss:$8 sps:$4 sm:$0xff]  }
 0x4e1   :  { %2580 = vst.msk [vmem:[#allocation2 + $0x1c] sm:$0xf] %vm2576_vm1, %v4918_v32  ;;  %v2500_v48 = vmax.f32 %v5313_v25, 0.0  ;;  %2851 = vmatprep.mubr.bf16.mxu1 %v5857_v30  ;;  %v5872_v32 = vld [vmem:[#allocation2 + $0x50] ss:$8 sps:$4 sm:$0xff]  }
 0x4e2   :  { %v5315_v51 = vpop.f32.mrf.mxu0  ;;  %2852 = vmatmul.mubr.bf16.vlgmr.msra.gmra.mxu1 %v5855_v27 }
 0x4e3   :  { %v4919_v20 = vpack.c.bf16 %v2500_v48, %v2500_v48  ;;  %v5316_v31 = vadd.f32 %v5315_v51, %v5314_v43 }
 0x4e4   :  { %v5317_v34 = vpop.f32.mrf.mxu0 }
 0x4e5   :  { %2581 = vst.msk [vmem:[#allocation2 + $0x24] sm:$0xf] %vm2576_vm1, %v4919_v20  ;;  %v2501_v52 = vmax.f32 %v5316_v31, 0.0  ;;  %v5875_v31 = vld [vmem:[#allocation2 + $0x60] ss:$8 sps:$4 sm:$0xff]  }
 0x4e6   :  { %v5318_v21 = vpop.f32.mrf.mxu0 }
 0x4e7   :  { %v4920_v35 = vpack.c.bf16 %v2501_v52, %v2501_v52  ;;  %v5319_v36 = vadd.f32 %v5318_v21, %v5317_v34  ;;  %v5878_v52 = vld [vmem:[#allocation2 + $0x70] ss:$8 sps:$4 sm:$0xff]  }
 0x4e8   :  { %v5320_v56 = vpop.f32.mrf.mxu0  ;;  %v5858_v39 = vld [vmem:[#allocation2 + $0x14] ss:$8 sps:$4 sm:$0xff]  }
 0x4e9   :  { %2582 = vst.msk [vmem:[#allocation2 + $0x2c] sm:$0xf] %vm2576_vm1, %v4920_v35  ;;  %v2502_v58 = vmax.f32 %v5319_v36, 0.0  ;;  %2859 = vmatprep.mubr.bf16.mxu1 %v5858_v39  ;;  %v5879_v21 = vld [vmem:[%s7191_s3 + $0x178] sm:$0xff]   ;;  %v5881_v36 = vld [vmem:[%s7191_s3 + $0x170] sm:$0xff]   ;;  %v5883_v39 = vld [vmem:[%s7191_s3 + $0x168] sm:$0xff]  }
 0x4ea   :  { %v5321_v42 = vpop.f32.mrf.mxu0  ;;  %2860 = vmatmul.mubr.bf16.gmra.mxu1 %v5860_v41  ;;  %v5880_v35 = vld [vmem:[%s7191_s3 + $0x138] sm:$0xff]   ;;  %5411 = vmatprep.subr.bf16.mxu0 %v5879_v21  ;;  %v5884_v41 = vld [vmem:[%s7191_s3 + $0x128] sm:$0xff]  }
 0x4eb   :  { %v4921_v7 = vpack.c.bf16 %v2502_v58, %v2502_v58  ;;  %v5322_v44 = vadd.f32 %v5321_v42, %v5320_v56  ;;  %5412 = vmatpush3.bf16.msra.mxu0 %v5880_v35  ;;  %v5882_v56 = vld [vmem:[%s7191_s3 + $0x130] sm:$0xff]   ;;  %v5885_v58 = vld [vmem:[%s7191_s3 + $0x160] sm:$0xff]  }
 0x4ec   :  { %v5323_v28 = vpop.f32.mrf.mxu0  ;;  %5413 = vmatprep.subr.bf16.mxu0 %v5881_v36  ;;  %v5886_v42 = vld [vmem:[%s7191_s3 + $0x120] sm:$0xff]  }
 0x4ed   :  { %2583 = vst.msk [vmem:[#allocation2 + $0x34] sm:$0xf] %vm2576_vm1, %v4921_v7  ;;  %v2503_v29 = vmax.f32 %v5322_v44, 0.0  ;;  %v5887_v7 = vld [vmem:[%s7191_s3 + $0x158] sm:$0xff]  }
 0x4ee   :  { %v5324_v9 = vpop.f32.mrf.mxu0  ;;  %v5888_v44 = vld [vmem:[%s7191_s3 + $0x118] sm:$0xff]  }
 0x4ef   :  { %v4922_v46 = vpack.c.bf16 %v2503_v29, %v2503_v29  ;;  %v5325_v37 = vadd.f32 %v5324_v9, %v5323_v28  ;;  %5414 = vmatpush3.bf16.msra.mxu0 %v5882_v56  ;;  %v5889_v28 = vld [vmem:[%s7191_s3 + $0x150] sm:$0xff]   ;;  %v5891_v9 = vld [vmem:[%s7191_s3 + $0x148] sm:$0xff]  }
 0x4f0   :  { %v5326_v12 = vpop.f32.mrf.mxu0  ;;  %v5861_v59 = vld [vmem:[#allocation2 + $0x24] ss:$8 sps:$4 sm:$0xff]   ;;  %5415 = vmatprep.subr.bf16.mxu0 %v5883_v39  ;;  %v5890_v29 = vld [vmem:[%s7191_s3 + $0x110] sm:$0xff]  }
 0x4f1   :  { %2584 = vst.msk [vmem:[#allocation2 + $0x3c] sm:$0xf] %vm2576_vm1, %v4922_v46  ;;  %v2504_v26 = vmax.f32 %v5325_v37, 0.0  ;;  %2867 = vmatprep.mubr.bf16.mxu1 %v5861_v59  ;;  %v5892_v46 = vld [vmem:[%s7191_s3 + $0x108] sm:$0xff]   ;;  %v6860_v59 = vld [vmem:[%s7189_s5 + $0x3] ss:$0 sm:$0xff] }
 0x4f2   :  { %v5327_v55 = vpop.f32.mrf.mxu0  ;;  %2868 = vmatmul.mubr.bf16.gmra.mxu1 %v5863_v4  ;;  %v5893_v4 = vld [vmem:[%s7191_s3 + $0x140] sm:$0xff]  }
 0x4f3   :  { %v4923_v45 = vpack.c.bf16 %v2504_v26, %v2504_v26  ;;  %v5328_v11 = vadd.f32 %v5327_v55, %v5326_v12  ;;  %5416 = vmatpush3.bf16.msra.mxu0 %v5884_v41 }
 0x4f4   :  { %v5329_v49 = vpop.f32.mrf.mxu0  ;;  %5417 = vmatprep.subr.bf16.mxu0 %v5885_v58 }
 0x4f5   :  { %2585 = vst.msk [vmem:[#allocation2 + $0x44] sm:$0xf] %vm2576_vm1, %v4923_v45  ;;  %v2505_v47 = vmax.f32 %v5328_v11, 0.0 }
 0x4f6   :  { %v5330_v50 = vpop.f32.mrf.mxu0 }
 0x4f7   :  { %v4924_v53 = vpack.c.bf16 %v2505_v47, %v2505_v47  ;;  %v5331_v33 = vadd.f32 %v5330_v50, %v5329_v49  ;;  %5418 = vmatpush3.bf16.msra.mxu0 %v5886_v42  ;;  %v5894_v49 = vld [vmem:[%s7191_s3 + $0x100] sm:$0xff]  }
 0x4f8   :  { %v5332_v23 = vpop.f32.mrf.mxu0  ;;  %v5864_v54 = vld [vmem:[#allocation2 + $0x34] ss:$8 sps:$4 sm:$0xff]   ;;  %5419 = vmatprep.subr.bf16.mxu0 %v5887_v7 }
 0x4f9   :  { %2586 = vst.msk [vmem:[#allocation2 + $0x4c] sm:$0xf] %vm2576_vm1, %v4924_v53  ;;  %v2506_v60 = vmax.f32 %v5331_v33, 0.0  ;;  %2875 = vmatprep.mubr.bf16.mxu1 %v5864_v54 }
 0x4fa   :  { %v5333_v61 = vpop.f32.mrf.mxu0  ;;  %2876 = vmatmul.mubr.bf16.gmra.mxu1 %v5866_v57 }
 0x4fb   :  { %v4925_v62 = vpack.c.bf16 %v2506_v60, %v2506_v60  ;;  %v5334_v63 = vadd.f32 %v5333_v61, %v5332_v23  ;;  %5420 = vmatpush3.bf16.msra.mxu0 %v5888_v44 }
 0x4fc   :  { %v5335_v15 = vpop.f32.mrf.mxu0  ;;  %5421 = vmatprep.subr.bf16.mxu0 %v5889_v28 }
 0x4fd   :  { %2587 = vst.msk [vmem:[#allocation2 + $0x54] sm:$0xf] %vm2576_vm1, %v4925_v62  ;;  %v2507_v0 = vmax.f32 %v5334_v63, 0.0 }
 0x4fe   :  { %v5336_v38 = vpop.f32.mrf.mxu0 }
 0x4ff   :  { %v4926_v40 = vpack.c.bf16 %v2507_v0, %v2507_v0  ;;  %v5337_v17 = vadd.f32 %v5336_v38, %v5335_v15  ;;  %5422 = vmatpush3.bf16.msra.mxu0 %v5890_v29 }
 0x500   :  { %v5338_v1 = vpop.f32.mrf.mxu0  ;;  %v5867_v24 = vld [vmem:[#allocation2 + $0x44] ss:$8 sps:$4 sm:$0xff]   ;;  %5423 = vmatprep.subr.bf16.mxu0 %v5891_v9 }
 0x501   :  { %2588 = vst.msk [vmem:[#allocation2 + $0x5c] sm:$0xf] %vm2576_vm1, %v4926_v40  ;;  %v2508_v13 = vmax.f32 %v5337_v17, 0.0  ;;  %2883 = vmatprep.mubr.bf16.mxu1 %v5867_v24 }
 0x502   :  { %v5339_v3 = vpop.f32.mrf.mxu0  ;;  %2884 = vmatmul.mubr.bf16.gmra.mxu1 %v5869_v2 }
 0x503   :  { %v4927_v5 = vpack.c.bf16 %v2508_v13, %v2508_v13  ;;  %v5340_v6 = vadd.f32 %v5339_v3, %v5338_v1  ;;  %5424 = vmatpush3.bf16.msra.mxu0 %v5892_v46 }
 0x504   :  { %v5341_v8 = vpop.f32.mrf.mxu0  ;;  %5425 = vmatprep.subr.bf16.mxu0 %v5893_v4 }
 0x505   :  { %2589 = vst.msk [vmem:[#allocation2 + $0x64] sm:$0xf] %vm2576_vm1, %v4927_v5  ;;  %v2509_v10 = vmax.f32 %v5340_v6, 0.0 }
 0x506   :  { %v5342_v14 = vpop.f32.mrf.mxu0 }
 0x507   :  { %v4928_v16 = vpack.c.bf16 %v2509_v10, %v2509_v10  ;;  %v5343_v22 = vadd.f32 %v5342_v14, %v5341_v8  ;;  %5426 = vmatpush3.bf16.msra.mxu0 %v5894_v49 }
 0x508   :  { %v5344_v18 = vpop.f32.mrf.mxu0  ;;  %v5870_v19 = vld [vmem:[#allocation2 + $0x54] ss:$8 sps:$4 sm:$0xff]  }
 0x509   :  { %2590 = vst.msk [vmem:[#allocation2 + $0x6c] sm:$0xf] %vm2576_vm1, %v4928_v16  ;;  %v2510_v25 = vmax.f32 %v5343_v22, 0.0  ;;  %2891 = vmatprep.mubr.bf16.mxu1 %v5870_v19 }
 0x50a   :  { %v5345_v43 = vpop.f32.mrf.mxu0  ;;  %2892 = vmatmul.mubr.bf16.gmra.mxu1 %v5872_v32 }
 0x50b   :  { %v4929_v27 = vpack.c.bf16 %v2510_v25, %v2510_v25  ;;  %v5346_v30 = vadd.f32 %v5345_v43, %v5344_v18 }
 0x50d   :  { %2591 = vst.msk [vmem:[#allocation2 + $0x74] sm:$0xf] %vm2576_vm1, %v4929_v27  ;;  %v2511_v48 = vmax.f32 %v5346_v30, 0.0 }
 0x50f   :  { %v4930_v51 = vpack.c.bf16 %v2511_v48, %v2511_v48 }
 0x510   :  { %v5873_v20 = vld [vmem:[#allocation2 + $0x64] ss:$8 sps:$4 sm:$0xff]  }
 0x511   :  { %2592 = vst.msk [vmem:[#allocation2 + $0x7c] sm:$0xf] %vm2576_vm1, %v4930_v51  ;;  %2899 = vmatprep.mubr.bf16.mxu1 %v5873_v20 }
 0x512   :  { %2900 = vmatmul.mubr.bf16.gmra.mxu1 %v5875_v31 }
 0x518   :  { %v5876_v34 = vld [vmem:[#allocation2 + $0x74] ss:$8 sps:$4 sm:$0xff]  }
 0x519   :  { %2907 = vmatprep.mubr.bf16.mxu1 %v5876_v34 }
 0x51a   :  { %2908 = vmatmul.mubr.bf16.gmra.mxu1 %v5878_v52 }
 0x5a2   :  { %v5363_v37 = vpop.f32.mrf.mxu1 }
 0x5a4   :  { %v5364_v12 = vpop.f32.mrf.mxu1 }
 0x5a5   :  { %v5365_v26 = vadd.f32 %v5364_v12, %v5363_v37 }
 0x5a6   :  { %v5366_v55 = vpop.f32.mrf.mxu1 }
 0x5a7   :  { %v2854_v45 = vadd.f32 %v5365_v26, %v6860_v59 }
 0x5a8   :  { %v5367_v11 = vpop.f32.mrf.mxu1 }
 0x5a9   :  { %v5368_v47 = vadd.f32 %v5367_v11, %v5366_v55  ;;  %v2916_v50 = vmax.f32 %v2854_v45, 0.0 }
 0x5aa   :  { %v5369_v53 = vpop.f32.mrf.mxu1 }
 0x5ab   :  { %v2857_v33 = vadd.f32 %v5368_v47, %v6860_v59  ;;  %v4931_v23 = vpack.c.bf16 %v2916_v50, %v2916_v50 }
 0x5ac   :  { %v5370_v54 = vpop.f32.mrf.mxu1 }
 0x5ad   :  { %v2917_v57 = vmax.f32 %v2857_v33, 0.0  ;;  %v5371_v60 = vadd.f32 %v5370_v54, %v5369_v53  ;;  %2980 = vrot.lane.b32.xlu1 %v4931_v23, %s5991_s28 }
 0x5ae   :  { %v5372_v61 = vpop.f32.mrf.mxu1 }
 0x5af   :  { %v4932_v62 = vpack.c.bf16 %v2917_v57, %v2917_v57  ;;  %v2862_v63 = vadd.f32 %v5371_v60, %v6860_v59 }
 0x5b0   :  { %v5373_v15 = vpop.f32.mrf.mxu1 }
 0x5b1   :  { %v2918_v0 = vmax.f32 %v2862_v63, 0.0  ;;  %v5374_v38 = vadd.f32 %v5373_v15, %v5372_v61  ;;  %2982 = vrot.lane.b32.xlu1 %v4932_v62, %s5991_s28 }
 0x5b2   :  { %v5375_v40 = vpop.f32.mrf.mxu1 }
 0x5b3   :  { %v4933_v17 = vpack.c.bf16 %v2918_v0, %v2918_v0  ;;  %v2865_v1 = vadd.f32 %v5374_v38, %v6860_v59 }
 0x5b4   :  { %v5376_v24 = vpop.f32.mrf.mxu1 }
 0x5b5   :  { %v2919_v2 = vmax.f32 %v2865_v1, 0.0  ;;  %v5377_v13 = vadd.f32 %v5376_v24, %v5375_v40  ;;  %2984 = vrot.lane.b32.xlu0 %v4933_v17, %s5991_s28 }
 0x5b6   :  { %v5378_v3 = vpop.f32.mrf.mxu1 }
 0x5b7   :  { %v4934_v5 = vpack.c.bf16 %v2919_v2, %v2919_v2  ;;  %v2870_v6 = vadd.f32 %v5377_v13, %v6860_v59 }
 0x5b8   :  { %v5379_v8 = vpop.f32.mrf.mxu1 }
 0x5b9   :  { %v2920_v10 = vmax.f32 %v2870_v6, 0.0  ;;  %v5380_v14 = vadd.f32 %v5379_v8, %v5378_v3  ;;  %2986 = vrot.lane.b32.xlu1 %v4934_v5, %s5991_s28 }
 0x5ba   :  { %v5381_v16 = vpop.f32.mrf.mxu1 }
 0x5bb   :  { %v4935_v22 = vpack.c.bf16 %v2920_v10, %v2920_v10  ;;  %v2873_v18 = vadd.f32 %v5380_v14, %v6860_v59 }
 0x5bc   :  { %v5382_v19 = vpop.f32.mrf.mxu1 }
 0x5bd   :  { %v2921_v32 = vmax.f32 %v2873_v18, 0.0  ;;  %v5383_v25 = vadd.f32 %v5382_v19, %v5381_v16  ;;  %2988 = vrot.lane.b32.xlu0 %v4935_v22, %s5991_s28 }
 0x5be   :  { %v5384_v43 = vpop.f32.mrf.mxu1 }
 0x5bf   :  { %v4936_v27 = vpack.c.bf16 %v2921_v32, %v2921_v32  ;;  %v2878_v30 = vadd.f32 %v5383_v25, %v6860_v59  ;;  %v5895_v25 = vld [vmem:[#allocation2] ss:$8 sps:$4 sm:$0xff]  }
 0x5c0   :  { %v5385_v48 = vpop.f32.mrf.mxu1 }
 0x5c1   :  { %v2922_v51 = vmax.f32 %v2878_v30, 0.0  ;;  %v5386_v20 = vadd.f32 %v5385_v48, %v5384_v43  ;;  %2990 = vrot.lane.b32.xlu1 %v4936_v27, %s5991_s28 }
 0x5c2   :  { %v5387_v31 = vpop.f32.mrf.mxu1 }
 0x5c3   :  { %v4937_v34 = vpack.c.bf16 %v2922_v51, %v2922_v51  ;;  %v2881_v52 = vadd.f32 %v5386_v20, %v6860_v59 }
 0x5c4   :  { %v5388_v21 = vpop.f32.mrf.mxu1 }
 0x5c5   :  { %v2923_v35 = vmax.f32 %v2881_v52, 0.0  ;;  %v5389_v36 = vadd.f32 %v5388_v21, %v5387_v31  ;;  %2992 = vrot.lane.b32.xlu0 %v4937_v34, %s5991_s28 }
 0x5c6   :  { %v5390_v56 = vpop.f32.mrf.mxu1 }
 0x5c7   :  { %v4938_v39 = vpack.c.bf16 %v2923_v35, %v2923_v35  ;;  %v2886_v41 = vadd.f32 %v5389_v36, %v6860_v59 }
 0x5c8   :  { %v5391_v58 = vpop.f32.mrf.mxu1 }
 0x5c9   :  { %v2924_v42 = vmax.f32 %v2886_v41, 0.0  ;;  %v5392_v7 = vadd.f32 %v5391_v58, %v5390_v56  ;;  %2994 = vrot.lane.b32.xlu1 %v4938_v39, %s5991_s28 }
 0x5ca   :  { %v5393_v44 = vpop.f32.mrf.mxu1 }
 0x5cb   :  { %v4939_v28 = vpack.c.bf16 %v2924_v42, %v2924_v42  ;;  %v2889_v29 = vadd.f32 %v5392_v7, %v6860_v59 }
 0x5cc   :  { %v5394_v9 = vpop.f32.mrf.mxu1 }
 0x5cd   :  { %v2925_v46 = vmax.f32 %v2889_v29, 0.0  ;;  %v5395_v37 = vadd.f32 %v5394_v9, %v5393_v44  ;;  %2996 = vrot.lane.b32.xlu0 %v4939_v28, %s5991_s28 }
 0x5ce   :  { %v5396_v12 = vpop.f32.mrf.mxu1 }
 0x5cf   :  { %v4940_v4 = vpack.c.bf16 %v2925_v46, %v2925_v46  ;;  %v2894_v26 = vadd.f32 %v5395_v37, %v6860_v59 }
 0x5d0   :  { %v5397_v55 = vpop.f32.mrf.mxu1 }
 0x5d1   :  { %v2926_v45 = vmax.f32 %v2894_v26, 0.0  ;;  %v5398_v11 = vadd.f32 %v5397_v55, %v5396_v12  ;;  %2998 = vrot.lane.b32.xlu1 %v4940_v4, %s5991_s28 }
 0x5d2   :  { %v5399_v49 = vpop.f32.mrf.mxu1 }
 0x5d3   :  { %v4941_v47 = vpack.c.bf16 %v2926_v45, %v2926_v45  ;;  %v2897_v50 = vadd.f32 %v5398_v11, %v6860_v59 }
 0x5d4   :  { %v5400_v53 = vpop.f32.mrf.mxu1 }
 0x5d5   :  { %v2927_v33 = vmax.f32 %v2897_v50, 0.0  ;;  %v5401_v23 = vadd.f32 %v5400_v53, %v5399_v49  ;;  %3000 = vrot.lane.b32.xlu0 %v4941_v47, %s5991_s28  ;;  %v5910_v53 = vld [vmem:[#allocation2 + $0x60] ss:$8 sps:$4 sm:$0xff]  }
 0x5d6   :  { %v5402_v54 = vpop.f32.mrf.mxu1 }
 0x5d7   :  { %v4942_v57 = vpack.c.bf16 %v2927_v33, %v2927_v33  ;;  %v2902_v60 = vadd.f32 %v5401_v23, %v6860_v59  ;;  %v5913_v23 = vld [vmem:[#allocation2 + $0x70] ss:$8 sps:$4 sm:$0xff]  }
 0x5d8   :  { %v5403_v61 = vpop.f32.mrf.mxu1 }
 0x5d9   :  { %v2928_v62 = vmax.f32 %v2902_v60, 0.0  ;;  %v5404_v63 = vadd.f32 %v5403_v61, %v5402_v54  ;;  %3002 = vrot.lane.b32.xlu1 %v4942_v57, %s5991_s28  ;;  %v5914_v54 = vld [vmem:[%s7191_s3 + $0x1f8] sm:$0xff]   ;;  %v5916_v60 = vld [vmem:[%s7191_s3 + $0x1f0] sm:$0xff]  }
 0x5da   :  { %v5405_v15 = vpop.f32.mrf.mxu1  ;;  %v5915_v57 = vld [vmem:[%s7191_s3 + $0x1b8] sm:$0xff]   ;;  %5475 = vmatprep.subr.bf16.mxu1 %v5914_v54  ;;  %v5917_v61 = vld [vmem:[%s7191_s3 + $0x1b0] sm:$0xff]  }
 0x5db   :  { %v4943_v0 = vpack.c.bf16 %v2928_v62, %v2928_v62  ;;  %v2905_v38 = vadd.f32 %v5404_v63, %v6860_v59  ;;  %5476 = vmatpush3.bf16.msra.mxu1 %v5915_v57  ;;  %v5918_v62 = vld [vmem:[%s7191_s3 + $0x1e8] sm:$0xff]  }
 0x5dc   :  { %v5406_v40 = vpop.f32.mrf.mxu1  ;;  %5477 = vmatprep.subr.bf16.mxu1 %v5916_v60  ;;  %v5919_v63 = vld [vmem:[%s7191_s3 + $0x1a8] sm:$0xff]  }
 0x5dd   :  { %v2929_v17 = vmax.f32 %v2905_v38, 0.0  ;;  %v5407_v1 = vadd.f32 %v5406_v40, %v5405_v15  ;;  %3004 = vrot.lane.b32.xlu0 %v4943_v0, %s5991_s28  ;;  %v5920_v15 = vld [vmem:[%s7191_s3 + $0x1e0] sm:$0xff]   ;;  %v5922_v38 = vld [vmem:[%s7191_s3 + $0x1d8] sm:$0xff]  }
 0x5de   :  { %v5408_v24 = vpop.f32.mrf.mxu1  ;;  %v5921_v0 = vld [vmem:[%s7191_s3 + $0x1a0] sm:$0xff]   ;;  %v5923_v40 = vld [vmem:[%s7191_s3 + $0x198] sm:$0xff]  }
 0x5df   :  { %v4944_v2 = vpack.c.bf16 %v2929_v17, %v2929_v17  ;;  %v2910_v13 = vadd.f32 %v5407_v1, %v6860_v59  ;;  %5478 = vmatpush3.bf16.msra.mxu1 %v5917_v61  ;;  %v5924_v17 = vld [vmem:[%s7191_s3 + $0x1d0] sm:$0xff]  }
 0x5e0   :  { %v5409_v3 = vpop.f32.mrf.mxu1  ;;  %5479 = vmatprep.subr.bf16.mxu1 %v5918_v62  ;;  %v5925_v1 = vld [vmem:[%s7191_s3 + $0x190] sm:$0xff]  }
 0x5e1   :  { %v2930_v5 = vmax.f32 %v2910_v13, 0.0  ;;  %v5410_v6 = vadd.f32 %v5409_v3, %v5408_v24  ;;  %3006 = vrot.lane.b32.xlu1 %v4944_v2, %s5991_s28  ;;  %v5926_v24 = vld [vmem:[%s7191_s3 + $0x1c8] sm:$0xff]   ;;  %v6961_v3 = vld [vmem:[%s7189_s5 + $0x4] ss:$0 sm:$0xff] }
 0x5e2   :  { %v5927_v2 = vld [vmem:[%s7191_s3 + $0x188] sm:$0xff]  }
 0x5e3   :  { %v4945_v8 = vpack.c.bf16 %v2930_v5, %v2930_v5  ;;  %v2913_v10 = vadd.f32 %v5410_v6, %v6860_v59  ;;  %5480 = vmatpush3.bf16.msra.mxu1 %v5919_v63  ;;  %v5928_v6 = vld [vmem:[%s7191_s3 + $0x1c0] sm:$0xff]  }
 0x5e4   :  { %5481 = vmatprep.subr.bf16.mxu1 %v5920_v15 }
 0x5e5   :  { %v2931_v14 = vmax.f32 %v2913_v10, 0.0  ;;  %3008 = vrot.lane.b32.xlu0 %v4945_v8, %s5991_s28 }
 0x5e7   :  { %v4946_v16 = vpack.c.bf16 %v2931_v14, %v2931_v14  ;;  %5482 = vmatpush3.bf16.msra.mxu1 %v5921_v0 }
 0x5e8   :  { %5483 = vmatprep.subr.bf16.mxu1 %v5922_v38 }
 0x5e9   :  { %3010 = vrot.lane.b32.xlu1 %v4946_v16, %s5991_s28 }
 0x5eb   :  { %5484 = vmatpush3.bf16.msra.mxu1 %v5923_v40 }
 0x5ec   :  { %5485 = vmatprep.subr.bf16.mxu1 %v5924_v17 }
 0x5ef   :  { %5486 = vmatpush3.bf16.msra.mxu1 %v5925_v1 }
 0x5f0   :  { %5487 = vmatprep.subr.bf16.mxu1 %v5926_v24 }
 0x5f3   :  { %5488 = vmatpush3.bf16.msra.mxu1 %v5927_v2 }
 0x5f4   :  { %5489 = vmatprep.subr.bf16.mxu1 %v5928_v6 }
 0x61f   :  { %v2981_v22 = vpop.permute.xlu1 %2980 }
 0x620   :  { %3029 = vst.msk [vmem:[#allocation2 + $0x4] sm:$0xf] %vm3028_vm2, %v2981_v22  ;;  %v5929_v22 = vld [vmem:[%s7191_s3 + $0x180] sm:$0xff]  }
 0x621   :  { %5490 = vmatpush3.bf16.msra.mxu1 %v5929_v22 }
 0x623   :  { %v2983_v18 = vpop.permute.xlu1 %2982 }
 0x624   :  { %3030 = vst.msk [vmem:[#allocation2 + $0xc] sm:$0xf] %vm3028_vm2, %v2983_v18 }
 0x627   :  { %v2985_v19 = vpop.permute.xlu0 %2984 }
 0x628   :  { %3031 = vst.msk [vmem:[#allocation2 + $0x14] sm:$0xf] %vm3028_vm2, %v2985_v19 }
 0x62b   :  { %v2987_v32 = vpop.permute.xlu1 %2986  ;;  %v5897_v43 = vld [vmem:[#allocation2 + $0x4] ss:$8 sps:$4 sm:$0xff]  }
 0x62c   :  { %3032 = vst.msk [vmem:[#allocation2 + $0x1c] sm:$0xf] %vm3028_vm2, %v2987_v32  ;;  %3303 = vmatprep.mubr.bf16.mxu0 %v5897_v43 }
 0x62d   :  { %3304 = vmatmul.mubr.bf16.vlgmr.msra.gmra.mxu0 %v5895_v25 }
 0x62f   :  { %v2989_v59 = vpop.permute.xlu0 %2988  ;;  %v3047_v30 = vld [vmem:[#allocation2 + $0x10] sm:$0xff] }
 0x630   :  { %3033 = vst.msk [vmem:[#allocation2 + $0x24] sm:$0xf] %vm3028_vm2, %v2989_v59 }
 0x633   :  { %v2991_v27 = vpop.permute.xlu1 %2990  ;;  %v3048_v48 = vld [vmem:[#allocation2 + $0x18] sm:$0xff] }
 0x634   :  { %v5898_v51 = vld [vmem:[#allocation2 + $0x14] ss:$8 sps:$4 sm:$0xff]   ;;  %3034 = vst.msk [vmem:[#allocation2 + $0x2c] sm:$0xf] %vm3028_vm2, %v2991_v27  ;;  %v4741_v20 = vcombine.low %v3047_v30, %v3048_v48 }
 0x635   :  { %3311 = vmatprep.mubr.bf16.mxu0 %v5898_v51 }
 0x636   :  { %3312 = vmatmul.mubr.bf16.gmra.mxu0 %v4741_v20 }
 0x637   :  { %v2993_v31 = vpop.permute.xlu0 %2992  ;;  %v3049_v52 = vld [vmem:[#allocation2 + $0x20] sm:$0xff] }
 0x638   :  { %3035 = vst.msk [vmem:[#allocation2 + $0x34] sm:$0xf] %vm3028_vm2, %v2993_v31 }
 0x63b   :  { %v2995_v34 = vpop.permute.xlu1 %2994  ;;  %v3050_v21 = vld [vmem:[#allocation2 + $0x28] sm:$0xff] }
 0x63c   :  { %v5900_v35 = vld [vmem:[#allocation2 + $0x24] ss:$8 sps:$4 sm:$0xff]   ;;  %3036 = vst.msk [vmem:[#allocation2 + $0x3c] sm:$0xf] %vm3028_vm2, %v2995_v34  ;;  %v4743_v36 = vcombine.low %v3049_v52, %v3050_v21 }
 0x63d   :  { %3319 = vmatprep.mubr.bf16.mxu0 %v5900_v35 }
 0x63e   :  { %3320 = vmatmul.mubr.bf16.gmra.mxu0 %v4743_v36 }
 0x63f   :  { %v2997_v56 = vpop.permute.xlu0 %2996  ;;  %v3051_v41 = vld [vmem:[#allocation2 + $0x30] sm:$0xff] }
 0x640   :  { %3037 = vst.msk [vmem:[#allocation2 + $0x44] sm:$0xf] %vm3028_vm2, %v2997_v56 }
 0x643   :  { %v2999_v39 = vpop.permute.xlu1 %2998  ;;  %v3052_v58 = vld [vmem:[#allocation2 + $0x38] sm:$0xff] }
 0x644   :  { %v5902_v42 = vld [vmem:[#allocation2 + $0x34] ss:$8 sps:$4 sm:$0xff]   ;;  %3038 = vst.msk [vmem:[#allocation2 + $0x4c] sm:$0xf] %vm3028_vm2, %v2999_v39  ;;  %v4745_v7 = vcombine.low %v3051_v41, %v3052_v58 }
 0x645   :  { %3327 = vmatprep.mubr.bf16.mxu0 %v5902_v42 }
 0x646   :  { %3328 = vmatmul.mubr.bf16.gmra.mxu0 %v4745_v7 }
 0x647   :  { %v3001_v44 = vpop.permute.xlu0 %3000  ;;  %v3053_v29 = vld [vmem:[#allocation2 + $0x40] sm:$0xff] }
 0x648   :  { %3039 = vst.msk [vmem:[#allocation2 + $0x54] sm:$0xf] %vm3028_vm2, %v3001_v44 }
 0x64b   :  { %v3003_v28 = vpop.permute.xlu1 %3002  ;;  %v3054_v9 = vld [vmem:[#allocation2 + $0x48] sm:$0xff] }
 0x64c   :  { %v5904_v46 = vld [vmem:[#allocation2 + $0x44] ss:$8 sps:$4 sm:$0xff]   ;;  %3040 = vst.msk [vmem:[#allocation2 + $0x5c] sm:$0xf] %vm3028_vm2, %v3003_v28  ;;  %v4747_v37 = vcombine.low %v3053_v29, %v3054_v9 }
 0x64d   :  { %3335 = vmatprep.mubr.bf16.mxu0 %v5904_v46 }
 0x64e   :  { %3336 = vmatmul.mubr.bf16.gmra.mxu0 %v4747_v37 }
 0x64f   :  { %v3005_v12 = vpop.permute.xlu0 %3004  ;;  %v3055_v26 = vld [vmem:[#allocation2 + $0x50] sm:$0xff] }
 0x650   :  { %3041 = vst.msk [vmem:[#allocation2 + $0x64] sm:$0xf] %vm3028_vm2, %v3005_v12 }
 0x653   :  { %v3007_v4 = vpop.permute.xlu1 %3006  ;;  %v3056_v55 = vld [vmem:[#allocation2 + $0x58] sm:$0xff] }
 0x654   :  { %v5906_v45 = vld [vmem:[#allocation2 + $0x54] ss:$8 sps:$4 sm:$0xff]   ;;  %3042 = vst.msk [vmem:[#allocation2 + $0x6c] sm:$0xf] %vm3028_vm2, %v3007_v4  ;;  %v4749_v11 = vcombine.low %v3055_v26, %v3056_v55 }
 0x655   :  { %3343 = vmatprep.mubr.bf16.mxu0 %v5906_v45 }
 0x656   :  { %3344 = vmatmul.mubr.bf16.gmra.mxu0 %v4749_v11 }
 0x657   :  { %v3009_v49 = vpop.permute.xlu0 %3008 }
 0x658   :  { %3043 = vst.msk [vmem:[#allocation2 + $0x74] sm:$0xf] %vm3028_vm2, %v3009_v49 }
 0x65b   :  { %v3011_v47 = vpop.permute.xlu1 %3010  ;;  %v5908_v50 = vld [vmem:[#allocation2 + $0x64] ss:$8 sps:$4 sm:$0xff]  }
 0x65c   :  { %3044 = vst.msk [vmem:[#allocation2 + $0x7c] sm:$0xf] %vm3028_vm2, %v3011_v47  ;;  %3351 = vmatprep.mubr.bf16.mxu0 %v5908_v50 }
 0x65e   :  { %3352 = vmatmul.mubr.bf16.gmra.mxu0 %v5910_v53 }
 0x663   :  { %v5911_v33 = vld [vmem:[#allocation2 + $0x74] ss:$8 sps:$4 sm:$0xff]  }
 0x664   :  { %3359 = vmatprep.mubr.bf16.mxu0 %v5911_v33 }
 0x666   :  { %3360 = vmatmul.mubr.bf16.gmra.mxu0 %v5913_v23 }
 0x6ed   :  { %v5427_v13 = vpop.f32.mrf.mxu0 }
 0x6ef   :  { %v5428_v5 = vpop.f32.mrf.mxu0 }
 0x6f0   :  { %v5429_v8 = vadd.f32 %v5428_v5, %v5427_v13 }
 0x6f1   :  { %v5430_v10 = vpop.f32.mrf.mxu0 }
 0x6f2   :  { %v3306_v14 = vadd.f32 %v5429_v8, %v6961_v3 }
 0x6f3   :  { %v5431_v16 = vpop.f32.mrf.mxu0 }
 0x6f4   :  { %v3368_v18 = vmax.f32 %v3306_v14, 0.0  ;;  %v5432_v19 = vadd.f32 %v5431_v16, %v5430_v10 }
 0x6f6   :  { %v5433_v32 = vpop.f32.mrf.mxu0  ;;  %v4947_v25 = vpack.c.bf16 %v3368_v18, %v3368_v18  ;;  %v3309_v43 = vadd.f32 %v5432_v19, %v6961_v3 }
 0x6f8   :  { %v5434_v59 = vpop.f32.mrf.mxu0  ;;  %v3369_v27 = vmax.f32 %v3309_v43, 0.0  ;;  %3432 = vrot.lane.b32.xlu0 %v4947_v25, %s5989_s11 }
 0x6f9   :  { %v5435_v30 = vadd.f32 %v5434_v59, %v5433_v32 }
 0x6fa   :  { %v5436_v48 = vpop.f32.mrf.mxu0  ;;  %v4948_v51 = vpack.c.bf16 %v3369_v27, %v3369_v27 }
 0x6fb   :  { %v3314_v20 = vadd.f32 %v5435_v30, %v6961_v3 }
 0x6fc   :  { %v5437_v31 = vpop.f32.mrf.mxu0  ;;  %3434 = vrot.lane.b32.xlu1 %v4948_v51, %s5989_s11 }
 0x6fd   :  { %v3370_v34 = vmax.f32 %v3314_v20, 0.0  ;;  %v5438_v52 = vadd.f32 %v5437_v31, %v5436_v48 }
 0x6fe   :  { %v5439_v21 = vpop.f32.mrf.mxu0 }
 0x6ff   :  { %v4949_v35 = vpack.c.bf16 %v3370_v34, %v3370_v34  ;;  %v3317_v36 = vadd.f32 %v5438_v52, %v6961_v3 }
 0x700   :  { %v5440_v56 = vpop.f32.mrf.mxu0 }
 0x701   :  { %v3371_v39 = vmax.f32 %v3317_v36, 0.0  ;;  %v5441_v41 = vadd.f32 %v5440_v56, %v5439_v21  ;;  %3436 = vrot.lane.b32.xlu0 %v4949_v35, %s5989_s11 }
 0x702   :  { %v5442_v58 = vpop.f32.mrf.mxu0 }
 0x703   :  { %v4950_v42 = vpack.c.bf16 %v3371_v39, %v3371_v39  ;;  %v3322_v7 = vadd.f32 %v5441_v41, %v6961_v3 }
 0x704   :  { %v5443_v44 = vpop.f32.mrf.mxu0 }
 0x705   :  { %v3372_v28 = vmax.f32 %v3322_v7, 0.0  ;;  %v5444_v29 = vadd.f32 %v5443_v44, %v5442_v58  ;;  %3438 = vrot.lane.b32.xlu1 %v4950_v42, %s5989_s11 }
 0x706   :  { %v5445_v9 = vpop.f32.mrf.mxu0 }
 0x707   :  { %v4951_v46 = vpack.c.bf16 %v3372_v28, %v3372_v28  ;;  %v3325_v37 = vadd.f32 %v5444_v29, %v6961_v3 }
 0x708   :  { %v5446_v12 = vpop.f32.mrf.mxu0 }
 0x709   :  { %v3373_v4 = vmax.f32 %v3325_v37, 0.0  ;;  %v5447_v26 = vadd.f32 %v5446_v12, %v5445_v9  ;;  %3440 = vrot.lane.b32.xlu0 %v4951_v46, %s5989_s11 }
 0x70a   :  { %v5448_v55 = vpop.f32.mrf.mxu0 }
 0x70b   :  { %v4952_v45 = vpack.c.bf16 %v3373_v4, %v3373_v4  ;;  %v3330_v11 = vadd.f32 %v5447_v26, %v6961_v3  ;;  %v5930_v26 = vld [vmem:[#allocation2] ss:$8 sps:$4 sm:$0xff]  }
 0x70c   :  { %v5449_v49 = vpop.f32.mrf.mxu0 }
 0x70d   :  { %v3374_v47 = vmax.f32 %v3330_v11, 0.0  ;;  %v5450_v50 = vadd.f32 %v5449_v49, %v5448_v55  ;;  %3442 = vrot.lane.b32.xlu1 %v4952_v45, %s5989_s11 }
 0x70e   :  { %v5451_v53 = vpop.f32.mrf.mxu0 }
 0x70f   :  { %v4953_v33 = vpack.c.bf16 %v3374_v47, %v3374_v47  ;;  %v3333_v23 = vadd.f32 %v5450_v50, %v6961_v3 }
 0x710   :  { %v5452_v54 = vpop.f32.mrf.mxu0 }
 0x711   :  { %v3375_v57 = vmax.f32 %v3333_v23, 0.0  ;;  %v5453_v60 = vadd.f32 %v5452_v54, %v5451_v53  ;;  %3444 = vrot.lane.b32.xlu0 %v4953_v33, %s5989_s11 }
 0x712   :  { %v5454_v61 = vpop.f32.mrf.mxu0 }
 0x713   :  { %v4954_v62 = vpack.c.bf16 %v3375_v57, %v3375_v57  ;;  %v3338_v63 = vadd.f32 %v5453_v60, %v6961_v3 }
 0x714   :  { %v5455_v15 = vpop.f32.mrf.mxu0 }
 0x715   :  { %v3376_v0 = vmax.f32 %v3338_v63, 0.0  ;;  %v5456_v38 = vadd.f32 %v5455_v15, %v5454_v61  ;;  %3446 = vrot.lane.b32.xlu1 %v4954_v62, %s5989_s11 }
 0x716   :  { %v5457_v40 = vpop.f32.mrf.mxu0 }
 0x717   :  { %v4955_v17 = vpack.c.bf16 %v3376_v0, %v3376_v0  ;;  %v3341_v1 = vadd.f32 %v5456_v38, %v6961_v3 }
 0x718   :  { %v5458_v24 = vpop.f32.mrf.mxu0 }
 0x719   :  { %v3377_v2 = vmax.f32 %v3341_v1, 0.0  ;;  %v5459_v13 = vadd.f32 %v5458_v24, %v5457_v40  ;;  %3448 = vrot.lane.b32.xlu0 %v4955_v17, %s5989_s11 }
 0x71a   :  { %v5460_v5 = vpop.f32.mrf.mxu0 }
 0x71b   :  { %v4956_v6 = vpack.c.bf16 %v3377_v2, %v3377_v2  ;;  %v3346_v8 = vadd.f32 %v5459_v13, %v6961_v3 }
 0x71c   :  { %v5461_v10 = vpop.f32.mrf.mxu0 }
 0x71d   :  { %v3378_v14 = vmax.f32 %v3346_v8, 0.0  ;;  %v5462_v16 = vadd.f32 %v5461_v10, %v5460_v5  ;;  %3450 = vrot.lane.b32.xlu1 %v4956_v6, %s5989_s11 }
 0x71e   :  { %v5463_v22 = vpop.f32.mrf.mxu0 }
 0x71f   :  { %v4957_v18 = vpack.c.bf16 %v3378_v14, %v3378_v14  ;;  %v3349_v19 = vadd.f32 %v5462_v16, %v6961_v3 }
 0x720   :  { %v5464_v32 = vpop.f32.mrf.mxu0 }
 0x721   :  { %v3379_v25 = vmax.f32 %v3349_v19, 0.0  ;;  %v5465_v43 = vadd.f32 %v5464_v32, %v5463_v22  ;;  %3452 = vrot.lane.b32.xlu0 %v4957_v18, %s5989_s11  ;;  %v5945_v32 = vld [vmem:[#allocation2 + $0x60] ss:$8 sps:$4 sm:$0xff]  }
 0x722   :  { %v5466_v59 = vpop.f32.mrf.mxu0 }
 0x723   :  { %v4958_v27 = vpack.c.bf16 %v3379_v25, %v3379_v25  ;;  %v3354_v30 = vadd.f32 %v5465_v43, %v6961_v3  ;;  %v5948_v43 = vld [vmem:[#allocation2 + $0x70] ss:$8 sps:$4 sm:$0xff]  }
 0x724   :  { %v5467_v48 = vpop.f32.mrf.mxu0 }
 0x725   :  { %v3380_v51 = vmax.f32 %v3354_v30, 0.0  ;;  %v5468_v20 = vadd.f32 %v5467_v48, %v5466_v59  ;;  %3454 = vrot.lane.b32.xlu1 %v4958_v27, %s5989_s11  ;;  %v5949_v59 = vld [vmem:[%s7192_s4 + $0x78] sm:$0xff]   ;;  %v5951_v30 = vld [vmem:[%s7192_s4 + $0x70] sm:$0xff]  }
 0x726   :  { %v5469_v31 = vpop.f32.mrf.mxu0  ;;  %v5950_v27 = vld [vmem:[%s7192_s4 + $0x38] sm:$0xff]   ;;  %5539 = vmatprep.subr.bf16.mxu0 %v5949_v59  ;;  %v5952_v48 = vld [vmem:[%s7192_s4 + $0x30] sm:$0xff]  }
 0x727   :  { %v4959_v34 = vpack.c.bf16 %v3380_v51, %v3380_v51  ;;  %v3357_v52 = vadd.f32 %v5468_v20, %v6961_v3  ;;  %5540 = vmatpush3.bf16.msra.mxu0 %v5950_v27  ;;  %v5953_v51 = vld [vmem:[%s7192_s4 + $0x68] sm:$0xff]  }
 0x728   :  { %v5470_v21 = vpop.f32.mrf.mxu0  ;;  %5541 = vmatprep.subr.bf16.mxu0 %v5951_v30  ;;  %v5954_v20 = vld [vmem:[%s7192_s4 + $0x28] sm:$0xff]  }
 0x729   :  { %v3381_v35 = vmax.f32 %v3357_v52, 0.0  ;;  %v5471_v36 = vadd.f32 %v5470_v21, %v5469_v31  ;;  %3456 = vrot.lane.b32.xlu0 %v4959_v34, %s5989_s11  ;;  %v5955_v31 = vld [vmem:[%s7192_s4 + $0x60] sm:$0xff]   ;;  %v5957_v52 = vld [vmem:[%s7192_s4 + $0x58] sm:$0xff]  }
 0x72a   :  { %v5472_v56 = vpop.f32.mrf.mxu0  ;;  %v5956_v34 = vld [vmem:[%s7192_s4 + $0x20] sm:$0xff]   ;;  %v5958_v21 = vld [vmem:[%s7192_s4 + $0x18] sm:$0xff]  }
 0x72b   :  { %v4960_v39 = vpack.c.bf16 %v3381_v35, %v3381_v35  ;;  %v3362_v41 = vadd.f32 %v5471_v36, %v6961_v3  ;;  %5542 = vmatpush3.bf16.msra.mxu0 %v5952_v48  ;;  %v5959_v35 = vld [vmem:[%s7192_s4 + $0x50] sm:$0xff]  }
 0x72c   :  { %v5473_v58 = vpop.f32.mrf.mxu0  ;;  %5543 = vmatprep.subr.bf16.mxu0 %v5953_v51  ;;  %v5960_v36 = vld [vmem:[%s7192_s4 + $0x10] sm:$0xff]  }
 0x72d   :  { %v3382_v42 = vmax.f32 %v3362_v41, 0.0  ;;  %v5474_v7 = vadd.f32 %v5473_v58, %v5472_v56  ;;  %3458 = vrot.lane.b32.xlu1 %v4960_v39, %s5989_s11  ;;  %v5961_v56 = vld [vmem:[%s7192_s4 + $0x48] sm:$0xff]   ;;  %v7062_v58 = vld [vmem:[%s7189_s5 + $0x5] ss:$0 sm:$0xff] }
 0x72e   :  { %v5962_v39 = vld [vmem:[%s7192_s4 + $0x8] sm:$0xff]  }
 0x72f   :  { %v4961_v44 = vpack.c.bf16 %v3382_v42, %v3382_v42  ;;  %v3365_v28 = vadd.f32 %v5474_v7, %v6961_v3  ;;  %5544 = vmatpush3.bf16.msra.mxu0 %v5954_v20  ;;  %v5963_v7 = vld [vmem:[%s7192_s4 + $0x40] sm:$0xff]  }
 0x730   :  { %5545 = vmatprep.subr.bf16.mxu0 %v5955_v31 }
 0x731   :  { %v3383_v29 = vmax.f32 %v3365_v28, 0.0  ;;  %3460 = vrot.lane.b32.xlu0 %v4961_v44, %s5989_s11 }
 0x733   :  { %v4962_v9 = vpack.c.bf16 %v3383_v29, %v3383_v29  ;;  %5546 = vmatpush3.bf16.msra.mxu0 %v5956_v34 }
 0x734   :  { %5547 = vmatprep.subr.bf16.mxu0 %v5957_v52 }
 0x735   :  { %3462 = vrot.lane.b32.xlu1 %v4962_v9, %s5989_s11 }
 0x737   :  { %5548 = vmatpush3.bf16.msra.mxu0 %v5958_v21 }
 0x738   :  { %5549 = vmatprep.subr.bf16.mxu0 %v5959_v35 }
 0x73b   :  { %5550 = vmatpush3.bf16.msra.mxu0 %v5960_v36 }
 0x73c   :  { %5551 = vmatprep.subr.bf16.mxu0 %v5961_v56 }
 0x73f   :  { %5552 = vmatpush3.bf16.msra.mxu0 %v5962_v39 }
 0x740   :  { %5553 = vmatprep.subr.bf16.mxu0 %v5963_v7 }
 0x76a   :  { %v3433_v46 = vpop.permute.xlu0 %3432 }
 0x76b   :  { %3481 = vst.msk [vmem:[#allocation2 + $0x4] sm:$0xf] %vm3480_vm3, %v3433_v46  ;;  %v5964_v46 = vld [vmem:[%s7192_s4] sm:$0xff]  }
 0x76c   :  { %5554 = vmatpush3.bf16.msra.mxu0 %v5964_v46 }
 0x76e   :  { %v3435_v37 = vpop.permute.xlu1 %3434 }
 0x76f   :  { %3482 = vst.msk [vmem:[#allocation2 + $0xc] sm:$0xf] %vm3480_vm3, %v3435_v37 }
 0x773   :  { %v3437_v12 = vpop.permute.xlu0 %3436 }
 0x774   :  { %3483 = vst.msk [vmem:[#allocation2 + $0x14] sm:$0xf] %vm3480_vm3, %v3437_v12 }
 0x776   :  { %v5932_v55 = vld [vmem:[#allocation2 + $0x4] ss:$8 sps:$4 sm:$0xff]  }
 0x777   :  { %v3439_v4 = vpop.permute.xlu1 %3438  ;;  %3755 = vmatprep.mubr.bf16.mxu1 %v5932_v55 }
 0x778   :  { %3484 = vst.msk [vmem:[#allocation2 + $0x1c] sm:$0xf] %vm3480_vm3, %v3439_v4  ;;  %3756 = vmatmul.mubr.bf16.vlgmr.msra.gmra.mxu1 %v5930_v26 }
 0x77b   :  { %v3441_v3 = vpop.permute.xlu0 %3440  ;;  %v3499_v11 = vld [vmem:[#allocation2 + $0x10] sm:$0xff] }
 0x77c   :  { %3485 = vst.msk [vmem:[#allocation2 + $0x24] sm:$0xf] %vm3480_vm3, %v3441_v3 }
 0x77f   :  { %v3443_v45 = vpop.permute.xlu1 %3442  ;;  %v3500_v49 = vld [vmem:[#allocation2 + $0x18] sm:$0xff] }
 0x780   :  { %v5933_v47 = vld [vmem:[#allocation2 + $0x14] ss:$8 sps:$4 sm:$0xff]   ;;  %3486 = vst.msk [vmem:[#allocation2 + $0x2c] sm:$0xf] %vm3480_vm3, %v3443_v45  ;;  %v4821_v50 = vcombine.low %v3499_v11, %v3500_v49 }
 0x781   :  { %3763 = vmatprep.mubr.bf16.mxu1 %v5933_v47 }
 0x782   :  { %3764 = vmatmul.mubr.bf16.gmra.mxu1 %v4821_v50 }
 0x783   :  { %v3445_v53 = vpop.permute.xlu0 %3444  ;;  %v3501_v23 = vld [vmem:[#allocation2 + $0x20] sm:$0xff] }
 0x784   :  { %3487 = vst.msk [vmem:[#allocation2 + $0x34] sm:$0xf] %vm3480_vm3, %v3445_v53 }
 0x787   :  { %v3447_v33 = vpop.permute.xlu1 %3446  ;;  %v3502_v54 = vld [vmem:[#allocation2 + $0x28] sm:$0xff] }
 0x788   :  { %v5935_v57 = vld [vmem:[#allocation2 + $0x24] ss:$8 sps:$4 sm:$0xff]   ;;  %3488 = vst.msk [vmem:[#allocation2 + $0x3c] sm:$0xf] %vm3480_vm3, %v3447_v33  ;;  %v4823_v60 = vcombine.low %v3501_v23, %v3502_v54 }
 0x789   :  { %3771 = vmatprep.mubr.bf16.mxu1 %v5935_v57 }
 0x78a   :  { %3772 = vmatmul.mubr.bf16.gmra.mxu1 %v4823_v60 }
 0x78b   :  { %v3449_v61 = vpop.permute.xlu0 %3448  ;;  %v3503_v63 = vld [vmem:[#allocation2 + $0x30] sm:$0xff] }
 0x78c   :  { %3489 = vst.msk [vmem:[#allocation2 + $0x44] sm:$0xf] %vm3480_vm3, %v3449_v61 }
 0x78f   :  { %v3451_v62 = vpop.permute.xlu1 %3450  ;;  %v3504_v15 = vld [vmem:[#allocation2 + $0x38] sm:$0xff] }
 0x790   :  { %v5937_v0 = vld [vmem:[#allocation2 + $0x34] ss:$8 sps:$4 sm:$0xff]   ;;  %3490 = vst.msk [vmem:[#allocation2 + $0x4c] sm:$0xf] %vm3480_vm3, %v3451_v62  ;;  %v4825_v38 = vcombine.low %v3503_v63, %v3504_v15 }
 0x791   :  { %3779 = vmatprep.mubr.bf16.mxu1 %v5937_v0 }
 0x792   :  { %3780 = vmatmul.mubr.bf16.gmra.mxu1 %v4825_v38 }
 0x793   :  { %v3453_v40 = vpop.permute.xlu0 %3452  ;;  %v3505_v1 = vld [vmem:[#allocation2 + $0x40] sm:$0xff] }
 0x794   :  { %3491 = vst.msk [vmem:[#allocation2 + $0x54] sm:$0xf] %vm3480_vm3, %v3453_v40 }
 0x797   :  { %v3455_v17 = vpop.permute.xlu1 %3454  ;;  %v3506_v24 = vld [vmem:[#allocation2 + $0x48] sm:$0xff] }
 0x798   :  { %v5939_v2 = vld [vmem:[#allocation2 + $0x44] ss:$8 sps:$4 sm:$0xff]   ;;  %3492 = vst.msk [vmem:[#allocation2 + $0x5c] sm:$0xf] %vm3480_vm3, %v3455_v17  ;;  %v4827_v13 = vcombine.low %v3505_v1, %v3506_v24 }
 0x799   :  { %3787 = vmatprep.mubr.bf16.mxu1 %v5939_v2 }
 0x79a   :  { %3788 = vmatmul.mubr.bf16.gmra.mxu1 %v4827_v13 }
 0x79b   :  { %v3457_v5 = vpop.permute.xlu0 %3456  ;;  %v3507_v8 = vld [vmem:[#allocation2 + $0x50] sm:$0xff] }
 0x79c   :  { %3493 = vst.msk [vmem:[#allocation2 + $0x64] sm:$0xf] %vm3480_vm3, %v3457_v5 }
 0x79f   :  { %v3459_v6 = vpop.permute.xlu1 %3458  ;;  %v3508_v10 = vld [vmem:[#allocation2 + $0x58] sm:$0xff] }
 0x7a0   :  { %v5941_v14 = vld [vmem:[#allocation2 + $0x54] ss:$8 sps:$4 sm:$0xff]   ;;  %3494 = vst.msk [vmem:[#allocation2 + $0x6c] sm:$0xf] %vm3480_vm3, %v3459_v6  ;;  %v4829_v16 = vcombine.low %v3507_v8, %v3508_v10 }
 0x7a1   :  { %3795 = vmatprep.mubr.bf16.mxu1 %v5941_v14 }
 0x7a2   :  { %3796 = vmatmul.mubr.bf16.gmra.mxu1 %v4829_v16 }
 0x7a3   :  { %v3461_v22 = vpop.permute.xlu0 %3460 }
 0x7a4   :  { %3495 = vst.msk [vmem:[#allocation2 + $0x74] sm:$0xf] %vm3480_vm3, %v3461_v22 }
 0x7a7   :  { %v3463_v18 = vpop.permute.xlu1 %3462  ;;  %v5943_v19 = vld [vmem:[#allocation2 + $0x64] ss:$8 sps:$4 sm:$0xff]  }
 0x7a8   :  { %3496 = vst.msk [vmem:[#allocation2 + $0x7c] sm:$0xf] %vm3480_vm3, %v3463_v18  ;;  %3803 = vmatprep.mubr.bf16.mxu1 %v5943_v19 }
 0x7aa   :  { %3804 = vmatmul.mubr.bf16.gmra.mxu1 %v5945_v32 }
 0x7af   :  { %v5946_v25 = vld [vmem:[#allocation2 + $0x74] ss:$8 sps:$4 sm:$0xff]  }
 0x7b0   :  { %3811 = vmatprep.mubr.bf16.mxu1 %v5946_v25 }
 0x7b2   :  { %3812 = vmatmul.mubr.bf16.gmra.mxu1 %v5948_v43 }
 0x838   :  { %v5491_v41 = vpop.f32.mrf.mxu1 }
 0x83a   :  { %v5492_v42 = vpop.f32.mrf.mxu1 }
 0x83b   :  { %v5493_v44 = vadd.f32 %v5492_v42, %v5491_v41 }
 0x83c   :  { %v5494_v28 = vpop.f32.mrf.mxu1 }
 0x83d   :  { %v3758_v29 = vadd.f32 %v5493_v44, %v7062_v58 }
 0x83e   :  { %v5495_v9 = vpop.f32.mrf.mxu1 }
 0x83f   :  { %v3820_v37 = vmax.f32 %v3758_v29, 0.0  ;;  %v5496_v12 = vadd.f32 %v5495_v9, %v5494_v28 }
 0x841   :  { %v4963_v26 = vpack.c.bf16 %v3820_v37, %v3820_v37  ;;  %v3761_v55 = vadd.f32 %v5496_v12, %v7062_v58 }
 0x842   :  { %v5497_v4 = vpop.f32.mrf.mxu1 }
 0x843   :  { %v3821_v45 = vmax.f32 %v3761_v55, 0.0  ;;  %3884 = vrot.lane.b32.xlu0 %v4963_v26, %s5992_s16 }
 0x844   :  { %v5498_v3 = vpop.f32.mrf.mxu1 }
 0x845   :  { %v5499_v11 = vadd.f32 %v5498_v3, %v5497_v4  ;;  %v4964_v47 = vpack.c.bf16 %v3821_v45, %v3821_v45 }
 0x846   :  { %v5500_v49 = vpop.f32.mrf.mxu1 }
 0x847   :  { %v3766_v50 = vadd.f32 %v5499_v11, %v7062_v58  ;;  %3886 = vrot.lane.b32.xlu1 %v4964_v47, %s5992_s16 }
 0x848   :  { %v5501_v53 = vpop.f32.mrf.mxu1 }
 0x849   :  { %v3822_v33 = vmax.f32 %v3766_v50, 0.0  ;;  %v5502_v23 = vadd.f32 %v5501_v53, %v5500_v49 }
 0x84a   :  { %v5503_v54 = vpop.f32.mrf.mxu1 }
 0x84b   :  { %v4965_v57 = vpack.c.bf16 %v3822_v33, %v3822_v33  ;;  %v3769_v60 = vadd.f32 %v5502_v23, %v7062_v58 }
 0x84c   :  { %v5504_v61 = vpop.f32.mrf.mxu1 }
 0x84d   :  { %v3823_v62 = vmax.f32 %v3769_v60, 0.0  ;;  %v5505_v63 = vadd.f32 %v5504_v61, %v5503_v54  ;;  %3888 = vrot.lane.b32.xlu0 %v4965_v57, %s5992_s16 }
 0x84e   :  { %v5506_v15 = vpop.f32.mrf.mxu1 }
 0x84f   :  { %v4966_v0 = vpack.c.bf16 %v3823_v62, %v3823_v62  ;;  %v3774_v38 = vadd.f32 %v5505_v63, %v7062_v58 }
 0x850   :  { %v5507_v40 = vpop.f32.mrf.mxu1 }
 0x851   :  { %v3824_v17 = vmax.f32 %v3774_v38, 0.0  ;;  %v5508_v1 = vadd.f32 %v5507_v40, %v5506_v15  ;;  %3890 = vrot.lane.b32.xlu1 %v4966_v0, %s5992_s16 }
 0x852   :  { %v5509_v24 = vpop.f32.mrf.mxu1 }
 0x853   :  { %v4967_v2 = vpack.c.bf16 %v3824_v17, %v3824_v17  ;;  %v3777_v13 = vadd.f32 %v5508_v1, %v7062_v58 }
 0x854   :  { %v5510_v5 = vpop.f32.mrf.mxu1 }
 0x855   :  { %v3825_v6 = vmax.f32 %v3777_v13, 0.0  ;;  %v5511_v8 = vadd.f32 %v5510_v5, %v5509_v24  ;;  %3892 = vrot.lane.b32.xlu0 %v4967_v2, %s5992_s16 }
 0x856   :  { %v5512_v10 = vpop.f32.mrf.mxu1 }
 0x857   :  { %v4968_v14 = vpack.c.bf16 %v3825_v6, %v3825_v6  ;;  %v3782_v16 = vadd.f32 %v5511_v8, %v7062_v58  ;;  %v5965_v8 = vld [vmem:[#allocation2] ss:$8 sps:$4 sm:$0xff]  }
 0x858   :  { %v5513_v22 = vpop.f32.mrf.mxu1 }
 0x859   :  { %v3826_v18 = vmax.f32 %v3782_v16, 0.0  ;;  %v5514_v19 = vadd.f32 %v5513_v22, %v5512_v10  ;;  %3894 = vrot.lane.b32.xlu1 %v4968_v14, %s5992_s16  ;;  %v5968_v16 = vld [vmem:[#allocation2 + $0x10] ss:$8 sps:$4 sm:$0xff]  }
 0x85a   :  { %v5515_v32 = vpop.f32.mrf.mxu1 }
 0x85b   :  { %v4969_v25 = vpack.c.bf16 %v3826_v18, %v3826_v18  ;;  %v3785_v43 = vadd.f32 %v5514_v19, %v7062_v58 }
 0x85c   :  { %v5516_v59 = vpop.f32.mrf.mxu1 }
 0x85d   :  { %v3827_v27 = vmax.f32 %v3785_v43, 0.0  ;;  %v5517_v30 = vadd.f32 %v5516_v59, %v5515_v32  ;;  %3896 = vrot.lane.b32.xlu0 %v4969_v25, %s5992_s16  ;;  %v5971_v32 = vld [vmem:[#allocation2 + $0x20] ss:$8 sps:$4 sm:$0xff]  }
 0x85e   :  { %v5518_v48 = vpop.f32.mrf.mxu1 }
 0x85f   :  { %v4970_v51 = vpack.c.bf16 %v3827_v27, %v3827_v27  ;;  %v3790_v20 = vadd.f32 %v5517_v30, %v7062_v58  ;;  %v5974_v27 = vld [vmem:[#allocation2 + $0x30] ss:$8 sps:$4 sm:$0xff]  }
 0x860   :  { %v5519_v31 = vpop.f32.mrf.mxu1 }
 0x861   :  { %v3828_v34 = vmax.f32 %v3790_v20, 0.0  ;;  %v5520_v52 = vadd.f32 %v5519_v31, %v5518_v48  ;;  %3898 = vrot.lane.b32.xlu1 %v4970_v51, %s5992_s16  ;;  %v5977_v20 = vld [vmem:[#allocation2 + $0x40] ss:$8 sps:$4 sm:$0xff]  }
 0x862   :  { %v5521_v21 = vpop.f32.mrf.mxu1 }
 0x863   :  { %v4971_v35 = vpack.c.bf16 %v3828_v34, %v3828_v34  ;;  %v3793_v36 = vadd.f32 %v5520_v52, %v7062_v58 }
 0x864   :  { %v5522_v56 = vpop.f32.mrf.mxu1 }
 0x865   :  { %v3829_v39 = vmax.f32 %v3793_v36, 0.0  ;;  %v5523_v41 = vadd.f32 %v5522_v56, %v5521_v21  ;;  %3900 = vrot.lane.b32.xlu0 %v4971_v35, %s5992_s16  ;;  %v5980_v21 = vld [vmem:[#allocation2 + $0x50] ss:$8 sps:$4 sm:$0xff]  }
 0x866   :  { %v5524_v42 = vpop.f32.mrf.mxu1 }
 0x867   :  { %v4972_v7 = vpack.c.bf16 %v3829_v39, %v3829_v39  ;;  %v3798_v44 = vadd.f32 %v5523_v41, %v7062_v58  ;;  %v5983_v39 = vld [vmem:[#allocation2 + $0x60] ss:$8 sps:$4 sm:$0xff]  }
 0x868   :  { %v5525_v28 = vpop.f32.mrf.mxu1 }
 0x869   :  { %v3830_v29 = vmax.f32 %v3798_v44, 0.0  ;;  %v5526_v9 = vadd.f32 %v5525_v28, %v5524_v42  ;;  %3902 = vrot.lane.b32.xlu1 %v4972_v7, %s5992_s16  ;;  %v5986_v42 = vld [vmem:[#allocation2 + $0x70] ss:$8 sps:$4 sm:$0xff]   ;;  %v7121_v28 = vld [vmem:[%s7189_s5 + $0x2] ss:$0 sm:$0xff] }
 0x86a   :  { %v5527_v46 = vpop.f32.mrf.mxu1 }
 0x86b   :  { %v4973_v37 = vpack.c.bf16 %v3830_v29, %v3830_v29  ;;  %v3801_v12 = vadd.f32 %v5526_v9, %v7062_v58 }
 0x86c   :  { %v5528_v4 = vpop.f32.mrf.mxu1 }
 0x86d   :  { %v3831_v26 = vmax.f32 %v3801_v12, 0.0  ;;  %v5529_v55 = vadd.f32 %v5528_v4, %v5527_v46  ;;  %3904 = vrot.lane.b32.xlu0 %v4973_v37, %s5992_s16 }
 0x86e   :  { %v5530_v3 = vpop.f32.mrf.mxu1 }
 0x86f   :  { %v4974_v45 = vpack.c.bf16 %v3831_v26, %v3831_v26  ;;  %v3806_v11 = vadd.f32 %v5529_v55, %v7062_v58 }
 0x870   :  { %v5531_v49 = vpop.f32.mrf.mxu1 }
 0x871   :  { %v3832_v47 = vmax.f32 %v3806_v11, 0.0  ;;  %v5532_v50 = vadd.f32 %v5531_v49, %v5530_v3  ;;  %3906 = vrot.lane.b32.xlu1 %v4974_v45, %s5992_s16 }
 0x872   :  { %v5533_v53 = vpop.f32.mrf.mxu1 }
 0x873   :  { %v4975_v33 = vpack.c.bf16 %v3832_v47, %v3832_v47  ;;  %v3809_v23 = vadd.f32 %v5532_v50, %v7062_v58 }
 0x874   :  { %v5534_v54 = vpop.f32.mrf.mxu1 }
 0x875   :  { %v3833_v57 = vmax.f32 %v3809_v23, 0.0  ;;  %v5535_v60 = vadd.f32 %v5534_v54, %v5533_v53  ;;  %3908 = vrot.lane.b32.xlu0 %v4975_v33, %s5992_s16 }
 0x876   :  { %v5536_v61 = vpop.f32.mrf.mxu1 }
 0x877   :  { %v4976_v62 = vpack.c.bf16 %v3833_v57, %v3833_v57  ;;  %v3814_v63 = vadd.f32 %v5535_v60, %v7062_v58 }
 0x878   :  { %v5537_v15 = vpop.f32.mrf.mxu1 }
 0x879   :  { %v3834_v0 = vmax.f32 %v3814_v63, 0.0  ;;  %v5538_v38 = vadd.f32 %v5537_v15, %v5536_v61  ;;  %3910 = vrot.lane.b32.xlu1 %v4976_v62, %s5992_s16 }
 0x87b   :  { %v4977_v40 = vpack.c.bf16 %v3834_v0, %v3834_v0  ;;  %v3817_v17 = vadd.f32 %v5538_v38, %v7062_v58 }
 0x87d   :  { %v3835_v1 = vmax.f32 %v3817_v17, 0.0  ;;  %3912 = vrot.lane.b32.xlu0 %v4977_v40, %s5992_s16 }
 0x87f   :  { %v4978_v24 = vpack.c.bf16 %v3835_v1, %v3835_v1 }
 0x881   :  { %3914 = vrot.lane.b32.xlu1 %v4978_v24, %s5992_s16 }
 0x8b5   :  { %v3885_v2 = vpop.permute.xlu0 %3884 }
 0x8b6   :  { %3933 = vst.msk [vmem:[#allocation2 + $0x4] sm:$0xf] %vm3932_vm4, %v3885_v2 }
 0x8b9   :  { %v3887_v13 = vpop.permute.xlu1 %3886 }
 0x8ba   :  { %3934 = vst.msk [vmem:[#allocation2 + $0xc] sm:$0xf] %vm3932_vm4, %v3887_v13 }
 0x8bf   :  { %v3889_v5 = vpop.permute.xlu0 %3888 }
 0x8c0   :  { %3935 = vst.msk [vmem:[#allocation2 + $0x14] sm:$0xf] %vm3932_vm4, %v3889_v5 }
 0x8c1   :  { %v5967_v10 = vld [vmem:[#allocation2 + $0x4] ss:$8 sps:$4 sm:$0xff]  }
 0x8c2   :  { %4206 = vmatprep.mubr.bf16.mxu0 %v5967_v10 }
 0x8c3   :  { %v3891_v6 = vpop.permute.xlu1 %3890  ;;  %4207 = vmatmul.mubr.bf16.vlgmr.msra.gmra.mxu0 %v5965_v8 }
 0x8c4   :  { %3936 = vst.msk [vmem:[#allocation2 + $0x1c] sm:$0xf] %vm3932_vm4, %v3891_v6 }
 0x8c7   :  { %v3893_v58 = vpop.permute.xlu0 %3892 }
 0x8c8   :  { %3937 = vst.msk [vmem:[#allocation2 + $0x24] sm:$0xf] %vm3932_vm4, %v3893_v58 }
 0x8cb   :  { %v3895_v14 = vpop.permute.xlu1 %3894  ;;  %v5970_v22 = vld [vmem:[#allocation2 + $0x14] ss:$8 sps:$4 sm:$0xff]  }
 0x8cc   :  { %3938 = vst.msk [vmem:[#allocation2 + $0x2c] sm:$0xf] %vm3932_vm4, %v3895_v14  ;;  %4214 = vmatprep.mubr.bf16.mxu0 %v5970_v22 }
 0x8cd   :  { %4215 = vmatmul.mubr.bf16.gmra.mxu0 %v5968_v16 }
 0x8cf   :  { %v3897_v18 = vpop.permute.xlu0 %3896 }
 0x8d0   :  { %3939 = vst.msk [vmem:[#allocation2 + $0x34] sm:$0xf] %vm3932_vm4, %v3897_v18 }
 0x8d3   :  { %v3899_v19 = vpop.permute.xlu1 %3898  ;;  %v5973_v25 = vld [vmem:[#allocation2 + $0x24] ss:$8 sps:$4 sm:$0xff]  }
 0x8d4   :  { %3940 = vst.msk [vmem:[#allocation2 + $0x3c] sm:$0xf] %vm3932_vm4, %v3899_v19  ;;  %4222 = vmatprep.mubr.bf16.mxu0 %v5973_v25 }
 0x8d5   :  { %4223 = vmatmul.mubr.bf16.gmra.mxu0 %v5971_v32 }
 0x8d7   :  { %v3901_v43 = vpop.permute.xlu0 %3900 }
 0x8d8   :  { %3941 = vst.msk [vmem:[#allocation2 + $0x44] sm:$0xf] %vm3932_vm4, %v3901_v43 }
 0x8db   :  { %v3903_v59 = vpop.permute.xlu1 %3902  ;;  %v5976_v30 = vld [vmem:[#allocation2 + $0x34] ss:$8 sps:$4 sm:$0xff]  }
 0x8dc   :  { %3942 = vst.msk [vmem:[#allocation2 + $0x4c] sm:$0xf] %vm3932_vm4, %v3903_v59  ;;  %4230 = vmatprep.mubr.bf16.mxu0 %v5976_v30 }
 0x8dd   :  { %4231 = vmatmul.mubr.bf16.gmra.mxu0 %v5974_v27 }
 0x8df   :  { %v3905_v48 = vpop.permute.xlu0 %3904 }
 0x8e0   :  { %3943 = vst.msk [vmem:[#allocation2 + $0x54] sm:$0xf] %vm3932_vm4, %v3905_v48 }
 0x8e3   :  { %v3907_v51 = vpop.permute.xlu1 %3906  ;;  %v5979_v31 = vld [vmem:[#allocation2 + $0x44] ss:$8 sps:$4 sm:$0xff]  }
 0x8e4   :  { %3944 = vst.msk [vmem:[#allocation2 + $0x5c] sm:$0xf] %vm3932_vm4, %v3907_v51  ;;  %4238 = vmatprep.mubr.bf16.mxu0 %v5979_v31 }
 0x8e5   :  { %4239 = vmatmul.mubr.bf16.gmra.mxu0 %v5977_v20 }
 0x8e7   :  { %v3909_v34 = vpop.permute.xlu0 %3908 }
 0x8e8   :  { %3945 = vst.msk [vmem:[#allocation2 + $0x64] sm:$0xf] %vm3932_vm4, %v3909_v34 }
 0x8eb   :  { %v3911_v52 = vpop.permute.xlu1 %3910  ;;  %v5982_v35 = vld [vmem:[#allocation2 + $0x54] ss:$8 sps:$4 sm:$0xff]  }
 0x8ec   :  { %3946 = vst.msk [vmem:[#allocation2 + $0x6c] sm:$0xf] %vm3932_vm4, %v3911_v52  ;;  %4246 = vmatprep.mubr.bf16.mxu0 %v5982_v35 }
 0x8ed   :  { %4247 = vmatmul.mubr.bf16.gmra.mxu0 %v5980_v21 }
 0x8ef   :  { %v3913_v36 = vpop.permute.xlu0 %3912 }
 0x8f0   :  { %3947 = vst.msk [vmem:[#allocation2 + $0x74] sm:$0xf] %vm3932_vm4, %v3913_v36 }
 0x8f3   :  { %v3915_v56 = vpop.permute.xlu1 %3914  ;;  %v5985_v41 = vld [vmem:[#allocation2 + $0x64] ss:$8 sps:$4 sm:$0xff]  }
 0x8f4   :  { %3948 = vst.msk [vmem:[#allocation2 + $0x7c] sm:$0xf] %vm3932_vm4, %v3915_v56  ;;  %4254 = vmatprep.mubr.bf16.mxu0 %v5985_v41 }
 0x8f5   :  { %4255 = vmatmul.mubr.bf16.gmra.mxu0 %v5983_v39 }
 0x8fb   :  { %v5988_v7 = vld [vmem:[#allocation2 + $0x74] ss:$8 sps:$4 sm:$0xff]  }
 0x8fc   :  { %4262 = vmatprep.mubr.bf16.mxu0 %v5988_v7 }
 0x8fd   :  { %4263 = vmatmul.mubr.bf16.gmra.mxu0 %v5986_v42 }
 0x983   :  { %v5555_v44 = vpop.f32.mrf.mxu0 }
 0x985   :  { %v5556_v29 = vpop.f32.mrf.mxu0 }
 0x986   :  { %v5557_v9 = vadd.f32 %v5556_v29, %v5555_v44 }
 0x987   :  { %v5558_v46 = vpop.f32.mrf.mxu0 }
 0x988   :  { %v4209_v37 = vadd.f32 %v5557_v9, %v7121_v28 }
 0x989   :  { %v5559_v12 = vpop.f32.mrf.mxu0 }
 0x98a   :  { %4271 = vst [vmem:[%s7193_s6] sm:$0xff] %v4209_v37  ;;  %v5560_v4 = vadd.f32 %v5559_v12, %v5558_v46 }
 0x98c   :  { %v4212_v55 = vadd.f32 %v5560_v4, %v7121_v28 }
 0x98d   :  { %v5561_v26 = vpop.f32.mrf.mxu0 }
 0x98e   :  { %4272 = vst [vmem:[%s7193_s6 + $0x8] sm:$0xff] %v4212_v55 }
 0x98f   :  { %v5562_v3 = vpop.f32.mrf.mxu0 }
 0x990   :  { %v5563_v45 = vadd.f32 %v5562_v3, %v5561_v26 }
 0x991   :  { %v5564_v11 = vpop.f32.mrf.mxu0 }
 0x992   :  { %v4217_v49 = vadd.f32 %v5563_v45, %v7121_v28 }
 0x993   :  { %v5565_v47 = vpop.f32.mrf.mxu0 }
 0x994   :  { %4273 = vst [vmem:[%s7193_s6 + $0x10] sm:$0xff] %v4217_v49  ;;  %v5566_v50 = vadd.f32 %v5565_v47, %v5564_v11 }
 0x995   :  { %v5567_v53 = vpop.f32.mrf.mxu0 }
 0x996   :  { %v4220_v33 = vadd.f32 %v5566_v50, %v7121_v28 }
 0x997   :  { %v5568_v23 = vpop.f32.mrf.mxu0 }
 0x998   :  { %4274 = vst [vmem:[%s7193_s6 + $0x18] sm:$0xff] %v4220_v33  ;;  %v5569_v54 = vadd.f32 %v5568_v23, %v5567_v53 }
 0x999   :  { %v5570_v57 = vpop.f32.mrf.mxu0 }
 0x99a   :  { %v4225_v60 = vadd.f32 %v5569_v54, %v7121_v28 }
 0x99b   :  { %v5571_v61 = vpop.f32.mrf.mxu0 }
 0x99c   :  { %4275 = vst [vmem:[%s7193_s6 + $0x20] sm:$0xff] %v4225_v60  ;;  %v5572_v62 = vadd.f32 %v5571_v61, %v5570_v57 }
 0x99d   :  { %v5573_v63 = vpop.f32.mrf.mxu0 }
 0x99e   :  { %v4228_v15 = vadd.f32 %v5572_v62, %v7121_v28 }
 0x99f   :  { %v5574_v0 = vpop.f32.mrf.mxu0 }
 0x9a0   :  { %4276 = vst [vmem:[%s7193_s6 + $0x28] sm:$0xff] %v4228_v15  ;;  %v5575_v38 = vadd.f32 %v5574_v0, %v5573_v63 }
 0x9a1   :  { %v5576_v40 = vpop.f32.mrf.mxu0 }
 0x9a2   :  { %v4233_v17 = vadd.f32 %v5575_v38, %v7121_v28 }
 0x9a3   :  { %v5577_v1 = vpop.f32.mrf.mxu0 }
 0x9a4   :  { %4277 = vst [vmem:[%s7193_s6 + $0x30] sm:$0xff] %v4233_v17  ;;  %v5578_v24 = vadd.f32 %v5577_v1, %v5576_v40 }
 0x9a5   :  { %v5579_v2 = vpop.f32.mrf.mxu0 }
 0x9a6   :  { %v4236_v13 = vadd.f32 %v5578_v24, %v7121_v28 }
 0x9a7   :  { %v5580_v5 = vpop.f32.mrf.mxu0 }
 0x9a8   :  { %4278 = vst [vmem:[%s7193_s6 + $0x38] sm:$0xff] %v4236_v13  ;;  %v5581_v6 = vadd.f32 %v5580_v5, %v5579_v2 }
 0x9a9   :  { %v5582_v8 = vpop.f32.mrf.mxu0 }
 0x9aa   :  { %v4241_v10 = vadd.f32 %v5581_v6, %v7121_v28 }
 0x9ab   :  { %v5583_v58 = vpop.f32.mrf.mxu0 }
 0x9ac   :  { %4279 = vst [vmem:[%s7193_s6 + $0x40] sm:$0xff] %v4241_v10  ;;  %v5584_v14 = vadd.f32 %v5583_v58, %v5582_v8 }
 0x9ad   :  { %v5585_v16 = vpop.f32.mrf.mxu0 }
 0x9ae   :  { %v4244_v22 = vadd.f32 %v5584_v14, %v7121_v28 }
 0x9af   :  { %v5586_v18 = vpop.f32.mrf.mxu0 }
 0x9b0   :  { %4280 = vst [vmem:[%s7193_s6 + $0x48] sm:$0xff] %v4244_v22  ;;  %v5587_v19 = vadd.f32 %v5586_v18, %v5585_v16 }
 0x9b1   :  { %v5588_v32 = vpop.f32.mrf.mxu0 }
 0x9b2   :  { %v4249_v25 = vadd.f32 %v5587_v19, %v7121_v28 }
 0x9b3   :  { %v5589_v43 = vpop.f32.mrf.mxu0 }
 0x9b4   :  { %4281 = vst [vmem:[%s7193_s6 + $0x50] sm:$0xff] %v4249_v25  ;;  %v5590_v59 = vadd.f32 %v5589_v43, %v5588_v32 }
 0x9b5   :  { %v5591_v27 = vpop.f32.mrf.mxu0 }
 0x9b6   :  { %v4252_v30 = vadd.f32 %v5590_v59, %v7121_v28 }
 0x9b7   :  { %v5592_v48 = vpop.f32.mrf.mxu0 }
 0x9b8   :  { %4282 = vst [vmem:[%s7193_s6 + $0x58] sm:$0xff] %v4252_v30  ;;  %v5593_v51 = vadd.f32 %v5592_v48, %v5591_v27 }
 0x9b9   :  { %v5594_v20 = vpop.f32.mrf.mxu0 }
 0x9ba   :  { %v4257_v31 = vadd.f32 %v5593_v51, %v7121_v28 }
 0x9bb   :  { %v5595_v34 = vpop.f32.mrf.mxu0 }
 0x9bc   :  { %4283 = vst [vmem:[%s7193_s6 + $0x60] sm:$0xff] %v4257_v31  ;;  %v5596_v52 = vadd.f32 %v5595_v34, %v5594_v20 }
 0x9bd   :  { %v5597_v21 = vpop.f32.mrf.mxu0 }
 0x9be   :  { %v4260_v35 = vadd.f32 %v5596_v52, %v7121_v28 }
 0x9bf   :  { %v5598_v36 = vpop.f32.mrf.mxu0 }
 0x9c0   :  { %4284 = vst [vmem:[%s7193_s6 + $0x68] sm:$0xff] %v4260_v35  ;;  %v5599_v56 = vadd.f32 %v5598_v36, %v5597_v21 }
 0x9c1   :  { %v5600_v39 = vpop.f32.mrf.mxu0 }
 0x9c2   :  { %v4265_v41 = vadd.f32 %v5599_v56, %v7121_v28 }
 0x9c3   :  { %v5601_v42 = vpop.f32.mrf.mxu0 }
 0x9c4   :  { %4285 = vst [vmem:[%s7193_s6 + $0x70] sm:$0xff] %v4265_v41  ;;  %v5602_v7 = vadd.f32 %v5601_v42, %v5600_v39 }
 0x9c6   :  { %v4268_v44 = vadd.f32 %v5602_v7, %v7121_v28 }
 0x9c8   :  { %4286 = vst [vmem:[%s7193_s6 + $0x78] sm:$0xff] %v4268_v44 }

</bundles_post_ra>
